<compile_context>
chip_gen: v7x
topology: tpu7x:2x2x1
jax: 0.10.0
libtpu: 0.0.40
codegen_flags: <defaults>
</compile_context>

<pallas_src>
import jax
import jax.numpy as jnp
from jax import lax
from jax.experimental import pallas as pl
from jax.experimental.pallas import tpu as pltpu

_LANE = 128


# ---------------------------------------------------------------------------
# In-kernel math helpers (f32 everywhere; exp / reciprocal go to the EUP slot)
# ---------------------------------------------------------------------------
def _erf(x):
    # Abramowitz & Stegun 7.1.26 (max abs err ~1.5e-7).
    a1, a2, a3, a4, a5 = 0.254829592, -0.284496736, 1.421413741, -1.453152027, 1.061405429
    p = 0.3275911
    ax = jnp.abs(x)
    t = pl.reciprocal(1.0 + p * ax, approx=True)          # EUP vrcp, VALU-free
    poly = ((((a5 * t + a4) * t + a3) * t + a2) * t + a1) * t
    y = 1.0 - poly * jnp.exp(-ax * ax)
    return jnp.where(x >= 0, y, -y)


def _gelu(x):
    # exact GELU: x * 0.5 * (1 + erf(x / sqrt(2)))
    return 0.5 * x * (1.0 + _erf(x * 0.7071067811865476))


# ---------------------------------------------------------------------------
# Pallas kernel: grid = (batch, H-row tile).  Input block = full image (reused
# across the row tiles of one image), output block = TH rows, all lane-dense.
# ---------------------------------------------------------------------------
def bottleneck_kernel(x_ref, w1_ref, w2_ref, w3_ref, bn_ref, o_ref, hp_ref):
    H, W, Cp = x_ref.shape            # full image (batch dim squeezed away)
    TH = o_ref.shape[0]               # rows produced by this grid step
    t = pl.program_id(1)
    row0 = pl.multiple_of(t * TH, TH)

    # ---- hoisted, fused BN scale/bias (read once) --------------------------
    s1, b1 = bn_ref[0], bn_ref[1]
    s2, b2 = bn_ref[2], bn_ref[3]
    s3, b3 = bn_ref[4], bn_ref[5]

    # ---- gather TH + 2 input rows (halo rows clamped; zeroed below) --------
    idx_top = jnp.maximum(row0 - 1, 0)
    idx_bot = jnp.minimum(row0 + TH, H - 1)
    xc = x_ref[pl.ds(row0, TH)]                    # (TH, W, Cp) f32 (residual)
    xt = x_ref[pl.ds(idx_top, 1)]                  # (1,  W, Cp)
    xb = x_ref[pl.ds(idx_bot, 1)]                  # (1,  W, Cp)
    xh = jnp.concatenate([xt, xc, xb], axis=0)     # (TH+2, W, Cp)

    # ---- conv1 (1x1) + BN1 + GELU on TH+2 rows (bf16 MXU, f32 acc) ----------
    h1 = jnp.dot(xh.reshape((TH + 2) * W, Cp).astype(jnp.bfloat16), w1_ref[...],
                 preferred_element_type=jnp.float32)
    h1 = _gelu(h1 * s1 + b1).reshape(TH + 2, W, Cp)

    # zero halo rows that fall outside the image (== conv2 zero padding)
    rix = lax.broadcasted_iota(jnp.int32, (TH + 2, 1, 1), 0)
    valid = ((rix != 0) | (row0 > 0)) & ((rix != TH + 1) | (row0 + TH < H))
    h1 = jnp.where(valid, h1, 0.0).astype(jnp.bfloat16)

    # ---- stage zero-padded conv2 input into the persistent VMEM scratch ----
    hp_ref[:, 1:W + 1, :] = h1
    zcol = jnp.zeros((TH + 2, 1, Cp), jnp.bfloat16)
    hp_ref[:, 0:1, :] = zcol
    hp_ref[:, W + 1:W + 2, :] = zcol

    # ---- conv2 (3x3, pad=1) as ONE im2col matmul + BN2 + GELU ---------------
    cols = []
    for dh in range(3):
        for dw in range(3):
            cols.append(hp_ref[dh:dh + TH, dw:dw + W, :].reshape(TH * W, Cp))
    col = jnp.concatenate(cols, axis=-1)                       # (TH*W, 9*Cp) bf16
    h2 = jnp.dot(col, w2_ref[...], preferred_element_type=jnp.float32)
    h2 = _gelu(h2 * s2 + b2).astype(jnp.bfloat16)              # (TH*W, Cp)

    # ---- conv3 (1x1) + BN3 + residual + GELU (residual & BN in f32) ---------
    h3 = jnp.dot(h2, w3_ref[...], preferred_element_type=jnp.float32)
    h3 = h3 * s3 + b3 + xc.reshape(TH * W, Cp)
    o_ref[...] = _gelu(h3).reshape(TH, W, Cp)


# ---------------------------------------------------------------------------
# Wrappers
# ---------------------------------------------------------------------------
def _round_up(n, m):
    return ((n + m - 1) // m) * m


def bottleneck_forward_nhwc(x_nhwc, params):
    """Preferred TPU path: NHWC in / NHWC out, no layout transposes."""
    w1, (s1, b1), w2, (s2, b2), w3, (s3, b3) = params
    N, H, W, Cin = x_nhwc.shape
    width = w1.shape[1]
    Cout = w3.shape[1]
    assert Cin == Cout, "residual add requires inplanes == planes * expansion"

    # One lane-dense padded channel count for the whole block.
    Cp = _round_up(max(Cin, width, Cout, _LANE), _LANE)

    xp = jnp.pad(x_nhwc, ((0, 0), (0, 0), (0, 0), (0, Cp - Cin)))

    # Zero-padded weights (padded channels stay exactly zero through the block)
    w1p = jnp.zeros((Cp, Cp), jnp.float32).at[:Cin, :width].set(w1).astype(jnp.bfloat16)
    w2p = (jnp.zeros((3, 3, Cp, Cp), jnp.float32)
           .at[:, :, :width, :width].set(w2)
           .reshape(9 * Cp, Cp).astype(jnp.bfloat16))           # (dh, dw, cin) rows
    w3p = jnp.zeros((Cp, Cp), jnp.float32).at[:width, :Cout].set(w3).astype(jnp.bfloat16)

    # Fused BN params: rows = [s1, b1, s2, b2, s3, b3]
    bn = jnp.zeros((6, Cp), jnp.float32)
    bn = bn.at[0, :width].set(s1).at[1, :width].set(b1)
    bn = bn.at[2, :width].set(s2).at[3, :width].set(b2)
    bn = bn.at[4, :Cout].set(s3).at[5, :Cout].set(b3)

    # H-row tiling: pipelining depth and megacore sharding even for small N.
    TH = 8 if H % 8 == 0 else H
    grid = (N, H // TH)

    out = pl.pallas_call(
        bottleneck_kernel,
        out_shape=jax.ShapeDtypeStruct((N, H, W, Cp), jnp.float32),
        grid=grid,
        in_specs=[
            pl.BlockSpec((None, H, W, Cp), lambda n, t: (n, 0, 0, 0)),   # full image
            pl.BlockSpec((Cp, Cp), lambda n, t: (0, 0)),                 # w1
            pl.BlockSpec((9 * Cp, Cp), lambda n, t: (0, 0)),             # w2 (im2col)
            pl.BlockSpec((Cp, Cp), lambda n, t: (0, 0)),                 # w3
            pl.BlockSpec((6, Cp), lambda n, t: (0, 0)),                  # fused BN
        ],
        out_specs=pl.BlockSpec((None, TH, W, Cp), lambda n, t: (n, t, 0, 0)),
        scratch_shapes=[pltpu.VMEM((TH + 2, W + 2, Cp), jnp.bfloat16)],
        compiler_params=pltpu.CompilerParams(
            dimension_semantics=("parallel", "parallel"),
            vmem_limit_bytes=48 * 1024 * 1024),
    )(xp, w1p, w2p, w3p, bn)

    return out[..., :Cout]


def bottleneck_forward(x_nchw, params):
    """NCHW adapter for PyTorch-layout parity (adds two layout transposes)."""
    x = jnp.transpose(x_nchw, (0, 2, 3, 1))
    y = bottleneck_forward_nhwc(x, params)
    return jnp.transpose(y, (0, 3, 1, 2))


# ---------------------------------------------------------------------------
# Deterministic parameter construction (matches module shapes).
# ---------------------------------------------------------------------------
def make_params(key, inplanes, planes, base_width=64, expansion=4):
    width = int(planes * (base_width / 64.0))
    cout = planes * expansion
    ks = jax.random.split(key, 12)

    def bn_fold(kg, kb, km, kv, c, eps=1e-5):
        gamma = 1.0 + 0.1 * jax.random.normal(kg, (c,), jnp.float32)
        beta = 0.1 * jax.random.normal(kb, (c,), jnp.float32)
        mean = 0.1 * jax.random.normal(km, (c,), jnp.float32)
        var = 1.0 + 0.1 * jax.random.uniform(kv, (c,), jnp.float32)
        scale = gamma / jnp.sqrt(var + eps)
        bias = beta - mean * scale
        return scale, bias

    w1 = 0.2 * jax.random.normal(ks[0], (inplanes, width), jnp.float32)      # (Cin, width)
    w2 = 0.1 * jax.random.normal(ks[1], (3, 3, width, width), jnp.float32)   # HWIO
    w3 = 0.2 * jax.random.normal(ks[2], (width, cout), jnp.float32)          # (width, Cout)

    bn1 = bn_fold(ks[3], ks[4], ks[5], ks[6], width)
    bn2 = bn_fold(ks[7], ks[8], ks[9], ks[10], width)
    bn3 = bn_fold(ks[11], ks[3], ks[5], ks[7], cout)
    return w1, bn1, w2, bn2, w3, bn3


# ---------------------------------------------------------------------------
# Pure-JAX f32 reference (lax.conv + exact GELU), NHWC.
# ---------------------------------------------------------------------------
def reference_forward_nhwc(x, params):
    w1, (s1, b1), w2, (s2, b2), w3, (s3, b3) = params
    dn = ('NHWC', 'HWIO', 'NHWC')
    gelu = lambda t: jax.nn.gelu(t, approximate=False)
    h = lax.conv_general_dilated(x, w1[None, None], (1, 1), 'VALID', dimension_numbers=dn)
    h = gelu(h * s1 + b1)
    h = lax.conv_general_dilated(h, w2, (1, 1), ((1, 1), (1, 1)), dimension_numbers=dn)
    h = gelu(h * s2 + b2)
    h = lax.conv_general_dilated(h, w3[None, None], (1, 1), 'VALID', dimension_numbers=dn)
    h = gelu(h * s3 + b3 + x)
    return h


if __name__ == "__main__":
    # Bottleneck(inplanes=16, planes=4): width=4, out channels = 16 -> the
    # identity add is well-defined.  NHWC input (lane-dense TPU path).
    N, planes, H, W = 2, 4, 16, 16
    inplanes = planes * 4

    key = jax.random.PRNGKey(0)
    kx, kp = jax.random.split(key)
    x = jax.random.normal(kx, (N, H, W, inplanes), jnp.float32)   # NHWC
    params = make_params(kp, inplanes, planes)

    fwd = jax.jit(bottleneck_forward_nhwc)
    out = jax.block_until_ready(fwd(x, params))

    ref = reference_forward_nhwc(x, params)
    assert out.shape == (N, H, W, inplanes)
    assert bool(jnp.all(jnp.isfinite(out)))
    # Tolerance accounts for bf16 MXU operands (f32 accumulate / BN / residual).
    assert jnp.allclose(out, ref, rtol=3e-2, atol=3e-2), (
        float(jnp.max(jnp.abs(out - ref))))

    print("KERNEL_OK")
</pallas_src>

<mosaic_0001>
module attributes {stable_mosaic.version = 11 : i64} {
  func.func @bottleneck_kernel(%arg0: i32, %arg1: i32, %arg2: memref<1x16x16x128xf32, #tpu.memory_space<vmem>>, %arg3: memref<128x128xbf16, #tpu.memory_space<vmem>>, %arg4: memref<1152x128xbf16, #tpu.memory_space<vmem>>, %arg5: memref<128x128xbf16, #tpu.memory_space<vmem>>, %arg6: memref<6x128xf32, #tpu.memory_space<vmem>>, %arg7: memref<1x8x16x128xf32, #tpu.memory_space<vmem>>, %arg8: memref<10x18x128xbf16, #tpu.memory_space<vmem>>) attributes {dimension_semantics = [#tpu.dimension_semantics<parallel>, #tpu.dimension_semantics<parallel>], iteration_bounds = array<i64: 2, 2>, scalar_prefetch = 0 : i64, scratch_operands = 1 : i64, tpu.core_type = #tpu.core_type<tc>, window_params = [{transform_indices = @transform_0, window_bounds = array<i64: 1, 16, 16, 128>}, {pipeline_mode = #tpu.pipeline_mode<synchronous>, transform_indices = @transform_1, window_bounds = array<i64: 128, 128>}, {pipeline_mode = #tpu.pipeline_mode<synchronous>, transform_indices = @transform_2, window_bounds = array<i64: 1152, 128>}, {pipeline_mode = #tpu.pipeline_mode<synchronous>, transform_indices = @transform_3, window_bounds = array<i64: 128, 128>}, {pipeline_mode = #tpu.pipeline_mode<synchronous>, transform_indices = @transform_4, window_bounds = array<i64: 6, 128>}, {transform_indices = @transform_5, window_bounds = array<i64: 1, 8, 16, 128>}]} {
    %c8_i32 = arith.constant 8 : i32
    %0 = arith.muli %arg1, %c8_i32 : i32
    %1 = tpu.assume_multiple %0, 8 : i32
    %c0 = arith.constant 0 : index
    %c0_0 = arith.constant 0 : index
    %2 = vector.load %arg6[%c0, %c0_0] : memref<6x128xf32, #tpu.memory_space<vmem>>, vector<1x128xf32>
    %3 = vector.shape_cast %2 : vector<1x128xf32> to vector<128xf32>
    %c1 = arith.constant 1 : index
    %c0_1 = arith.constant 0 : index
    %4 = vector.load %arg6[%c1, %c0_1] : memref<6x128xf32, #tpu.memory_space<vmem>>, vector<1x128xf32>
    %5 = vector.shape_cast %4 : vector<1x128xf32> to vector<128xf32>
    %c2 = arith.constant 2 : index
    %c0_2 = arith.constant 0 : index
    %6 = vector.load %arg6[%c2, %c0_2] : memref<6x128xf32, #tpu.memory_space<vmem>>, vector<1x128xf32>
    %7 = vector.shape_cast %6 : vector<1x128xf32> to vector<128xf32>
    %c3 = arith.constant 3 : index
    %c0_3 = arith.constant 0 : index
    %8 = vector.load %arg6[%c3, %c0_3] : memref<6x128xf32, #tpu.memory_space<vmem>>, vector<1x128xf32>
    %9 = vector.shape_cast %8 : vector<1x128xf32> to vector<128xf32>
    %c4 = arith.constant 4 : index
    %c0_4 = arith.constant 0 : index
    %10 = vector.load %arg6[%c4, %c0_4] : memref<6x128xf32, #tpu.memory_space<vmem>>, vector<1x128xf32>
    %11 = vector.shape_cast %10 : vector<1x128xf32> to vector<128xf32>
    %c5 = arith.constant 5 : index
    %c0_5 = arith.constant 0 : index
    %12 = vector.load %arg6[%c5, %c0_5] : memref<6x128xf32, #tpu.memory_space<vmem>>, vector<1x128xf32>
    %13 = vector.shape_cast %12 : vector<1x128xf32> to vector<128xf32>
    %c1_i32 = arith.constant 1 : i32
    %14 = arith.subi %1, %c1_i32 : i32
    %c0_i32 = arith.constant 0 : i32
    %15 = arith.maxsi %14, %c0_i32 : i32
    %c8_i32_6 = arith.constant 8 : i32
    %16 = arith.addi %1, %c8_i32_6 : i32
    %c15_i32 = arith.constant 15 : i32
    %17 = arith.minsi %16, %c15_i32 : i32
    %c0_7 = arith.constant 0 : index
    %18 = arith.index_cast %1 : i32 to index
    %c0_8 = arith.constant 0 : index
    %c0_9 = arith.constant 0 : index
    %19 = vector.load %arg2[%c0_7, %18, %c0_8, %c0_9] : memref<1x16x16x128xf32, #tpu.memory_space<vmem>>, vector<1x8x16x128xf32>
    %20 = vector.shape_cast %19 : vector<1x8x16x128xf32> to vector<8x16x128xf32>
    %c0_10 = arith.constant 0 : index
    %21 = arith.index_cast %15 : i32 to index
    %c0_11 = arith.constant 0 : index
    %c0_12 = arith.constant 0 : index
    %22 = vector.load %arg2[%c0_10, %21, %c0_11, %c0_12] : memref<1x16x16x128xf32, #tpu.memory_space<vmem>>, vector<1x1x16x128xf32>
    %23 = vector.shape_cast %22 : vector<1x1x16x128xf32> to vector<1x16x128xf32>
    %c0_13 = arith.constant 0 : index
    %24 = arith.index_cast %17 : i32 to index
    %c0_14 = arith.constant 0 : index
    %c0_15 = arith.constant 0 : index
    %25 = vector.load %arg2[%c0_13, %24, %c0_14, %c0_15] : memref<1x16x16x128xf32, #tpu.memory_space<vmem>>, vector<1x1x16x128xf32>
    %26 = vector.shape_cast %25 : vector<1x1x16x128xf32> to vector<1x16x128xf32>
    %27 = tpu.concatenate %23, %20, %26 in 0 : vector<1x16x128xf32>, vector<8x16x128xf32>, vector<1x16x128xf32> -> vector<10x16x128xf32>
    %28 = vector.shape_cast %27 : vector<10x16x128xf32> to vector<160x128xf32>
    %29 = arith.truncf %28 : vector<160x128xf32> to vector<160x128xbf16>
    %c0_16 = arith.constant 0 : index
    %c0_17 = arith.constant 0 : index
    %30 = vector.load %arg3[%c0_16, %c0_17] : memref<128x128xbf16, #tpu.memory_space<vmem>>, vector<128x128xbf16>
    %cst = arith.constant dense<0.000000e+00> : vector<160x128xf32>
    %31 = tpu.matmul %29, %30, %cst {dimension_numbers = #tpu.dot_dimension_numbers<[1], [0], [0], [1], [0, 0, 1, 1], [], []>} : vector<160x128xbf16>, vector<128x128xbf16>, vector<160x128xf32> -> vector<160x128xf32>
    %32 = vector.shape_cast %3 : vector<128xf32> to vector<1x128xf32>
    %33 = vector.broadcast %32 : vector<1x128xf32> to vector<160x128xf32>
    %34 = arith.mulf %31, %33 : vector<160x128xf32>
    %35 = vector.shape_cast %5 : vector<128xf32> to vector<1x128xf32>
    %36 = vector.broadcast %35 : vector<1x128xf32> to vector<160x128xf32>
    %37 = arith.addf %34, %36 : vector<160x128xf32>
    %cst_18 = arith.constant 5.000000e-01 : f32
    %38 = vector.broadcast %cst_18 : f32 to vector<160x128xf32>
    %39 = arith.mulf %38, %37 : vector<160x128xf32>
    %cst_19 = arith.constant 0.707106769 : f32
    %40 = vector.broadcast %cst_19 : f32 to vector<160x128xf32>
    %41 = arith.mulf %37, %40 : vector<160x128xf32>
    %42 = math.absf %41 : vector<160x128xf32>
    %cst_20 = arith.constant 0.327591091 : f32
    %43 = vector.broadcast %cst_20 : f32 to vector<160x128xf32>
    %44 = arith.mulf %43, %42 : vector<160x128xf32>
    %cst_21 = arith.constant 1.000000e+00 : f32
    %45 = vector.broadcast %cst_21 : f32 to vector<160x128xf32>
    %46 = arith.addf %45, %44 : vector<160x128xf32>
    %47 = tpu.reciprocal %46 {approx = true} : vector<160x128xf32> -> vector<160x128xf32>
    %cst_22 = arith.constant 1.06140542 : f32
    %48 = vector.broadcast %cst_22 : f32 to vector<160x128xf32>
    %49 = arith.mulf %48, %47 : vector<160x128xf32>
    %cst_23 = arith.constant -1.45315206 : f32
    %50 = vector.broadcast %cst_23 : f32 to vector<160x128xf32>
    %51 = arith.addf %49, %50 : vector<160x128xf32>
    %52 = arith.mulf %51, %47 : vector<160x128xf32>
    %cst_24 = arith.constant 1.42141378 : f32
    %53 = vector.broadcast %cst_24 : f32 to vector<160x128xf32>
    %54 = arith.addf %52, %53 : vector<160x128xf32>
    %55 = arith.mulf %54, %47 : vector<160x128xf32>
    %cst_25 = arith.constant -0.284496725 : f32
    %56 = vector.broadcast %cst_25 : f32 to vector<160x128xf32>
    %57 = arith.addf %55, %56 : vector<160x128xf32>
    %58 = arith.mulf %57, %47 : vector<160x128xf32>
    %cst_26 = arith.constant 0.254829586 : f32
    %59 = vector.broadcast %cst_26 : f32 to vector<160x128xf32>
    %60 = arith.addf %58, %59 : vector<160x128xf32>
    %61 = arith.mulf %60, %47 : vector<160x128xf32>
    %cst_27 = arith.constant 0.000000e+00 : f32
    %62 = vector.broadcast %cst_27 : f32 to vector<160x128xf32>
    %63 = arith.subf %62, %42 : vector<160x128xf32>
    %64 = arith.mulf %63, %42 : vector<160x128xf32>
    %65 = math.exp %64 : vector<160x128xf32>
    %66 = arith.mulf %61, %65 : vector<160x128xf32>
    %cst_28 = arith.constant 1.000000e+00 : f32
    %67 = vector.broadcast %cst_28 : f32 to vector<160x128xf32>
    %68 = arith.subf %67, %66 : vector<160x128xf32>
    %cst_29 = arith.constant 0.000000e+00 : f32
    %69 = vector.broadcast %cst_29 : f32 to vector<160x128xf32>
    %70 = arith.cmpf oge, %41, %69 : vector<160x128xf32>
    %cst_30 = arith.constant 0.000000e+00 : f32
    %71 = vector.broadcast %cst_30 : f32 to vector<160x128xf32>
    %72 = arith.subf %71, %68 : vector<160x128xf32>
    %73 = arith.select %70, %68, %72 : vector<160x128xi1>, vector<160x128xf32>
    %cst_31 = arith.constant 1.000000e+00 : f32
    %74 = vector.broadcast %cst_31 : f32 to vector<160x128xf32>
    %75 = arith.addf %74, %73 : vector<160x128xf32>
    %76 = arith.mulf %39, %75 : vector<160x128xf32>
    %77 = vector.shape_cast %76 : vector<160x128xf32> to vector<10x16x128xf32>
    %78 = tpu.iota {dimensions = array<i32: 0>} : vector<10x1x1xi32>
    %c0_i32_32 = arith.constant 0 : i32
    %79 = vector.broadcast %c0_i32_32 : i32 to vector<10x1x1xi32>
    %80 = arith.cmpi ne, %78, %79 : vector<10x1x1xi32>
    %c0_i32_33 = arith.constant 0 : i32
    %81 = arith.cmpi sgt, %1, %c0_i32_33 : i32
    %82 = vector.broadcast %81 : i1 to vector<10x1x1xi1>
    %83 = arith.ori %80, %82 : vector<10x1x1xi1>
    %c9_i32 = arith.constant 9 : i32
    %84 = vector.broadcast %c9_i32 : i32 to vector<10x1x1xi32>
    %85 = arith.cmpi ne, %78, %84 : vector<10x1x1xi32>
    %c8_i32_34 = arith.constant 8 : i32
    %86 = arith.addi %1, %c8_i32_34 : i32
    %c16_i32 = arith.constant 16 : i32
    %87 = arith.cmpi slt, %86, %c16_i32 : i32
    %88 = vector.broadcast %87 : i1 to vector<10x1x1xi1>
    %89 = arith.ori %85, %88 : vector<10x1x1xi1>
    %90 = arith.andi %83, %89 : vector<10x1x1xi1>
    %cst_35 = arith.constant 0.000000e+00 : f32
    %91 = vector.shape_cast %90 : vector<10x1x1xi1> to vector<10x1x1xi1>
    %92 = vector.broadcast %91 : vector<10x1x1xi1> to vector<10x16x128xi1>
    %93 = vector.broadcast %cst_35 : f32 to vector<10x16x128xf32>
    %94 = arith.select %92, %77, %93 : vector<10x16x128xi1>, vector<10x16x128xf32>
    %95 = arith.truncf %94 : vector<10x16x128xf32> to vector<10x16x128xbf16>
    %c0_36 = arith.constant 0 : index
    %c1_37 = arith.constant 1 : index
    %c0_38 = arith.constant 0 : index
    %96 = vector.load %arg8[%c0_36, %c1_37, %c0_38] : memref<10x18x128xbf16, #tpu.memory_space<vmem>>, vector<10x16x128xbf16>
    tpu.vector_store %arg8[%c0_36, %c1_37, %c0_38], %95 {strides = array<i32>} : memref<10x18x128xbf16, #tpu.memory_space<vmem>>, vector<10x16x128xbf16>,
    %cst_39 = arith.constant 0.000000e+00 : bf16
    %97 = vector.broadcast %cst_39 : bf16 to vector<10x1x128xbf16>
    %c0_40 = arith.constant 0 : index
    %c0_41 = arith.constant 0 : index
    %c0_42 = arith.constant 0 : index
    %98 = vector.load %arg8[%c0_40, %c0_41, %c0_42] : memref<10x18x128xbf16, #tpu.memory_space<vmem>>, vector<10x1x128xbf16>
    tpu.vector_store %arg8[%c0_40, %c0_41, %c0_42], %97 {strides = array<i32>} : memref<10x18x128xbf16, #tpu.memory_space<vmem>>, vector<10x1x128xbf16>,
    %c0_43 = arith.constant 0 : index
    %c17 = arith.constant 17 : index
    %c0_44 = arith.constant 0 : index
    %99 = vector.load %arg8[%c0_43, %c17, %c0_44] : memref<10x18x128xbf16, #tpu.memory_space<vmem>>, vector<10x1x128xbf16>
    tpu.vector_store %arg8[%c0_43, %c17, %c0_44], %97 {strides = array<i32>} : memref<10x18x128xbf16, #tpu.memory_space<vmem>>, vector<10x1x128xbf16>,
    %c0_45 = arith.constant 0 : index
    %c0_46 = arith.constant 0 : index
    %c0_47 = arith.constant 0 : index
    %100 = vector.load %arg8[%c0_45, %c0_46, %c0_47] : memref<10x18x128xbf16, #tpu.memory_space<vmem>>, vector<8x16x128xbf16>
    %101 = vector.shape_cast %100 : vector<8x16x128xbf16> to vector<128x128xbf16>
    %c0_48 = arith.constant 0 : index
    %c1_49 = arith.constant 1 : index
    %c0_50 = arith.constant 0 : index
    %102 = vector.load %arg8[%c0_48, %c1_49, %c0_50] : memref<10x18x128xbf16, #tpu.memory_space<vmem>>, vector<8x16x128xbf16>
    %103 = vector.shape_cast %102 : vector<8x16x128xbf16> to vector<128x128xbf16>
    %c0_51 = arith.constant 0 : index
    %c2_52 = arith.constant 2 : index
    %c0_53 = arith.constant 0 : index
    %104 = vector.load %arg8[%c0_51, %c2_52, %c0_53] : memref<10x18x128xbf16, #tpu.memory_space<vmem>>, vector<8x16x128xbf16>
    %105 = vector.shape_cast %104 : vector<8x16x128xbf16> to vector<128x128xbf16>
    %c1_54 = arith.constant 1 : index
    %c0_55 = arith.constant 0 : index
    %c0_56 = arith.constant 0 : index
    %106 = vector.load %arg8[%c1_54, %c0_55, %c0_56] : memref<10x18x128xbf16, #tpu.memory_space<vmem>>, vector<8x16x128xbf16>
    %107 = vector.shape_cast %106 : vector<8x16x128xbf16> to vector<128x128xbf16>
    %c1_57 = arith.constant 1 : index
    %c1_58 = arith.constant 1 : index
    %c0_59 = arith.constant 0 : index
    %108 = vector.load %arg8[%c1_57, %c1_58, %c0_59] : memref<10x18x128xbf16, #tpu.memory_space<vmem>>, vector<8x16x128xbf16>
    %109 = vector.shape_cast %108 : vector<8x16x128xbf16> to vector<128x128xbf16>
    %c1_60 = arith.constant 1 : index
    %c2_61 = arith.constant 2 : index
    %c0_62 = arith.constant 0 : index
    %110 = vector.load %arg8[%c1_60, %c2_61, %c0_62] : memref<10x18x128xbf16, #tpu.memory_space<vmem>>, vector<8x16x128xbf16>
    %111 = vector.shape_cast %110 : vector<8x16x128xbf16> to vector<128x128xbf16>
    %c2_63 = arith.constant 2 : index
    %c0_64 = arith.constant 0 : index
    %c0_65 = arith.constant 0 : index
    %112 = vector.load %arg8[%c2_63, %c0_64, %c0_65] : memref<10x18x128xbf16, #tpu.memory_space<vmem>>, vector<8x16x128xbf16>
    %113 = vector.shape_cast %112 : vector<8x16x128xbf16> to vector<128x128xbf16>
    %c2_66 = arith.constant 2 : index
    %c1_67 = arith.constant 1 : index
    %c0_68 = arith.constant 0 : index
    %114 = vector.load %arg8[%c2_66, %c1_67, %c0_68] : memref<10x18x128xbf16, #tpu.memory_space<vmem>>, vector<8x16x128xbf16>
    %115 = vector.shape_cast %114 : vector<8x16x128xbf16> to vector<128x128xbf16>
    %c2_69 = arith.constant 2 : index
    %c2_70 = arith.constant 2 : index
    %c0_71 = arith.constant 0 : index
    %116 = vector.load %arg8[%c2_69, %c2_70, %c0_71] : memref<10x18x128xbf16, #tpu.memory_space<vmem>>, vector<8x16x128xbf16>
    %117 = vector.shape_cast %116 : vector<8x16x128xbf16> to vector<128x128xbf16>
    %118 = tpu.concatenate %101, %103, %105, %107, %109, %111, %113, %115, %117 in 1 : vector<128x128xbf16>, vector<128x128xbf16>, vector<128x128xbf16>, vector<128x128xbf16>, vector<128x128xbf16>, vector<128x128xbf16>, vector<128x128xbf16>, vector<128x128xbf16>, vector<128x128xbf16> -> vector<128x1152xbf16>
    %c0_72 = arith.constant 0 : index
    %c0_73 = arith.constant 0 : index
    %119 = vector.load %arg4[%c0_72, %c0_73] : memref<1152x128xbf16, #tpu.memory_space<vmem>>, vector<1152x128xbf16>
    %cst_74 = arith.constant dense<0.000000e+00> : vector<128x128xf32>
    %120 = tpu.matmul %118, %119, %cst_74 {dimension_numbers = #tpu.dot_dimension_numbers<[1], [0], [0], [1], [0, 0, 1, 1], [], []>} : vector<128x1152xbf16>, vector<1152x128xbf16>, vector<128x128xf32> -> vector<128x128xf32>
    %121 = vector.shape_cast %7 : vector<128xf32> to vector<1x128xf32>
    %122 = vector.broadcast %121 : vector<1x128xf32> to vector<128x128xf32>
    %123 = arith.mulf %120, %122 : vector<128x128xf32>
    %124 = vector.shape_cast %9 : vector<128xf32> to vector<1x128xf32>
    %125 = vector.broadcast %124 : vector<1x128xf32> to vector<128x128xf32>
    %126 = arith.addf %123, %125 : vector<128x128xf32>
    %cst_75 = arith.constant 5.000000e-01 : f32
    %127 = vector.broadcast %cst_75 : f32 to vector<128x128xf32>
    %128 = arith.mulf %127, %126 : vector<128x128xf32>
    %cst_76 = arith.constant 0.707106769 : f32
    %129 = vector.broadcast %cst_76 : f32 to vector<128x128xf32>
    %130 = arith.mulf %126, %129 : vector<128x128xf32>
    %131 = math.absf %130 : vector<128x128xf32>
    %cst_77 = arith.constant 0.327591091 : f32
    %132 = vector.broadcast %cst_77 : f32 to vector<128x128xf32>
    %133 = arith.mulf %132, %131 : vector<128x128xf32>
    %cst_78 = arith.constant 1.000000e+00 : f32
    %134 = vector.broadcast %cst_78 : f32 to vector<128x128xf32>
    %135 = arith.addf %134, %133 : vector<128x128xf32>
    %136 = tpu.reciprocal %135 {approx = true} : vector<128x128xf32> -> vector<128x128xf32>
    %cst_79 = arith.constant 1.06140542 : f32
    %137 = vector.broadcast %cst_79 : f32 to vector<128x128xf32>
    %138 = arith.mulf %137, %136 : vector<128x128xf32>
    %cst_80 = arith.constant -1.45315206 : f32
    %139 = vector.broadcast %cst_80 : f32 to vector<128x128xf32>
    %140 = arith.addf %138, %139 : vector<128x128xf32>
    %141 = arith.mulf %140, %136 : vector<128x128xf32>
    %cst_81 = arith.constant 1.42141378 : f32
    %142 = vector.broadcast %cst_81 : f32 to vector<128x128xf32>
    %143 = arith.addf %141, %142 : vector<128x128xf32>
    %144 = arith.mulf %143, %136 : vector<128x128xf32>
    %cst_82 = arith.constant -0.284496725 : f32
    %145 = vector.broadcast %cst_82 : f32 to vector<128x128xf32>
    %146 = arith.addf %144, %145 : vector<128x128xf32>
    %147 = arith.mulf %146, %136 : vector<128x128xf32>
    %cst_83 = arith.constant 0.254829586 : f32
    %148 = vector.broadcast %cst_83 : f32 to vector<128x128xf32>
    %149 = arith.addf %147, %148 : vector<128x128xf32>
    %150 = arith.mulf %149, %136 : vector<128x128xf32>
    %cst_84 = arith.constant 0.000000e+00 : f32
    %151 = vector.broadcast %cst_84 : f32 to vector<128x128xf32>
    %152 = arith.subf %151, %131 : vector<128x128xf32>
    %153 = arith.mulf %152, %131 : vector<128x128xf32>
    %154 = math.exp %153 : vector<128x128xf32>
    %155 = arith.mulf %150, %154 : vector<128x128xf32>
    %cst_85 = arith.constant 1.000000e+00 : f32
    %156 = vector.broadcast %cst_85 : f32 to vector<128x128xf32>
    %157 = arith.subf %156, %155 : vector<128x128xf32>
    %cst_86 = arith.constant 0.000000e+00 : f32
    %158 = vector.broadcast %cst_86 : f32 to vector<128x128xf32>
    %159 = arith.cmpf oge, %130, %158 : vector<128x128xf32>
    %cst_87 = arith.constant 0.000000e+00 : f32
    %160 = vector.broadcast %cst_87 : f32 to vector<128x128xf32>
    %161 = arith.subf %160, %157 : vector<128x128xf32>
    %162 = arith.select %159, %157, %161 : vector<128x128xi1>, vector<128x128xf32>
    %cst_88 = arith.constant 1.000000e+00 : f32
    %163 = vector.broadcast %cst_88 : f32 to vector<128x128xf32>
    %164 = arith.addf %163, %162 : vector<128x128xf32>
    %165 = arith.mulf %128, %164 : vector<128x128xf32>
    %166 = arith.truncf %165 : vector<128x128xf32> to vector<128x128xbf16>
    %c0_89 = arith.constant 0 : index
    %c0_90 = arith.constant 0 : index
    %167 = vector.load %arg5[%c0_89, %c0_90] : memref<128x128xbf16, #tpu.memory_space<vmem>>, vector<128x128xbf16>
    %cst_91 = arith.constant dense<0.000000e+00> : vector<128x128xf32>
    %168 = tpu.matmul %166, %167, %cst_91 {dimension_numbers = #tpu.dot_dimension_numbers<[1], [0], [0], [1], [0, 0, 1, 1], [], []>} : vector<128x128xbf16>, vector<128x128xbf16>, vector<128x128xf32> -> vector<128x128xf32>
    %169 = vector.shape_cast %11 : vector<128xf32> to vector<1x128xf32>
    %170 = vector.broadcast %169 : vector<1x128xf32> to vector<128x128xf32>
    %171 = arith.mulf %168, %170 : vector<128x128xf32>
    %172 = vector.shape_cast %13 : vector<128xf32> to vector<1x128xf32>
    %173 = vector.broadcast %172 : vector<1x128xf32> to vector<128x128xf32>
    %174 = arith.addf %171, %173 : vector<128x128xf32>
    %175 = vector.shape_cast %20 : vector<8x16x128xf32> to vector<128x128xf32>
    %176 = arith.addf %174, %175 : vector<128x128xf32>
    %cst_92 = arith.constant 5.000000e-01 : f32
    %177 = vector.broadcast %cst_92 : f32 to vector<128x128xf32>
    %178 = arith.mulf %177, %176 : vector<128x128xf32>
    %cst_93 = arith.constant 0.707106769 : f32
    %179 = vector.broadcast %cst_93 : f32 to vector<128x128xf32>
    %180 = arith.mulf %176, %179 : vector<128x128xf32>
    %181 = math.absf %180 : vector<128x128xf32>
    %cst_94 = arith.constant 0.327591091 : f32
    %182 = vector.broadcast %cst_94 : f32 to vector<128x128xf32>
    %183 = arith.mulf %182, %181 : vector<128x128xf32>
    %cst_95 = arith.constant 1.000000e+00 : f32
    %184 = vector.broadcast %cst_95 : f32 to vector<128x128xf32>
    %185 = arith.addf %184, %183 : vector<128x128xf32>
    %186 = tpu.reciprocal %185 {approx = true} : vector<128x128xf32> -> vector<128x128xf32>
    %cst_96 = arith.constant 1.06140542 : f32
    %187 = vector.broadcast %cst_96 : f32 to vector<128x128xf32>
    %188 = arith.mulf %187, %186 : vector<128x128xf32>
    %cst_97 = arith.constant -1.45315206 : f32
    %189 = vector.broadcast %cst_97 : f32 to vector<128x128xf32>
    %190 = arith.addf %188, %189 : vector<128x128xf32>
    %191 = arith.mulf %190, %186 : vector<128x128xf32>
    %cst_98 = arith.constant 1.42141378 : f32
    %192 = vector.broadcast %cst_98 : f32 to vector<128x128xf32>
    %193 = arith.addf %191, %192 : vector<128x128xf32>
    %194 = arith.mulf %193, %186 : vector<128x128xf32>
    %cst_99 = arith.constant -0.284496725 : f32
    %195 = vector.broadcast %cst_99 : f32 to vector<128x128xf32>
    %196 = arith.addf %194, %195 : vector<128x128xf32>
    %197 = arith.mulf %196, %186 : vector<128x128xf32>
    %cst_100 = arith.constant 0.254829586 : f32
    %198 = vector.broadcast %cst_100 : f32 to vector<128x128xf32>
    %199 = arith.addf %197, %198 : vector<128x128xf32>
    %200 = arith.mulf %199, %186 : vector<128x128xf32>
    %cst_101 = arith.constant 0.000000e+00 : f32
    %201 = vector.broadcast %cst_101 : f32 to vector<128x128xf32>
    %202 = arith.subf %201, %181 : vector<128x128xf32>
    %203 = arith.mulf %202, %181 : vector<128x128xf32>
    %204 = math.exp %203 : vector<128x128xf32>
    %205 = arith.mulf %200, %204 : vector<128x128xf32>
    %cst_102 = arith.constant 1.000000e+00 : f32
    %206 = vector.broadcast %cst_102 : f32 to vector<128x128xf32>
    %207 = arith.subf %206, %205 : vector<128x128xf32>
    %cst_103 = arith.constant 0.000000e+00 : f32
    %208 = vector.broadcast %cst_103 : f32 to vector<128x128xf32>
    %209 = arith.cmpf oge, %180, %208 : vector<128x128xf32>
    %cst_104 = arith.constant 0.000000e+00 : f32
    %210 = vector.broadcast %cst_104 : f32 to vector<128x128xf32>
    %211 = arith.subf %210, %207 : vector<128x128xf32>
    %212 = arith.select %209, %207, %211 : vector<128x128xi1>, vector<128x128xf32>
    %cst_105 = arith.constant 1.000000e+00 : f32
    %213 = vector.broadcast %cst_105 : f32 to vector<128x128xf32>
    %214 = arith.addf %213, %212 : vector<128x128xf32>
    %215 = arith.mulf %178, %214 : vector<128x128xf32>
    %216 = vector.shape_cast %215 : vector<128x128xf32> to vector<8x16x128xf32>
    %c0_106 = arith.constant 0 : index
    %c0_107 = arith.constant 0 : index
    %c0_108 = arith.constant 0 : index
    %c0_109 = arith.constant 0 : index
    %217 = vector.load %arg7[%c0_106, %c0_107, %c0_108, %c0_109] : memref<1x8x16x128xf32, #tpu.memory_space<vmem>>, vector<1x8x16x128xf32>
    %218 = vector.shape_cast %217 : vector<1x8x16x128xf32> to vector<8x16x128xf32>
    %219 = vector.shape_cast %216 : vector<8x16x128xf32> to vector<1x8x16x128xf32>
    tpu.vector_store %arg7[%c0_106, %c0_107, %c0_108, %c0_109], %219 {strides = array<i32>} : memref<1x8x16x128xf32, #tpu.memory_space<vmem>>, vector<1x8x16x128xf32>,
    return
  }
  func.func @transform_0(%arg0: i32, %arg1: i32) -> (i32, i32, i32, i32) {
    %c0_i32 = arith.constant 0 : i32
    %c0_i32_0 = arith.constant 0 : i32
    %c0_i32_1 = arith.constant 0 : i32
    %c0_i32_2 = arith.constant 0 : i32
    return %arg0, %c0_i32, %c0_i32_0, %c0_i32_1 : i32, i32, i32, i32
  }
  func.func @transform_1(%arg0: i32, %arg1: i32) -> (i32, i32) {
    %c0_i32 = arith.constant 0 : i32
    %c0_i32_0 = arith.constant 0 : i32
    %c0_i32_1 = arith.constant 0 : i32
    return %c0_i32, %c0_i32_0 : i32, i32
  }
  func.func @transform_2(%arg0: i32, %arg1: i32) -> (i32, i32) {
    %c0_i32 = arith.constant 0 : i32
    %c0_i32_0 = arith.constant 0 : i32
    %c0_i32_1 = arith.constant 0 : i32
    return %c0_i32, %c0_i32_0 : i32, i32
  }
  func.func @transform_3(%arg0: i32, %arg1: i32) -> (i32, i32) {
    %c0_i32 = arith.constant 0 : i32
    %c0_i32_0 = arith.constant 0 : i32
    %c0_i32_1 = arith.constant 0 : i32
    return %c0_i32, %c0_i32_0 : i32, i32
  }
  func.func @transform_4(%arg0: i32, %arg1: i32) -> (i32, i32) {
    %c0_i32 = arith.constant 0 : i32
    %c0_i32_0 = arith.constant 0 : i32
    %c0_i32_1 = arith.constant 0 : i32
    return %c0_i32, %c0_i32_0 : i32, i32
  }
  func.func @transform_5(%arg0: i32, %arg1: i32) -> (i32, i32, i32, i32) {
    %c0_i32 = arith.constant 0 : i32
    %c0_i32_0 = arith.constant 0 : i32
    %c0_i32_1 = arith.constant 0 : i32
    return %arg0, %arg1, %c0_i32, %c0_i32_0 : i32, i32, i32, i32
  }
}

</mosaic_0001>

<bundles_post_ra>
// kernel: bottleneck_forward_nhwc.1
= control target key start
LH: loop header
LB: loop body
LE: loop exit
PB: predicated region body
PF: predicated region fallthrough
CT: control target
= control target key end

     0   :  { %s8782_s0 = inlined_call_operand.vmem [shape: f32[2,16,16,128], index: 0, kind: input, shape index: {}]   ;;  %s8783_s1 = inlined_call_operand.vmem [shape: bf16[128,128], index: 1, kind: input, shape index: {}]   ;;  %s8784_s2 = inlined_call_operand.vmem [shape: bf16[1152,128], index: 2, kind: input, shape index: {}]   ;;  %s8785_s3 = inlined_call_operand.vmem [shape: bf16[128,128], index: 3, kind: input, shape index: {}]   ;;  %s8786_s4 = inlined_call_operand.vmem [shape: f32[6,128], index: 4, kind: input, shape index: {}]   ;;  %s8787_s5 = inlined_call_operand.hbm [shape: f32[2,16,16,128], index: 5, kind: output, shape index: {}]  }
   0x1   :  { %8792 = sst [smem:[#allocation11_spill]] %s8782_s0 }
   0x2   :  { %10 = vsyncpa [#allocation4], 0 }
   0x3   :  { %12 = vsyncpa [#allocation4 + $0x1], 0  ;;  %s6186_s18 = smov 0   ;;  %s6188_s19 = smov 0  }
   0x4   :  { %s6190_s20 = smov 0   ;;  %s6192_s21 = smov 0  }
   0x5   :  { %s6194_s22 = smov 0   ;;  %s6196_s23 = smov 0  }
   0x6   :  { %s6198_s24 = smov 0   ;;  %s6200_s25 = smov 0  }
   0x7 LB: > { %s4969_s26 = sadd.s32 4294967295, %s6151_s25   ;;  %s4970_s27 = sadd.s32 4294967294, %s6151_s25   ;;  %s6151_s25 = sphi %s6200_s25, %s18_s25   ;;  %s6147_s24 = sphi %s6198_s24, %s8833_s24   ;;  %s6143_s23 = sphi %s6196_s23, %s8832_s23   ;;  %s6139_s22 = sphi %s6194_s22, %s8831_s22   ;;  %s6135_s21 = sphi %s6192_s21, %s8830_s21   ;;  %s6131_s20 = sphi %s6190_s20, %s8829_s20   ;;  %s6127_s19 = sphi %s6188_s19, %s8828_s19   ;;  %s6123_s18 = sphi %s6186_s18, %s8827_s18  }
   0x8   : > { %s27_s28 = sadd.s32 1, %s6143_s23  ;;  %s30_s29 = sadd.s32 1, %s6147_s24 }
   0x9   : > { %p28_p0 = scmp.ge.s32.totalorder %s27_s28, 2  ;;  %p159_p1 = scmp.ne.s32.totalorder %s6131_s20, %s6127_s19 }
   0xa   : > { %p160_p2 = scmp.eq.s32.totalorder %s4969_s26, 3  ;;  %p165_p5 = scmp.ne.s32.totalorder %s6127_s19, %s6123_s18 }
   0xb   : > { %s8835_s28 = smov (%p28_p0, %s27_s28), 0  ;;  %s8837_s29 = smov (!%p28_p0, %s30_s29), %s6147_s24 }
   0xc   : > { %s145_s30 = ssub.s32 %s6143_s23, %s8835_s28  ;;  %p6237_p3 = por %p160_p2, %p159_p1 }
   0xd   : > { %p32_p4 = scmp.ge.s32.totalorder %s8837_s29, 2  ;;  %p166_p6 = scmp.eq.s32.totalorder %s4970_s27, 3 }
   0xe   : > { %p4973_p7 = scmp.ge.s32.totalorder %s6151_s25, 1  ;;  %p204_p9 = scmp.lt.s32.totalorder %s6151_s25, 5 }
   0xf   : > { %s8839_s29 = smov (%p32_p4, %s8837_s29), 0  ;;  %p6246_p8 = por %p166_p6, %p165_p5 }
  0x10   : > { %s144_s8 = ssub.s32 %s6147_s24, %s8839_s29  ;;  %s149_s9 = sadd.s32 1, %s6131_s20 }
  0x11   : > { %s146_s10 = sor.u32 %s145_s30, %s144_s8  ;;  %p205_p10 = pnand %p4973_p7, %p204_p9 }
  0x12   : > { %p147_p11 = scmp.eq.s32.totalorder %s146_s10, 0 }
  0x13   : > { %208 = sbr.rel (%p205_p10) target bundleno = 1286 (0x506), region = 40 }
  0x14   : > { %s6255_s11 = scalar_select %p147_p11, %s6131_s20, %s149_s9  }
  0x1a   : > { %v5717_v0 = vld [vmem:[%s8783_s1] sm:$0xff]   ;;  %p232_p12 = scmp.lt.s32.totalorder %s6139_s22, 1  ;;  %v5718_v1 = vld [vmem:[%s8783_s1 + $0x8] sm:$0xff]   ;;  %s6265_s16 = sshll.u32 %s6135_s21, 3  ;;  %v5719_v2 = vld [vmem:[%s8783_s1 + $0x10] sm:$0xff]   ;;  %vm1328_vm5 = vcmask 1043456  }
  0x1b   : > { %5528 = vmatprep.subr.bf16.mxu0 %v5717_v0  ;;  %s4978_s26 = sadd.s32 4294967295, %s6265_s16  ;;  %s8795_s0 = sld [smem:[#allocation11_spill]]  ;;  %v5720_v3 = vld [vmem:[%s8783_s1 + $0x18] sm:$0xff]   ;;  %v5721_v6 = vld [vmem:[%s8783_s1 + $0x20] sm:$0xff]   ;;  %v5722_v8 = vld [vmem:[%s8783_s1 + $0x28] sm:$0xff]   ;;  %vm1335_vm8 = vcmask 1040384  }
  0x1c   : > { %s233_s17 = scalar_select %p232_p12, %s6139_s22, 1  ;;  %5529 = vmatpush3.bf16.msra.mxu0 %v5717_v0  ;;  %v5723_v9 = vld [vmem:[%s8783_s1 + $0x30] sm:$0xff]   ;;  %v5724_v10 = vld [vmem:[%s8783_s1 + $0x38] sm:$0xff]   ;;  %v6327_v38 = vld [vmem:[%s8786_s4] ss:$0 sm:$0xff] }
  0x1d   : > { %5530 = vmatprep.subr.bf16.mxu0 %v5718_v1  ;;  %p247_p13 = scmp.gt.s32.totalorder %s4978_s26, 0  ;;  %s6278_s13 = sadd.s32 8, %s6265_s16  ;;  %v6332_v39 = vld [vmem:[%s8786_s4 + $0x1] ss:$0 sm:$0xff]  ;;  %vm1329_vm6 = vsmask.f32 7938 }
  0x1e   : > { %s5199_s8 = sshll.u32 %s233_s17, 8  ;;  %p250_p0 = scmp.lt.s32.totalorder %s6278_s13, 15  ;;  %vm1125_vm7 = vsmask.f32 256  ;;  %vm1126_vm9 = vsmask.f32 4368  ;;  %vm6583_vm12 = vmand %vm1328_vm5, %vm1329_vm6 }
  0x1f   : > { %s8841_s26 = smov (!%p247_p13, %s4978_s26), 0  ;;  %s5200_s14 = sshll.u32 %s6135_s21, 7  ;;  %vm6604_vm13 = vmand %vm1335_vm8, %vm1125_vm7 }
  0x20   : > { %5531 = vmatpush3.bf16.msra.mxu0 %v5718_v1  ;;  %s4980_s17 = sshll.u32 %s8841_s26, 4  ;;  %p1033_p1 = scmp.gt.s32.totalorder %s6265_s16, 0  ;;  %vm6617_vm15 = vmor %vm1125_vm7, %vm1126_vm9 }
  0x21   : > { %s6275_s12 = scalar_lea.vmem %s8795_s0, %s5199_s8  ;;  %5532 = vmatprep.subr.bf16.mxu0 %v5719_v2  ;;  %p1037_p2 = scmp.lt.s32.totalorder %s6278_s13, 16 }
  0x22   : > { %s271_s27 = scalar_lea.vmem %s6275_s12, %s4980_s17  ;;  %s6303_s0 = scalar_lea.vmem %s6275_s12, %s5200_s14 }
  0x23   : > { %v272_v4 = vld [vmem:[%s271_s27] sm:$0xff]  ;;  %v273_v5 = vld [vmem:[%s271_s27 + $0x8] sm:$0xff]  ;;  %s6289_s9 = scalar_select %p250_p0, %s6278_s13, 15  ;;  %v256_v13 = vld [vmem:[%s6303_s0 + $0x10] sm:$0xff] }
  0x24   : > { %5533 = vmatpush3.bf16.msra.mxu0 %v5719_v2  ;;  %v278_v7 = vpack.c.bf16 %v273_v5, %v272_v4  ;;  %v254_v11 = vld [vmem:[%s6303_s0] sm:$0xff]  ;;  %v255_v12 = vld [vmem:[%s6303_s0 + $0x8] sm:$0xff]  ;;  %v257_v14 = vld [vmem:[%s6303_s0 + $0x18] sm:$0xff]  ;;  %s6935_s26 = scalar_select %p1037_p2, 1, 0 }
  0x25   : > { %5534 = vmatprep.subr.bf16.mxu0 %v5720_v3  ;;  %s4981_s15 = sshll.u32 %s6289_s9, 4  ;;  %v279_v15 = vpack.c.bf16 %v255_v12, %v254_v11  ;;  %v280_v16 = vpack.c.bf16 %v257_v14, %v256_v13  ;;  %v258_v17 = vld [vmem:[%s6303_s0 + $0x20] sm:$0xff]  ;;  %v259_v18 = vld [vmem:[%s6303_s0 + $0x28] sm:$0xff]  ;;  %v260_v19 = vld [vmem:[%s6303_s0 + $0x30] sm:$0xff]  ;;  %s6153_s17 = smov [#allocation3]  }
  0x26   : > { %5544 = vmatprep.mubr.bf16.mxu0 %v278_v7  ;;  %v261_v20 = vld [vmem:[%s6303_s0 + $0x38] sm:$0xff]  ;;  %v281_v21 = vpack.c.bf16 %v259_v18, %v258_v17  ;;  %v262_v23 = vld [vmem:[%s6303_s0 + $0x40] sm:$0xff]  ;;  %v263_v24 = vld [vmem:[%s6303_s0 + $0x48] sm:$0xff]  ;;  %s275_s10 = scalar_lea.vmem %s6275_s12, %s4981_s15  ;;  %s5195_s15 = sshll.u32 %s6139_s22, 5 }
  0x27   : > { %v282_v22 = vpack.c.bf16 %v261_v20, %v260_v19  ;;  %v264_v25 = vld [vmem:[%s6303_s0 + $0x50] sm:$0xff]  ;;  %v265_v26 = vld [vmem:[%s6303_s0 + $0x58] sm:$0xff]  ;;  %v283_v27 = vpack.c.bf16 %v263_v24, %v262_v23  ;;  %v266_v29 = vld [vmem:[%s6303_s0 + $0x60] sm:$0xff]  ;;  %s6355_s12 = scalar_select %p1033_p1, 1, 0 }
  0x28   : > { %5535 = vmatpush3.bf16.msra.mxu0 %v5720_v3  ;;  %v284_v28 = vpack.c.bf16 %v265_v26, %v264_v25  ;;  %v267_v30 = vld [vmem:[%s6303_s0 + $0x68] sm:$0xff]  ;;  %v268_v31 = vld [vmem:[%s6303_s0 + $0x70] sm:$0xff]  ;;  %v269_v32 = vld [vmem:[%s6303_s0 + $0x78] sm:$0xff]  ;;  %s6061_s27 = sshll.u32 %s6153_s17, 4  ;;  %s6062_s27 = int_to_ptr.vmem [resolvable:$false] %s6061_s27 }
  0x29   : > { %5536 = vmatprep.subr.bf16.mxu0 %v5721_v6  ;;  %v285_v33 = vpack.c.bf16 %v267_v30, %v266_v29  ;;  %v286_v34 = vpack.c.bf16 %v269_v32, %v268_v31  ;;  %v276_v35 = vld [vmem:[%s275_s10] sm:$0xff]  ;;  %v277_v36 = vld [vmem:[%s275_s10 + $0x8] sm:$0xff]  ;;  %v1035_v18 = vstv %s6355_s12  ;;  %s229_s12 = sand.u32 1, %s6127_s19  }
  0x2a   : > { %v287_v37 = vpack.c.bf16 %v277_v36, %v276_v35  ;;  %vm6490_vm2 = vcmp.eq.s32.totalorder %v1035_v18, 1  ;;  %s8497_s16 = sshll.u32 %s229_s12, 7  ;;  %s8730_s13 = scalar_lea.sflag [#allocation4], %s229_s12 }
  0x2b   : > { %s8521_s9 = scalar_lea.vmem [#allocation3], %s8497_s16  ;;  %s6063_s16 = scalar_lea.vmem %s6062_s27, 4096 }
  0x2c   : > { %5537 = vmatpush3.bf16.msra.mxu0 %v5721_v6  ;;  %s4887_s22 = sshll.u32 %s8521_s9, 4  ;;  %s8725_s22 = int_to_ptr.vmem [resolvable:$true] %s4887_s22 }
  0x2d   : > { %5538 = vmatprep.subr.bf16.mxu0 %v5722_v8  ;;  %s6057_s14 = scalar_lea.vmem %s8725_s22, 2048  ;;  %p6064_p7 = scmp.lt.s32.totalorder %s8725_s22, %s6062_s27 }
  0x2e   : > { %p6058_p4 = scmp.ne.s32.totalorder %s8725_s22, %s6057_s14  ;;  %p6065_p9 = scmp.lt.s32.totalorder %s6063_s16, %s6057_s14 }
  0x30   : > { %5539 = vmatpush3.bf16.msra.mxu0 %v5722_v8  ;;  %p6059_p5 = pnand %p6058_p4, %p6237_p3  ;;  %p6066_p10 = por %p6065_p9, %p6064_p7 }
  0x31   : > { %5540 = vmatprep.subr.bf16.mxu0 %v5723_v9 }
  0x32   : > { %p6060_p6 = pneg %p6059_p5 }
  0x34   : > { %5541 = vmatpush3.bf16.msra.mxu0 %v5723_v9  ;;  %p6067_p11 = pnand %p6066_p10, %p6060_p6 }
  0x35   : > { %5542 = vmatprep.subr.bf16.mxu0 %v5724_v10 }
  0x38   : > { %5543 = vmatpush3.bf16.msra.mxu0 %v5724_v10 }
  0x3b   : > { %5545 = vmatmul.mubr.bf16.vlgmr.msra.gmra.mrb[0].mxu0 %v279_v15 }
  0x3c   : > { %5548 = vmatprep.mubr.bf16.mxu0 %v280_v16 }
  0x43   : > { %5549 = vmatmul.mubr.bf16.gmra.mrb[4].mxu0 %v281_v21 }
  0x44   : > { %5552 = vmatprep.mubr.bf16.mxu0 %v282_v22 }
  0x4b   : > { %5553 = vmatmul.mubr.bf16.gmra.mrb[8].mxu0 %v283_v27 }
  0x4c   : > { %5556 = vmatprep.mubr.bf16.mxu0 %v284_v28 }
  0x53   : > { %5557 = vmatmul.mubr.bf16.gmra.mrb[12].mxu0 %v285_v33 }
  0x54   : > { %5560 = vmatprep.mubr.bf16.mxu0 %v286_v34 }
  0x5b   : > { %5561 = vmatmul.mubr.bf16.gmra.mrb[16].mxu0 %v287_v37 }
 0x10e   : > { %v5546_v40 = vpop.f32.mrb[0].mxu0 }
 0x10f   : > { %v471_v41 = vmul.f32 %v5546_v40, %v6327_v38  ;;  %v386_v42 = vpop.f32.mrb[1].mxu0 }
 0x110   : > { %v469_v43 = vmul.f32 %v6327_v38, %v386_v42  ;;  %v5547_v44 = vpop.f32.mrb[2].mxu0 }
 0x111   : > { %v495_v45 = vadd.f32 %v6332_v39, %v471_v41  ;;  %v472_v46 = vmul.f32 %v5547_v44, %v6327_v38  ;;  %v389_v47 = vpop.f32.mrb[3].mxu0 }
 0x112   : > { %v493_v48 = vadd.f32 %v6332_v39, %v469_v43  ;;  %v470_v49 = vmul.f32 %v6327_v38, %v389_v47 }
 0x113   : > { %v6340_v50 = vmul.f32 0.70710677, %v495_v45  ;;  %v496_v51 = vadd.f32 %v6332_v39, %v472_v46  ;;  %v6366_v26 = vmul.f32 0.5, %v495_v45 }
 0x114   : > { %v6343_v52 = vmul.f32 0.70710677, %v493_v48  ;;  %v494_v53 = vadd.f32 %v6332_v39, %v470_v49  ;;  %v6376_v31 = vmul.f32 0.5, %v493_v48 }
 0x115   : > { %v555_v54 = vand.u32 2147483647, %v6340_v50  ;;  %v6347_v55 = vmul.f32 0.70710677, %v496_v51  ;;  %v6382_v35 = vmul.f32 0.5, %v496_v51  ;;  %vm935_vm0 = vcmp.ge.f32.partialorder %v6340_v50, 0.0 }
 0x116   : > { %v553_v56 = vand.u32 2147483647, %v6343_v52  ;;  %v6351_v57 = vmul.f32 0.70710677, %v494_v53  ;;  %v5550_v3 = vpop.f32.mrb[4].mxu0  ;;  %v6390_v40 = vmul.f32 0.5, %v494_v53 }
 0x117   : > { %v575_v58 = vmul.f32 0.3275911, %v555_v54  ;;  %v815_v59 = vsub.f32 0.0, %v555_v54  ;;  %v556_v60 = vand.u32 2147483647, %v6347_v55  ;;  %v402_v7 = vpop.f32.mrb[5].mxu0  ;;  %v475_v15 = vmul.f32 %v5550_v3, %v6327_v38 }
 0x118   : > { %v573_v61 = vmul.f32 0.3275911, %v553_v56  ;;  %v813_v62 = vsub.f32 0.0, %v553_v56  ;;  %v554_v63 = vand.u32 2147483647, %v6351_v57  ;;  %v5551_v10 = vpop.f32.mrb[6].mxu0  ;;  %v473_v16 = vmul.f32 %v6327_v38, %v402_v7 }
 0x119   : > { %v595_v0 = vadd.f32 1.0, %v575_v58  ;;  %v576_v1 = vmul.f32 0.3275911, %v556_v60  ;;  %v816_v2 = vsub.f32 0.0, %v556_v60  ;;  %v835_v4 = vmul.f32 %v815_v59, %v555_v54  ;;  %v405_v12 = vpop.f32.mrb[7].mxu0  ;;  %v5729_v50 = vld [vmem:[%s8784_s2] sm:$0xff]  }
 0x11a   : > { %v593_v5 = vadd.f32 1.0, %v573_v61  ;;  %v574_v6 = vmul.f32 0.3275911, %v554_v63  ;;  %v833_v8 = vmul.f32 %v813_v62, %v553_v56  ;;  %v814_v11 = vsub.f32 0.0, %v554_v63 }
 0x11b   : > { %5829 = vrcp.f32 %v595_v0  ;;  %v596_v9 = vadd.f32 1.0, %v576_v1  ;;  %v836_v13 = vmul.f32 %v816_v2, %v556_v60  ;;  %v857_v17 = vmul.f32 1.442695, %v835_v4 }
 0x11c   : > { %5831 = vrcp.f32 %v593_v5  ;;  %v594_v14 = vadd.f32 1.0, %v574_v6  ;;  %v476_v19 = vmul.f32 %v5551_v10, %v6327_v38  ;;  %v474_v20 = vmul.f32 %v6327_v38, %v405_v12 }
 0x11d   : > { %v853_v22 = vmul.f32 1.442695, %v833_v8  ;;  %5833 = vrcp.f32 %v596_v9  ;;  %v499_v23 = vadd.f32 %v6332_v39, %v475_v15  ;;  %v6364_v24 = vadd.f32 %v6332_v39, %v473_v16 }
 0x11e   : > { %v5554_v21 = vpop.f32.mrb[8].mxu0  ;;  %v834_v27 = vmul.f32 %v814_v11, %v554_v63  ;;  %v6369_v28 = vadd.f32 %v6332_v39, %v476_v19  ;;  %v6372_v29 = vadd.f32 %v6332_v39, %v474_v20  ;;  %v859_v32 = vmul.f32 1.442695, %v836_v13 }
 0x11f   : > { %v418_v25 = vpop.f32.mrb[9].mxu0  ;;  %5835 = vrcp.f32 %v594_v14  ;;  %v6378_v33 = vmul.f32 0.70710677, %v499_v23  ;;  %v6385_v36 = vmul.f32 0.70710677, %v6364_v24  ;;  %v479_v46 = vmul.f32 %v5554_v21, %v6327_v38 }
 0x120   : > { %v6374_v30 = vpop.f32.mrb[10].mxu0  ;;  %5837 = vpow2.f32 %v857_v17  ;;  %v6388_v37 = vmul.f32 0.70710677, %v6369_v28  ;;  %v6394_v42 = vmul.f32 0.70710677, %v6372_v29  ;;  %v477_v4 = vmul.f32 %v6327_v38, %v418_v25 }
 0x121   : > { %v6380_v34 = vpop.f32.mrb[11].mxu0  ;;  %5839 = vpow2.f32 %v853_v22  ;;  %v559_v41 = vand.u32 2147483647, %v6378_v33  ;;  %v855_v43 = vmul.f32 1.442695, %v834_v27  ;;  %v6413_v8 = vmul.f32 0.5, %v499_v23 }
 0x122   : > { %v557_v44 = vand.u32 2147483647, %v6385_v36  ;;  %v560_v45 = vand.u32 2147483647, %v6388_v37  ;;  %5841 = vpow2.f32 %v859_v32  ;;  %v558_v51 = vand.u32 2147483647, %v6394_v42 }
 0x123   : > { %v579_v48 = vmul.f32 0.3275911, %v559_v41  ;;  %v819_v49 = vsub.f32 0.0, %v559_v41  ;;  %vm933_vm1 = vcmp.ge.f32.partialorder %v6343_v52, 0.0  ;;  %vm936_vm3 = vcmp.ge.f32.partialorder %v6347_v55, 0.0  ;;  %v5733_v55 = vld [vmem:[%s8784_s2 + $0x8] sm:$0xff]  }
 0x124   : > { %v577_v56 = vmul.f32 0.3275911, %v557_v44  ;;  %v817_v58 = vsub.f32 0.0, %v557_v44  ;;  %v820_v59 = vsub.f32 0.0, %v560_v45  ;;  %v580_v63 = vmul.f32 0.3275911, %v560_v45 }
 0x125   : > { %v6399_v47 = vpop.eup %5829  ;;  %v599_v61 = vadd.f32 1.0, %v579_v48  ;;  %v839_v62 = vmul.f32 %v819_v49, %v559_v41  ;;  %v578_v19 = vmul.f32 0.3275911, %v558_v51  ;;  %vm934_vm4 = vcmp.ge.f32.partialorder %v6351_v57, 0.0  ;;  %v5736_v57 = vld [vmem:[%s8784_s2 + $0xd8] sm:$0xff]  }
 0x126   : > { %v6402_v53 = vpop.eup %5831  ;;  %v635_v54 = vmul.f32 1.0614054, %v6399_v47  ;;  %v6406_v0 = vpop.f32.mrb[12].mxu0  ;;  %v597_v2 = vadd.f32 1.0, %v577_v56  ;;  %v837_v3 = vmul.f32 %v817_v58, %v557_v44  ;;  %v600_v9 = vadd.f32 1.0, %v580_v63 }
 0x127   : > { %v633_v60 = vmul.f32 1.0614054, %v6402_v53  ;;  %v6409_v5 = vpop.f32.mrb[13].mxu0  ;;  %v6411_v6 = vpop.eup %5833  ;;  %5843 = vrcp.f32 %v599_v61  ;;  %v865_v13 = vmul.f32 1.442695, %v839_v62  ;;  %v840_v17 = vmul.f32 %v820_v59, %v560_v45 }
 0x128   : > { %v655_v1 = vadd.f32 -1.4531521, %v635_v54  ;;  %v6415_v10 = vpop.f32.mrb[14].mxu0  ;;  %v636_v12 = vmul.f32 1.0614054, %v6411_v6  ;;  %5845 = vrcp.f32 %v597_v2  ;;  %v598_v41 = vadd.f32 1.0, %v578_v19 }
 0x129   : > { %v653_v7 = vadd.f32 -1.4531521, %v633_v60  ;;  %v6419_v14 = vpop.eup %5835  ;;  %v861_v16 = vmul.f32 1.442695, %v837_v3  ;;  %v6422_v20 = vpop.f32.mrb[15].mxu0  ;;  %5847 = vpow2.f32 %v855_v43  ;;  %v818_v44 = vsub.f32 0.0, %v558_v51 }
 0x12a   : > { %v675_v11 = vmul.f32 %v6399_v47, %v655_v1  ;;  %v5838_v21 = vpop.eup %5837  ;;  %v656_v23 = vadd.f32 -1.4531521, %v636_v12  ;;  %v634_v25 = vmul.f32 1.0614054, %v6419_v14  ;;  %5849 = vrcp.f32 %v600_v9 }
 0x12b   : > { %v673_v15 = vmul.f32 %v6402_v53, %v653_v7  ;;  %v5840_v27 = vpop.eup %5839  ;;  %5851 = vpow2.f32 %v865_v13  ;;  %v867_v59 = vmul.f32 1.442695, %v840_v17  ;;  %v838_v60 = vmul.f32 %v818_v44, %v558_v51 }
 0x12c   : > { %v695_v22 = vadd.f32 1.4214138, %v675_v11  ;;  %v676_v49 = vmul.f32 %v6411_v6, %v656_v23  ;;  %v654_v54 = vadd.f32 -1.4531521, %v634_v25  ;;  %v6429_v56 = vpop.eup %5841  ;;  %v6433_v43 = vadd.f32 %v6332_v39, %v479_v46 }
 0x12d   : > { %v693_v32 = vadd.f32 1.4214138, %v673_v15  ;;  %5853 = vrcp.f32 %v598_v41  ;;  %v6441_v7 = vmul.f32 0.5, %v6364_v24  ;;  %v6444_v9 = vmul.f32 0.5, %v6369_v28 }
 0x12e   : > { %v715_v48 = vmul.f32 %v6399_v47, %v695_v22  ;;  %v6427_v45 = vpop.f32.mrb[16].mxu0  ;;  %v696_v63 = vadd.f32 1.4214138, %v676_v49  ;;  %v674_v1 = vmul.f32 %v6419_v14, %v654_v54  ;;  %5855 = vpow2.f32 %v861_v16 }
 0x12f   : > { %v713_v58 = vmul.f32 %v6402_v53, %v693_v32  ;;  %v6435_v61 = vpop.f32.mrb[17].mxu0  ;;  %v6451_v13 = vmul.f32 0.70710677, %v6433_v43  ;;  %5857 = vpow2.f32 %v867_v59  ;;  %v6456_v24 = vmul.f32 1.442695, %v838_v60 }
 0x130   : > { %v735_v62 = vadd.f32 -0.28449672, %v715_v48  ;;  %v6438_v2 = vpop.f32.mrb[18].mxu0  ;;  %v716_v11 = vmul.f32 %v6411_v6, %v696_v63  ;;  %v694_v12 = vadd.f32 1.4214138, %v674_v1  ;;  %v6459_v28 = vadd.f32 %v6332_v39, %v477_v4 }
 0x131   : > { %v733_v3 = vadd.f32 -0.28449672, %v713_v58  ;;  %v6446_v51 = vpop.f32.mrb[19].mxu0  ;;  %v6453_v15 = vpop.eup %5843  ;;  %v6468_v44 = vand.u32 2147483647, %v6451_v13  ;;  %v6472_v4 = vmul.f32 %v6374_v30, %v6327_v38  ;;  %vm939_vm10 = vcmp.ge.f32.partialorder %v6378_v33, 0.0 }
 0x132   : > { %v755_v46 = vmul.f32 %v6399_v47, %v735_v62  ;;  %v6461_v16 = vpop.eup %5845  ;;  %v736_v22 = vadd.f32 -0.28449672, %v716_v11  ;;  %v714_v23 = vmul.f32 %v6419_v14, %v694_v12  ;;  %v639_v25 = vmul.f32 1.0614054, %v6453_v15 }
 0x133   : > { %v753_v17 = vmul.f32 %v6402_v53, %v733_v3  ;;  %v637_v41 = vmul.f32 1.0614054, %v6461_v16  ;;  %v5848_v48 = vpop.eup %5847  ;;  %v583_v1 = vmul.f32 0.3275911, %v6468_v44  ;;  %v6482_v30 = vmul.f32 0.70710677, %v6459_v28 }
 0x134   : > { %v775_v19 = vadd.f32 0.2548296, %v755_v46  ;;  %v756_v54 = vmul.f32 %v6411_v6, %v736_v22  ;;  %v734_v58 = vadd.f32 -0.28449672, %v714_v23  ;;  %v659_v59 = vadd.f32 -1.4531521, %v639_v25  ;;  %v6477_v60 = vpop.eup %5849 }
 0x135   : > { %v773_v32 = vadd.f32 0.2548296, %v753_v17  ;;  %v657_v63 = vadd.f32 -1.4531521, %v637_v41  ;;  %v6484_v3 = vpop.eup %5851  ;;  %v640_v22 = vmul.f32 1.0614054, %v6477_v60 }
 0x136   : > { %v795_v49 = vmul.f32 %v6399_v47, %v775_v19  ;;  %v776_v46 = vadd.f32 0.2548296, %v756_v54  ;;  %v754_v11 = vmul.f32 %v6419_v14, %v734_v58  ;;  %v679_v12 = vmul.f32 %v6453_v15, %v659_v59 }
 0x137   : > { %v793_v62 = vmul.f32 %v6402_v53, %v773_v32  ;;  %v677_v53 = vmul.f32 %v6461_v16, %v657_v63  ;;  %v603_v23 = vadd.f32 1.0, %v583_v1  ;;  %v6500_v25 = vpop.eup %5853  ;;  %vm937_vm11 = vcmp.ge.f32.partialorder %v6385_v36, 0.0 }
 0x138   : > { %v895_v47 = vmul.f32 %v5838_v21, %v795_v49  ;;  %v5725_v21 = vld [vmem:[%s8784_s2 + $0xc0] sm:$0xff]   ;;  %v774_v18 = vadd.f32 0.2548296, %v754_v11  ;;  %v699_v41 = vadd.f32 1.4214138, %v679_v12  ;;  %v6506_v54 = vpop.eup %5855  ;;  %vm940_vm14 = vcmp.ge.f32.partialorder %v6388_v37, 0.0 }
 0x139   : > { %v893_v17 = vmul.f32 %v5840_v27, %v793_v62  ;;  %v796_v27 = vmul.f32 %v6411_v6, %v776_v46  ;;  %v5726_v49 = vld [vmem:[%s8784_s2 + $0x80] sm:$0xff]   ;;  %v697_v59 = vadd.f32 1.4214138, %v677_v53  ;;  %v660_v62 = vadd.f32 -1.4531521, %v640_v22  ;;  %5304 = vmatprep.subr.bf16.mxu0 %v5725_v21  ;;  %v6512_v46 = vpop.eup %5857 }
 0x13a   : > { %v915_v32 = vsub.f32 1.0, %v895_v47  ;;  %5859 = vrcp.f32 %v603_v23  ;;  %v794_v6 = vmul.f32 %v6419_v14, %v774_v18  ;;  %v719_v47 = vmul.f32 %v6453_v15, %v699_v41  ;;  %5305 = vmatpush3.bf16.msra.mxu0 %v5726_v49  ;;  %v5730_v18 = vld [vmem:[%s8784_s2 + $0x88] sm:$0xff]  }
 0x13b   : > { %v913_v58 = vsub.f32 1.0, %v893_v17  ;;  %v896_v1 = vmul.f32 %v6429_v56, %v796_v27  ;;  %v717_v12 = vmul.f32 %v6461_v16, %v697_v59  ;;  %v680_v17 = vmul.f32 %v6477_v60, %v660_v62  ;;  %v5728_v56 = vld [vmem:[%s8784_s2 + $0xc8] sm:$0xff]   ;;  %v5727_v27 = vld [vmem:[%s8784_s2 + $0x40] sm:$0xff]  }
 0x13c   : > { %v955_v63 = vsub.f32 0.0, %v915_v32  ;;  %v638_v53 = vmul.f32 1.0614054, %v6500_v25  ;;  %v894_v23 = vmul.f32 %v5848_v48, %v794_v6  ;;  %v739_v21 = vadd.f32 -0.28449672, %v719_v47  ;;  %5306 = vmatprep.subr.bf16.mxu0 %v5728_v56  ;;  %5240 = vmatprep.subr.bf16.mxu1 %v5727_v27 }
 0x13d   : > { %v953_v11 = vsub.f32 0.0, %v913_v58  ;;  %v916_v22 = vsub.f32 1.0, %v896_v1  ;;  %v737_v59 = vadd.f32 -0.28449672, %v717_v12  ;;  %v700_v62 = vadd.f32 1.4214138, %v680_v17  ;;  %5241 = vmatpush3.bf16.msra.mxu1 %v5729_v50 }
 0x13e   : > { %v975_v14 = vsel %vm935_vm0, %v915_v32, %v955_v63  ;;  %v914_v63 = vsub.f32 1.0, %v894_v23  ;;  %v759_v1 = vmul.f32 %v6453_v15, %v739_v21  ;;  %5307 = vmatpush3.bf16.msra.mxu0 %v5730_v18  ;;  %v658_v47 = vadd.f32 -1.4531521, %v638_v53  ;;  %v5734_v53 = vld [vmem:[%s8784_s2 + $0x90] sm:$0xff]   ;;  %vm6677_vm0 = vmand %vm1335_vm8, %vm1329_vm6 }
 0x13f   : > { %v995_v41 = vadd.f32 1.0, %v975_v14  ;;  %v973_v49 = vsel %vm933_vm1, %v913_v58, %v953_v11  ;;  %v956_v32 = vsub.f32 0.0, %v916_v22  ;;  %v757_v52 = vmul.f32 %v6461_v16, %v737_v59  ;;  %v5732_v11 = vld [vmem:[%s8784_s2 + $0xd0] sm:$0xff]  }
 0x140   : > { %v993_v48 = vadd.f32 1.0, %v973_v49  ;;  %v720_v58 = vmul.f32 %v6477_v60, %v700_v62  ;;  %v954_v56 = vsub.f32 0.0, %v914_v63  ;;  %v779_v14 = vadd.f32 0.2548296, %v759_v1  ;;  %5308 = vmatprep.subr.bf16.mxu0 %v5732_v11 }
 0x141   : > { %v1015_v6 = vmul.f32 %v995_v41, %v6366_v26  ;;  %v976_v17 = vsel %vm936_vm3, %v916_v22, %v956_v32  ;;  %v5731_v26 = vld [vmem:[%s8784_s2 + $0x48] sm:$0xff]   ;;  %v777_v27 = vadd.f32 0.2548296, %v757_v52  ;;  %v823_v49 = vsub.f32 0.0, %v6468_v44  ;;  %v5738_v52 = vld [vmem:[%s8784_s2 + $0x98] sm:$0xff]  }
 0x142   : > { %v1013_v12 = vmul.f32 %v993_v48, %v6376_v31  ;;  %v996_v21 = vadd.f32 1.0, %v976_v17  ;;  %v740_v18 = vadd.f32 -0.28449672, %v720_v58  ;;  %v974_v22 = vsel %vm934_vm4, %v914_v63, %v954_v56  ;;  %5242 = vmatprep.subr.bf16.mxu1 %v5731_v26  ;;  %5309 = vmatpush3.bf16.msra.mxu0 %v5734_v53  ;;  %v1340_v17 = vld [vmem:[#allocation2 + $0xc] sm:$0xf] }
 0x143   : > { %v5203_v23 = vpack.c.bf16 %v1015_v6, %v1015_v6  ;;  %v799_v41 = vmul.f32 %v6453_v15, %v779_v14  ;;  %v6564_v32 = vmul.f32 %v6500_v25, %v658_v47  ;;  %5243 = vmatpush3.bf16.msra.mxu1 %v5733_v55  ;;  %v994_v15 = vadd.f32 1.0, %v974_v22  ;;  %5310 = vmatprep.subr.bf16.mxu0 %v5736_v57 }
 0x144   : > { %v1045_v31 = vsel %vm6490_vm2, %v1013_v12, 0.0  ;;  %v6559_v59 = vpop.eup %5859  ;;  %v1016_v48 = vmul.f32 %v996_v21, %v6382_v35  ;;  %v797_v1 = vmul.f32 %v6461_v16, %v777_v27  ;;  %v760_v6 = vmul.f32 %v6477_v60, %v740_v18  ;;  %v5735_v35 = vld [vmem:[%s8784_s2 + $0x50] sm:$0xff]   ;;  %v1331_v18 = vld [vmem:[#allocation2] sm:$0xf] }
 0x145   : > { %v1146_v62 = vshrl.u32 %v5203_v23, 16  ;;  %v5201_v50 = vpack.c.bf16 %v1045_v31, %v1045_v31  ;;  %v899_v63 = vmul.f32 %v6484_v3, %v799_v41  ;;  %v1149_v47 = vshll.u32 %v5203_v23, 16  ;;  %v5737_v3 = vld [vmem:[%s8784_s2 + $0x10] sm:$0xff]   ;;  %5244 = vmatprep.subr.bf16.mxu1 %v5735_v35  ;;  %v5740_v31 = vld [vmem:[%s8784_s2 + $0xe0] sm:$0xff]  }
 0x146   : > { %v5204_v12 = vpack.c.bf16 %v1016_v48, %v1016_v48  ;;  %v1014_v56 = vmul.f32 %v994_v15, %v6390_v40  ;;  %v897_v26 = vmul.f32 %v6506_v54, %v797_v1  ;;  %v780_v53 = vadd.f32 0.2548296, %v760_v6  ;;  %5311 = vmatpush3.bf16.msra.mxu0 %v5738_v52  ;;  %v5741_v1 = vld [vmem:[%s8784_s2 + $0x18] sm:$0xff]   ;;  %v1344_v35 = vld [vmem:[#allocation2 + $0x14] sm:$0x1] }
 0x147   : > { %v1148_v58 = vrot.slane %v1146_v62, 7  ;;  %v1129_v11 = vshrl.u32 %v5201_v50, 16  ;;  %v919_v14 = vsub.f32 1.0, %v899_v63  ;;  %v1132_v27 = vshll.u32 %v5201_v50, 16  ;;  %5245 = vmatpush3.bf16.msra.mxu1 %v5737_v3  ;;  %v5739_v62 = vld [vmem:[%s8784_s2 + $0x58] sm:$0xff]   ;;  %v5742_v50 = vld [vmem:[%s8784_s2 + $0xa0] sm:$0xff]   ;;  %5312 = vmatprep.subr.bf16.mxu0 %v5740_v31 }
 0x148   : > { %v1154_v55 = vshrl.u32 %v5204_v12, 16  ;;  %v1046_v40 = vsel %vm6490_vm2, %v1014_v56, 0.0  ;;  %v917_v54 = vsub.f32 1.0, %v897_v26  ;;  %v1157_v63 = vshll.u32 %v5204_v12, 16  ;;  %5246 = vmatprep.subr.bf16.mxu1 %v5739_v62  ;;  %v5744_v26 = vld [vmem:[%s8784_s2 + $0xe8] sm:$0xff]  }
 0x149   : > { %v1151_v23 = vor.u32 %v1149_v47, %v1148_v58  ;;  %v6589_v21 = vrot.slane %v1129_v11, 7  ;;  %v1152_v22 = vrot.slane %v1148_v58, 4  ;;  %v959_v41 = vsub.f32 0.0, %v919_v14 }
 0x14a   : > { %v1156_v15 = vrot.slane %v1154_v55, 7  ;;  %v5202_v52 = vpack.c.bf16 %v1046_v40, %v1046_v40  ;;  %v957_v47 = vsub.f32 0.0, %v917_v54  ;;  %v800_v11 = vmul.f32 %v6477_v60, %v780_v53  ;;  %5313 = vmatpush3.bf16.msra.mxu0 %v5742_v50  ;;  %v5743_v53 = vld [vmem:[%s8784_s2 + $0x60] sm:$0xff]   ;;  %v1337_v50 = vld [vmem:[#allocation2 + $0x8] sm:$0x1] }
 0x14b   : > { %v1341_v19 = vsel %vm6583_vm12, %v1151_v23, %v1340_v17  ;;  %v1134_v57 = vor.u32 %v1132_v27, %v6589_v21  ;;  %v979_v58 = vsel %vm939_vm10, %v919_v14, %v959_v41  ;;  %5247 = vmatpush3.bf16.msra.mxu1 %v5741_v1  ;;  %v5746_v27 = vld [vmem:[%s8784_s2 + $0xa8] sm:$0xff]   ;;  %5314 = vmatprep.subr.bf16.mxu0 %v5744_v26  ;;  %v643_v62 = vmul.f32 1.0614054, %v6559_v59 }
 0x14c   : > { %1342 = vst [vmem:[#allocation2 + $0xc] sm:$0xf] %v1341_v19  ;;  %v1159_v3 = vor.u32 %v1157_v63, %v1156_v15  ;;  %v1161_v17 = vrot.slane %v1156_v15, 4  ;;  %v999_v56 = vadd.f32 1.0, %v979_v58  ;;  %v1137_v23 = vshrl.u32 %v5202_v52, 16  ;;  %5248 = vmatprep.subr.bf16.mxu1 %v5743_v53  ;;  %v5748_v15 = vld [vmem:[%s8784_s2 + $0xf0] sm:$0xff]  }
 0x14d   : > { %v1332_v12 = vsel %vm6583_vm12, %v1134_v57, %v1331_v18  ;;  %v1140_v33 = vshll.u32 %v5202_v52, 16  ;;  %v977_v14 = vsel %vm937_vm11, %v917_v54, %v957_v47  ;;  %v900_v60 = vmul.f32 %v6512_v46, %v800_v11  ;;  %v5745_v46 = vld [vmem:[%s8784_s2 + $0x20] sm:$0xff]  }
 0x14e   : > { %1333 = vst [vmem:[#allocation2] sm:$0xf] %v1332_v12  ;;  %v1160_v18 = vsel %vm6617_vm15, %v1152_v22, %v1159_v3  ;;  %v1345_v55 = vsel %vm6604_vm13, %v1161_v17, %v1344_v35  ;;  %v1019_v31 = vmul.f32 %v999_v56, %v6413_v8  ;;  %v997_v36 = vadd.f32 1.0, %v977_v14  ;;  %5315 = vmatpush3.bf16.msra.mxu0 %v5746_v27  ;;  %v1354_v3 = vld [vmem:[#allocation2 + $0x24] sm:$0xf] }
 0x14f   : > { %1343 = vst [vmem:[#allocation2 + $0x10] sm:$0xf] %v1160_v18  ;;  %1346 = vst [vmem:[#allocation2 + $0x14] sm:$0x1] %v1345_v55  ;;  %v1139_v40 = vrot.slane %v1137_v23, 7  ;;  %v920_v41 = vsub.f32 1.0, %v900_v60  ;;  %v843_v57 = vmul.f32 %v823_v49, %v6468_v44  ;;  %5249 = vmatpush3.bf16.msra.mxu1 %v5745_v46  ;;  %5861 = vpow2.f32 %v6456_v24  ;;  %5316 = vmatprep.subr.bf16.mxu0 %v5748_v15 }
 0x150   : > { %v698_v54 = vadd.f32 1.4214138, %v6564_v32  ;;  %v1135_v22 = vrot.slane %v6589_v21, 4  ;;  %v5207_v8 = vpack.c.bf16 %v1019_v31, %v1019_v31  ;;  %v1017_v19 = vmul.f32 %v997_v36, %v6441_v7  ;;  %v5747_v21 = vld [vmem:[%s8784_s2 + $0x68] sm:$0xff]   ;;  %v5750_v7 = vld [vmem:[%s8784_s2 + $0xb0] sm:$0xff]  }
 0x151   : > { %v1142_v32 = vor.u32 %v1140_v33, %v1139_v40  ;;  %v1144_v63 = vrot.slane %v1139_v40, 4  ;;  %v960_v1 = vsub.f32 0.0, %v920_v41  ;;  %v663_v58 = vadd.f32 -1.4531521, %v643_v62  ;;  %5250 = vmatprep.subr.bf16.mxu1 %v5747_v21  ;;  %v5749_v24 = vld [vmem:[%s8784_s2 + $0x28] sm:$0xff]   ;;  %v5752_v55 = vld [vmem:[%s8784_s2 + $0x70] sm:$0xff]  }
 0x152   : > { %v718_v35 = vmul.f32 %v6500_v25, %v698_v54  ;;  %v1180_v44 = vshrl.u32 %v5207_v8, 16  ;;  %v5205_v49 = vpack.c.bf16 %v1017_v19, %v1017_v19  ;;  %5317 = vmatpush3.bf16.msra.mxu0 %v5750_v7  ;;  %v1183_v37 = vshll.u32 %v5207_v8, 16  ;;  %v1347_v62 = vld [vmem:[#allocation2 + $0x18] sm:$0xf] }
 0x153   : > { %v1406_v52 = vld [vmem:[#allocation2 + $0xc] sm:$0x1]  ;;  %v1143_v11 = vsel %vm6617_vm15, %v1135_v22, %v1142_v32  ;;  %v1338_v12 = vsel %vm6604_vm13, %v1144_v63, %v1337_v50  ;;  %v980_v17 = vsel %vm940_vm14, %v920_v41, %v960_v1  ;;  %v683_v27 = vmul.f32 %v6559_v59, %v663_v58  ;;  %5251 = vmatpush3.bf16.msra.mxu1 %v5749_v24  ;;  %v5753_v8 = vld [vmem:[%s8784_s2 + $0xf8] sm:$0xff]   ;;  %v5754_v32 = vld [vmem:[%s8784_s2 + $0x30] sm:$0xff]  }
 0x154   : > { %v1407_v47 = vsel %vm6604_vm13, 0, %v1406_v52  ;;  %1334 = vst [vmem:[#allocation2 + $0x4] sm:$0xf] %v1143_v11  ;;  %1339 = vst [vmem:[#allocation2 + $0x8] sm:$0x1] %v1338_v12  ;;  %v6681_v23 = vrot.slane %v1180_v44, 7  ;;  %5252 = vmatprep.subr.bf16.mxu1 %v5752_v55  ;;  %v6704_v15 = vadd.f32 %v6332_v39, %v6472_v4  ;;  %5318 = vmatprep.subr.bf16.mxu0 %v5753_v8 }
 0x155   : > { %1408 = vst [vmem:[#allocation2 + $0xc] sm:$0x1] %v1407_v47  ;;  %v1403_v26 = vld [vmem:[#allocation2] sm:$0x1]  ;;  %v1163_v33 = vshrl.u32 %v5205_v49, 16  ;;  %v1000_v14 = vadd.f32 1.0, %v980_v17 }
 0x156   : > { %v1404_v60 = vsel %vm6604_vm13, 0, %v1403_v26  ;;  %v738_v53 = vadd.f32 -0.28449672, %v718_v35  ;;  %v873_v18 = vmul.f32 1.442695, %v843_v57  ;;  %v1185_v36 = vor.u32 %v1183_v37, %v6681_v23  ;;  %v5755_v63 = vld [vmem:[%s8784_s2 + $0xb8] sm:$0xff]  }
 0x157   : > { %1405 = vst [vmem:[#allocation2] sm:$0x1] %v1404_v60  ;;  %v1437_v31 = vld [vmem:[#allocation2 + $0x14] sm:$0x1]  ;;  %v6690_v46 = vrot.slane %v1163_v33, 7  ;;  %v1166_v40 = vshll.u32 %v5205_v49, 16  ;;  %v1020_v41 = vmul.f32 %v1000_v14, %v6444_v9  ;;  %5253 = vmatpush3.bf16.msra.mxu1 %v5754_v32  ;;  %5319 = vmatpush3.bf16.msra.mxu0 %v5755_v63 }
 0x158   : > { %v1438_v54 = vsel %vm6677_vm0, 0, %v1437_v31  ;;  %v758_v22 = vmul.f32 %v6500_v25, %v738_v53  ;;  %v703_v50 = vadd.f32 1.4214138, %v683_v27  ;;  %5863 = vpow2.f32 %v873_v18  ;;  %v5756_v4 = vld [vmem:[%s8784_s2 + $0x78] sm:$0xff]   ;;  %v1358_v33 = vld [vmem:[#allocation2 + $0x2c] sm:$0x1] }
 0x159   : > { %1439 = vst [vmem:[#allocation2 + $0x14] sm:$0x1] %v1438_v54  ;;  %v1355_v19 = vsel %vm6583_vm12, %v1185_v36, %v1354_v3  ;;  %v1168_v57 = vor.u32 %v1166_v40, %v6690_v46  ;;  %v5208_v9 = vpack.c.bf16 %v1020_v41, %v1020_v41  ;;  %v561_v21 = vand.u32 2147483647, %v6482_v30  ;;  %v5757_v49 = vld [vmem:[%s8784_s2 + $0x38] sm:$0xff]   ;;  %5254 = vmatprep.subr.bf16.mxu1 %v5756_v4  ;;  %v5862_v17 = vpop.eup %5861 }
 0x15a   : > { %1356 = vst [vmem:[#allocation2 + $0x24] sm:$0xf] %v1355_v19  ;;  %v778_v1 = vadd.f32 0.2548296, %v758_v22  ;;  %v723_v35 = vmul.f32 %v6559_v59, %v703_v50  ;;  %v1186_v7 = vrot.slane %v6681_v23, 4  ;;  %v478_v3 = vmul.f32 %v6327_v38, %v6380_v34 }
 0x15b   : > { %v1348_v52 = vsel %vm6583_vm12, %v1168_v57, %v1347_v62  ;;  %v1188_v44 = vshrl.u32 %v5208_v9, 16  ;;  %v1434_v58 = vld [vmem:[#allocation2 + $0x8] sm:$0x1]  ;;  %v581_v12 = vmul.f32 0.3275911, %v561_v21  ;;  %v1191_v23 = vshll.u32 %v5208_v9, 16  ;;  %5255 = vmatpush3.bf16.msra.mxu1 %v5757_v49 }
 0x15c   : > { %1349 = vst [vmem:[#allocation2 + $0x18] sm:$0xf] %v1348_v52  ;;  %v798_v47 = vmul.f32 %v6500_v25, %v778_v1  ;;  %v743_v11 = vadd.f32 -0.28449672, %v723_v35  ;;  %v1435_v24 = vsel %vm6677_vm0, 0, %v1434_v58  ;;  %v821_v53 = vsub.f32 0.0, %v561_v21 }
 0x15d   : > { %v1190_v26 = vrot.slane %v1188_v44, 7  ;;  %v6729_v37 = vmul.f32 0.70710677, %v6704_v15  ;;  %1436 = vst [vmem:[#allocation2 + $0x8] sm:$0x1] %v1435_v24  ;;  %v601_v60 = vadd.f32 1.0, %v581_v12  ;;  %v6734_v55 = vadd.f32 %v6332_v39, %v478_v3 }
 0x15e   : > { %v898_v14 = vmul.f32 %v5862_v17, %v798_v47  ;;  %v763_v25 = vmul.f32 %v6559_v59, %v743_v11  ;;  %vm938_vm1 = vcmp.ge.f32.partialorder %v6394_v42, 0.0  ;;  %v841_v9 = vmul.f32 %v821_v53, %v561_v21 }
 0x15f   : > { %v1193_v27 = vor.u32 %v1191_v23, %v1190_v26  ;;  %v1195_v18 = vrot.slane %v1190_v26, 4  ;;  %v564_v34 = vand.u32 2147483647, %v6729_v37  ;;  %5865 = vrcp.f32 %v601_v60 }
 0x160   : > { %v918_v31 = vsub.f32 1.0, %v898_v14  ;;  %v783_v36 = vadd.f32 0.2548296, %v763_v25  ;;  %v6745_v63 = vmul.f32 0.70710677, %v6734_v55  ;;  %v518_v52 = vmul.f32 0.5, %v6372_v29 }
 0x161   : > { %v1412_v40 = vld [vmem:[#allocation2 + $0x24] sm:$0x1]  ;;  %v1194_v41 = vsel %vm6617_vm15, %v1186_v7, %v1193_v27  ;;  %v1359_v54 = vsel %vm6604_vm13, %v1195_v18, %v1358_v33  ;;  %v584_v62 = vmul.f32 0.3275911, %v564_v34  ;;  %v824_v7 = vsub.f32 0.0, %v564_v34 }
 0x162   : > { %v5864_v22 = vpop.eup %5863  ;;  %v1413_v50 = vsel %vm6604_vm13, 0, %v1412_v40  ;;  %1357 = vst [vmem:[#allocation2 + $0x28] sm:$0xf] %v1194_v41  ;;  %1360 = vst [vmem:[#allocation2 + $0x2c] sm:$0x1] %v1359_v54  ;;  %v958_v8 = vsub.f32 0.0, %v918_v31  ;;  %v803_v19 = vmul.f32 %v6559_v59, %v783_v36  ;;  %v483_v49 = vmul.f32 %v6406_v0, %v6327_v38 }
 0x163   : > { %1414 = vst [vmem:[#allocation2 + $0x24] sm:$0x1] %v1413_v50  ;;  %v1409_v57 = vld [vmem:[#allocation2 + $0x18] sm:$0x1]  ;;  %v604_v32 = vadd.f32 1.0, %v584_v62  ;;  %v523_v42 = vmul.f32 0.5, %v6433_v43  ;;  %v481_v58 = vmul.f32 %v6327_v38, %v6409_v5  ;;  %v844_v17 = vmul.f32 %v824_v7, %v564_v34 }
 0x164   : > { %v1410_v1 = vsel %vm6604_vm13, 0, %v1409_v57  ;;  %v978_v35 = vsel %vm938_vm1, %v918_v31, %v958_v8  ;;  %v903_v4 = vmul.f32 %v5864_v22, %v803_v19  ;;  %v562_v59 = vand.u32 2147483647, %v6745_v63  ;;  %v1351_v36 = vld [vmem:[#allocation2 + $0x20] sm:$0x1] }
 0x165   : > { %1411 = vst [vmem:[#allocation2 + $0x18] sm:$0x1] %v1410_v1  ;;  %v998_v44 = vadd.f32 1.0, %v978_v35  ;;  %5867 = vrcp.f32 %v604_v32  ;;  %v6757_v11 = vmul.f32 0.5, %v6459_v28  ;;  %v869_v12 = vmul.f32 1.442695, %v841_v9 }
 0x166   : > { %v923_v21 = vsub.f32 1.0, %v903_v4  ;;  %v582_v3 = vmul.f32 0.3275911, %v562_v59  ;;  %vm943_vm2 = vcmp.ge.f32.partialorder %v6451_v13, 0.0  ;;  %v507_v24 = vadd.f32 %v6332_v39, %v483_v49 }
 0x167   : > { %v1018_v47 = vmul.f32 %v998_v44, %v518_v52  ;;  %v1169_v43 = vrot.slane %v6690_v46, 4  ;;  %v6763_v0 = vmul.f32 0.5, %v6704_v15  ;;  %v6772_v13 = vadd.f32 %v6332_v39, %v481_v58 }
 0x168   : > { %v963_v29 = vsub.f32 0.0, %v923_v21  ;;  %v602_v5 = vadd.f32 1.0, %v582_v3  ;;  %v6769_v25 = vmul.f32 0.70710677, %v507_v24  ;;  %5869 = vpow2.f32 %v869_v12  ;;  %v1368_v3 = vld [vmem:[#allocation2 + $0x3c] sm:$0xf] }
 0x169   : > { %v1443_v26 = vld [vmem:[#allocation2 + $0x2c] sm:$0x1]  ;;  %v5206_v23 = vpack.c.bf16 %v1018_v47, %v1018_v47  ;;  %v6765_v33 = vpop.eup %5865  ;;  %v875_v15 = vmul.f32 1.442695, %v844_v17  ;;  %v822_v27 = vsub.f32 0.0, %v562_v59  ;;  %v484_v22 = vmul.f32 %v6415_v10, %v6327_v38 }
 0x16a   : > { %v1444_v28 = vsel %vm6677_vm0, 0, %v1443_v26  ;;  %v983_v14 = vsel %vm943_vm2, %v923_v21, %v963_v29  ;;  %v641_v53 = vmul.f32 1.0614054, %v6765_v33  ;;  %5871 = vrcp.f32 %v602_v5 }
 0x16b   : > { %1445 = vst [vmem:[#allocation2 + $0x2c] sm:$0x1] %v1444_v28  ;;  %v1171_v60 = vshrl.u32 %v5206_v23, 16  ;;  %v1003_v46 = vadd.f32 1.0, %v983_v14  ;;  %v567_v18 = vand.u32 2147483647, %v6769_v25  ;;  %v842_v52 = vmul.f32 %v822_v27, %v562_v59 }
 0x16c   : > { %v1174_v31 = vshll.u32 %v5206_v23, 16  ;;  %v661_v41 = vadd.f32 -1.4531521, %v641_v53  ;;  %v6777_v39 = vmul.f32 0.70710677, %v6772_v13  ;;  %v6786_v1 = vmul.f32 0.5, %v6734_v55 }
 0x16d   : > { %v1173_v34 = vrot.slane %v1171_v60, 7  ;;  %v1023_v40 = vmul.f32 %v1003_v46, %v523_v42  ;;  %v587_v54 = vmul.f32 0.3275911, %v567_v18  ;;  %v827_v62 = vsub.f32 0.0, %v567_v18  ;;  %v6796_v55 = vld [vmem:[%s8786_s4 + $0x1] ss:$0 sm:$0xff] }
 0x16e   : > { %v681_v9 = vmul.f32 %v6765_v33, %v661_v41  ;;  %v565_v4 = vand.u32 2147483647, %v6777_v39  ;;  %v508_v21 = vadd.f32 %v6796_v55, %v484_v22  ;;  %v5759_v59 = vld [vmem:[%s8784_s2 + $0x140] sm:$0xff]   ;;  %v871_v5 = vmul.f32 1.442695, %v842_v52 }
 0x16f   : > { %v6781_v50 = vpop.eup %5867  ;;  %v1176_v8 = vor.u32 %v1174_v31, %v1173_v34  ;;  %v1178_v19 = vrot.slane %v1173_v34, 4  ;;  %v5211_v57 = vpack.c.bf16 %v1023_v40, %v1023_v40  ;;  %v607_v35 = vadd.f32 1.0, %v587_v54  ;;  %5368 = vmatprep.subr.bf16.mxu1 %v5759_v59 }
 0x170   : > { %v644_v32 = vmul.f32 1.0614054, %v6781_v50  ;;  %v701_v44 = vadd.f32 1.4214138, %v681_v9  ;;  %v847_v47 = vmul.f32 %v827_v62, %v567_v18  ;;  %v585_v12 = vmul.f32 0.3275911, %v565_v4 }
 0x171   : > { %v1177_v7 = vsel %vm6617_vm15, %v1169_v43, %v1176_v8  ;;  %v1352_v38 = vsel %vm6604_vm13, %v1178_v19, %v1351_v36  ;;  %v1214_v10 = vshrl.u32 %v5211_v57, 16  ;;  %5873 = vrcp.f32 %v607_v35  ;;  %v6816_v18 = vld [vmem:[%s8786_s4] ss:$0 sm:$0xff] }
 0x172   : > { %1350 = vst [vmem:[#allocation2 + $0x1c] sm:$0xf] %v1177_v7  ;;  %1353 = vst [vmem:[#allocation2 + $0x20] sm:$0x1] %v1352_v38  ;;  %v664_v42 = vadd.f32 -1.4531521, %v644_v32  ;;  %v721_v29 = vmul.f32 %v6765_v33, %v701_v44  ;;  %5875 = vpow2.f32 %v875_v15  ;;  %v5870_v26 = vpop.eup %5869  ;;  %v482_v15 = vmul.f32 %v6816_v18, %v6422_v20 }
 0x173   : > { %v6799_v49 = vrot.slane %v1214_v10, 7  ;;  %v1217_v58 = vshll.u32 %v5211_v57, 16  ;;  %v825_v43 = vsub.f32 0.0, %v565_v4  ;;  %v6807_v28 = vmul.f32 0.5, %v507_v24  ;;  %v5774_v62 = vld [vmem:[%s8784_s2 + $0x1c0] sm:$0xff]  }
 0x174   : > { %v684_v17 = vmul.f32 %v6781_v50, %v664_v42  ;;  %v605_v14 = vadd.f32 1.0, %v585_v12  ;;  %v6809_v60 = vpop.eup %5871  ;;  %v741_v46 = vadd.f32 -0.28449672, %v721_v29  ;;  %v6811_v27 = vmul.f32 0.70710677, %v508_v21  ;;  %5432 = vmatprep.subr.bf16.mxu0 %v5774_v62 }
 0x175   : > { %v1219_v23 = vor.u32 %v1217_v58, %v6799_v49  ;;  %v642_v34 = vmul.f32 1.0614054, %v6809_v60  ;;  %v881_v31 = vmul.f32 1.442695, %v847_v47  ;;  %v845_v41 = vmul.f32 %v825_v43, %v565_v4 }
 0x176   : > { %v704_v53 = vadd.f32 1.4214138, %v684_v17  ;;  %5877 = vrcp.f32 %v605_v14  ;;  %v761_v36 = vmul.f32 %v6765_v33, %v741_v46  ;;  %v568_v54 = vand.u32 2147483647, %v6811_v27 }
 0x177   : > { %v1369_v24 = vsel %vm6583_vm12, %v1219_v23, %v1368_v3  ;;  %v662_v22 = vadd.f32 -1.4531521, %v642_v34  ;;  %5879 = vpow2.f32 %v871_v5  ;;  %v6830_v8 = vmul.f32 0.5, %v6772_v13 }
 0x178   : > { %1370 = vst [vmem:[#allocation2 + $0x3c] sm:$0xf] %v1369_v24  ;;  %v724_v40 = vmul.f32 %v6781_v50, %v704_v53  ;;  %v506_v19 = vadd.f32 %v6796_v55, %v482_v15  ;;  %v781_v9 = vadd.f32 0.2548296, %v761_v36  ;;  %v487_v35 = vmul.f32 %v6816_v18, %v6427_v45 }
 0x179   : > { %v1440_v20 = vld [vmem:[#allocation2 + $0x20] sm:$0x1]  ;;  %vm941_vm3 = vcmp.ge.f32.partialorder %v6482_v30, 0.0  ;;  %v682_v4 = vmul.f32 %v6809_v60, %v662_v22  ;;  %5881 = vpow2.f32 %v881_v31  ;;  %v588_v7 = vmul.f32 0.3275911, %v568_v54 }
 0x17a   : > { %v1441_v57 = vsel %vm6677_vm0, 0, %v1440_v20  ;;  %v744_v32 = vadd.f32 -0.28449672, %v724_v40  ;;  %v6839_v13 = vmul.f32 0.70710677, %v506_v19  ;;  %v801_v10 = vmul.f32 %v6765_v33, %v781_v9 }
 0x17b   : > { %1442 = vst [vmem:[#allocation2 + $0x20] sm:$0x1] %v1441_v57  ;;  %v6841_v38 = vpop.eup %5873  ;;  %v877_v44 = vmul.f32 1.442695, %v845_v41  ;;  %v6845_v42 = vmul.f32 0.5, %v508_v21  ;;  %v608_v47 = vadd.f32 1.0, %v588_v7  ;;  %v6850_v43 = vadd.f32 %v6796_v55, %v487_v35 }
 0x17c   : > { %v764_v52 = vmul.f32 %v6781_v50, %v744_v32  ;;  %v702_v45 = vadd.f32 1.4214138, %v682_v4  ;;  %v647_v58 = vmul.f32 1.0614054, %v6841_v38  ;;  %v828_v12 = vsub.f32 0.0, %v568_v54  ;;  %v5876_v59 = vpop.eup %5875 }
 0x17d   : > { %v901_v3 = vmul.f32 %v5870_v26, %v801_v10  ;;  %v566_v17 = vand.u32 2147483647, %v6839_v13  ;;  %v1220_v33 = vrot.slane %v6799_v49, 4  ;;  %vm944_vm4 = vcmp.ge.f32.partialorder %v6729_v37, 0.0 }
 0x17e   : > { %v784_v29 = vadd.f32 0.2548296, %v764_v52  ;;  %v722_v21 = vmul.f32 %v6809_v60, %v702_v45  ;;  %v667_v5 = vadd.f32 -1.4531521, %v647_v58  ;;  %5883 = vrcp.f32 %v608_v47 }
 0x17f   : > { %v1418_v23 = vld [vmem:[#allocation2 + $0x3c] sm:$0x1]  ;;  %v921_v46 = vsub.f32 1.0, %v901_v3  ;;  %5885 = vpow2.f32 %v877_v44  ;;  %v848_v34 = vmul.f32 %v828_v12, %v568_v54  ;;  %v586_v31 = vmul.f32 0.3275911, %v566_v17 }
 0x180   : > { %v1419_v14 = vsel %vm6604_vm13, 0, %v1418_v23  ;;  %v804_v26 = vmul.f32 %v6781_v50, %v784_v29  ;;  %v6858_v53 = vpop.eup %5877  ;;  %v742_v15 = vadd.f32 -0.28449672, %v722_v21  ;;  %v687_v24 = vmul.f32 %v6841_v38, %v667_v5 }
 0x181   : > { %1420 = vst [vmem:[#allocation2 + $0x3c] sm:$0x1] %v1419_v14  ;;  %v961_v36 = vsub.f32 0.0, %v921_v46  ;;  %v645_v41 = vmul.f32 1.0614054, %v6858_v53  ;;  %v5880_v20 = vpop.eup %5879  ;;  %v606_v57 = vadd.f32 1.0, %v586_v31 }
 0x182   : > { %v904_v40 = vmul.f32 %v5876_v59, %v804_v26  ;;  %v6863_v62 = vmul.f32 0.70710677, %v6850_v43  ;;  %v762_v22 = vmul.f32 %v6809_v60, %v742_v15  ;;  %v707_v50 = vadd.f32 1.4214138, %v687_v24 }
 0x183   : > { %v826_v9 = vsub.f32 0.0, %v566_v17  ;;  %v981_v32 = vsel %vm941_vm3, %v921_v46, %v961_v36  ;;  %v665_v4 = vadd.f32 -1.4531521, %v645_v41  ;;  %v5882_v7 = vpop.eup %5881  ;;  %5887 = vrcp.f32 %v606_v57 }
 0x184   : > { %v924_v35 = vsub.f32 1.0, %v904_v40  ;;  %v571_v54 = vand.u32 2147483647, %v6863_v62  ;;  %v1001_v10 = vadd.f32 1.0, %v981_v32  ;;  %v782_v52 = vadd.f32 0.2548296, %v762_v22 }
 0x185   : > { %v727_v44 = vmul.f32 %v6841_v38, %v707_v50  ;;  %v685_v58 = vmul.f32 %v6858_v53, %v665_v4  ;;  %v6871_v47 = vmul.f32 0.5, %v506_v19  ;;  %vm942_vm5 = vcmp.ge.f32.partialorder %v6745_v63, 0.0 }
 0x186   : > { %v964_v45 = vsub.f32 0.0, %v924_v35  ;;  %v591_v12 = vmul.f32 0.3275911, %v571_v54  ;;  %v1021_v59 = vmul.f32 %v1001_v10, %v6757_v11  ;;  %v802_v30 = vmul.f32 %v6809_v60, %v782_v52 }
 0x187   : > { %v747_v3 = vadd.f32 -0.28449672, %v727_v44  ;;  %v846_v29 = vmul.f32 %v826_v9, %v566_v17  ;;  %v705_v21 = vadd.f32 1.4214138, %v685_v58  ;;  %v883_v5 = vmul.f32 1.442695, %v848_v34 }
 0x188   : > { %v984_v23 = vsel %vm944_vm4, %v924_v35, %v964_v45  ;;  %v611_v14 = vadd.f32 1.0, %v591_v12  ;;  %v6878_v46 = vpop.eup %5883  ;;  %v5209_v26 = vpack.c.bf16 %v1021_v59, %v1021_v59  ;;  %v902_v15 = vmul.f32 %v5880_v20, %v802_v30  ;;  %v1361_v35 = vld [vmem:[#allocation2 + $0x30] sm:$0xf] }
 0x189   : > { %v1004_v19 = vadd.f32 1.0, %v984_v23  ;;  %v767_v24 = vmul.f32 %v6841_v38, %v747_v3  ;;  %v5886_v11 = vpop.eup %5885  ;;  %v725_v60 = vmul.f32 %v6858_v53, %v705_v21  ;;  %v648_v31 = vmul.f32 1.0614054, %v6878_v46 }
 0x18a   : > { %5889 = vrcp.f32 %v611_v14  ;;  %v831_v17 = vsub.f32 0.0, %v571_v54  ;;  %v1197_v36 = vshrl.u32 %v5209_v26, 16  ;;  %v922_v40 = vsub.f32 1.0, %v902_v15 }
 0x18b   : > { %v1024_v37 = vmul.f32 %v1004_v19, %v6763_v0  ;;  %v879_v34 = vmul.f32 1.442695, %v846_v29  ;;  %v787_v41 = vadd.f32 0.2548296, %v767_v24  ;;  %v745_v22 = vadd.f32 -0.28449672, %v725_v60 }
 0x18c   : > { %v668_v50 = vadd.f32 -1.4531521, %v648_v31  ;;  %5891 = vpow2.f32 %v883_v5  ;;  %v6884_v57 = vrot.slane %v1197_v36, 7  ;;  %v1200_v20 = vshll.u32 %v5209_v26, 16  ;;  %v1372_v5 = vld [vmem:[#allocation2 + $0x44] sm:$0x1] }
 0x18d   : > { %v5212_v9 = vpack.c.bf16 %v1024_v37, %v1024_v37  ;;  %v962_v32 = vsub.f32 0.0, %v922_v40  ;;  %vm947_vm6 = vcmp.ge.f32.partialorder %v6769_v25, 0.0  ;;  %v807_v4 = vmul.f32 %v6841_v38, %v787_v41  ;;  %v6890_v44 = vpop.eup %5887 }
 0x18e   : > { %v765_v10 = vmul.f32 %v6858_v53, %v745_v22  ;;  %v688_v0 = vmul.f32 %v6878_v46, %v668_v50  ;;  %v851_v52 = vmul.f32 %v831_v17, %v571_v54  ;;  %v1202_v45 = vor.u32 %v1200_v20, %v6884_v57 }
 0x18f   : > { %v1222_v58 = vshrl.u32 %v5212_v9, 16  ;;  %v1225_v12 = vshll.u32 %v5212_v9, 16  ;;  %5893 = vpow2.f32 %v879_v34  ;;  %v982_v59 = vsel %vm942_vm5, %v922_v40, %v962_v32 }
 0x190   : > { %v907_v30 = vmul.f32 %v5882_v7, %v807_v4  ;;  %v785_v3 = vadd.f32 0.2548296, %v765_v10  ;;  %v708_v29 = vadd.f32 1.4214138, %v688_v0  ;;  %v1362_v38 = vsel %vm6583_vm12, %v1202_v45, %v1361_v35 }
 0x191   : > { %v1224_v23 = vrot.slane %v1222_v58, 7  ;;  %v1002_v21 = vadd.f32 1.0, %v982_v59  ;;  %vm945_vm7 = vcmp.ge.f32.partialorder %v6777_v39, 0.0  ;;  %v646_v54 = vmul.f32 1.0614054, %v6890_v44 }
 0x192   : > { %1363 = vst [vmem:[#allocation2 + $0x30] sm:$0xf] %v1362_v38  ;;  %v927_v14 = vsub.f32 1.0, %v907_v30  ;;  %v805_v26 = vmul.f32 %v6858_v53, %v785_v3  ;;  %v728_v63 = vmul.f32 %v6878_v46, %v708_v29  ;;  %v889_v19 = vmul.f32 1.442695, %v851_v52 }
 0x193   : > { %v1227_v7 = vor.u32 %v1225_v12, %v1224_v23  ;;  %v1229_v15 = vrot.slane %v1224_v23, 4  ;;  %v1022_v24 = vmul.f32 %v1002_v21, %v6786_v1  ;;  %v666_v60 = vadd.f32 -1.4531521, %v646_v54  ;;  %v1365_v30 = vld [vmem:[#allocation2 + $0x38] sm:$0x1] }
 0x194   : > { %v6902_v31 = vpop.eup %5889  ;;  %v1203_v17 = vrot.slane %v6884_v57, 4  ;;  %v967_v36 = vsub.f32 0.0, %v927_v14  ;;  %v905_v37 = vmul.f32 %v5886_v11, %v805_v26  ;;  %v748_v40 = vadd.f32 -0.28449672, %v728_v63 }
 0x195   : > { %v1228_v53 = vsel %vm6617_vm15, %v1220_v33, %v1227_v7  ;;  %v1373_v34 = vsel %vm6604_vm13, %v1229_v15, %v1372_v5  ;;  %v5210_v41 = vpack.c.bf16 %v1022_v24, %v1022_v24  ;;  %v686_v22 = vmul.f32 %v6890_v44, %v666_v60 }
 0x196   : > { %v5892_v1 = vpop.eup %5891  ;;  %1371 = vst [vmem:[#allocation2 + $0x40] sm:$0xf] %v1228_v53  ;;  %1374 = vst [vmem:[#allocation2 + $0x44] sm:$0x1] %v1373_v34  ;;  %v987_v50 = vsel %vm947_vm6, %v927_v14, %v967_v36  ;;  %v925_v57 = vsub.f32 1.0, %v905_v37  ;;  %v768_v11 = vmul.f32 %v6878_v46, %v748_v40  ;;  %5895 = vpow2.f32 %v889_v19 }
 0x197   : > { %v651_v49 = vmul.f32 1.0614054, %v6902_v31  ;;  %v1205_v20 = vshrl.u32 %v5210_v41, 16  ;;  %v1007_v33 = vadd.f32 1.0, %v987_v50  ;;  %v706_v9 = vadd.f32 1.4214138, %v686_v22 }
 0x198   : > { %v965_v32 = vsub.f32 0.0, %v925_v57  ;;  %v788_v35 = vadd.f32 0.2548296, %v768_v11  ;;  %v485_v10 = vmul.f32 %v6816_v18, %v6435_v61  ;;  %v1208_v45 = vshll.u32 %v5210_v41, 16 }
 0x199   : > { %v671_v4 = vadd.f32 -1.4531521, %v651_v49  ;;  %v5894_v0 = vpop.eup %5893  ;;  %v1415_v52 = vld [vmem:[#allocation2 + $0x30] sm:$0x1]  ;;  %v1207_v25 = vrot.slane %v1205_v20, 7  ;;  %v1027_v58 = vmul.f32 %v1007_v33, %v6807_v28  ;;  %vm948_vm8 = vcmp.ge.f32.partialorder %v6811_v27, 0.0 }
 0x19a   : > { %v726_v12 = vmul.f32 %v6890_v44, %v706_v9  ;;  %v1416_v59 = vsel %vm6604_vm13, 0, %v1415_v52  ;;  %v985_v3 = vsel %vm945_vm7, %v925_v57, %v965_v32  ;;  %v808_v61 = vmul.f32 %v6878_v46, %v788_v35 }
 0x19b   : > { %v691_v29 = vmul.f32 %v6902_v31, %v671_v4  ;;  %1417 = vst [vmem:[#allocation2 + $0x30] sm:$0x1] %v1416_v59  ;;  %v1210_v38 = vor.u32 %v1208_v45, %v1207_v25  ;;  %v1212_v28 = vrot.slane %v1207_v25, 4  ;;  %v5215_v23 = vpack.c.bf16 %v1027_v58, %v1027_v58  ;;  %v1375_v45 = vld [vmem:[#allocation2 + $0x48] sm:$0xf] }
 0x19c   : > { %v1005_v21 = vadd.f32 1.0, %v985_v3  ;;  %v908_v54 = vmul.f32 %v5892_v1, %v808_v61  ;;  %v746_v5 = vadd.f32 -0.28449672, %v726_v12  ;;  %v509_v26 = vadd.f32 %v6796_v55, %v485_v10 }
 0x19d   : > { %v711_v14 = vadd.f32 1.4214138, %v691_v29  ;;  %v1449_v63 = vld [vmem:[#allocation2 + $0x44] sm:$0x1]  ;;  %v1211_v39 = vsel %vm6617_vm15, %v1203_v17, %v1210_v38  ;;  %v1366_v19 = vsel %vm6604_vm13, %v1212_v28, %v1365_v30  ;;  %v1248_v46 = vshrl.u32 %v5215_v23, 16 }
 0x19e   : > { %v488_v7 = vmul.f32 %v6816_v18, %v6438_v2  ;;  %v1450_v15 = vsel %vm6677_vm0, 0, %v1449_v63  ;;  %1364 = vst [vmem:[#allocation2 + $0x34] sm:$0xf] %v1211_v39  ;;  %1367 = vst [vmem:[#allocation2 + $0x38] sm:$0x1] %v1366_v19  ;;  %v1025_v24 = vmul.f32 %v1005_v21, %v6830_v8  ;;  %v928_v60 = vsub.f32 1.0, %v908_v54 }
 0x19f   : > { %v766_v17 = vmul.f32 %v6890_v44, %v746_v5  ;;  %1451 = vst [vmem:[#allocation2 + $0x44] sm:$0x1] %v1450_v15  ;;  %v6943_v36 = vrot.slane %v1248_v46, 7  ;;  %v1251_v37 = vshll.u32 %v5215_v23, 16  ;;  %v731_v40 = vmul.f32 %v6902_v31, %v711_v14  ;;  %v1382_v2 = vld [vmem:[#allocation2 + $0x54] sm:$0xf] }
 0x1a0   : > { %v6946_v53 = vmul.f32 0.70710677, %v509_v26  ;;  %v5213_v34 = vpack.c.bf16 %v1025_v24, %v1025_v24  ;;  %v968_v41 = vsub.f32 0.0, %v928_v60  ;;  %v6949_v1 = vmul.f32 0.5, %v6850_v43  ;;  %v5896_v8 = vpop.eup %5895  ;;  %v5773_v39 = vld [vmem:[%s8784_s2 + $0x118] sm:$0xff]  }
 0x1a1   : > { %v786_v22 = vadd.f32 0.2548296, %v766_v17  ;;  %v1253_v50 = vor.u32 %v1251_v37, %v6943_v36  ;;  %vm946_vm9 = vcmp.ge.f32.partialorder %v6839_v13, 0.0  ;;  %v751_v57 = vadd.f32 -0.28449672, %v731_v40 }
 0x1a2   : > { %v1039_v11 = vstv %s6935_s26  ;;  %v569_v49 = vand.u32 2147483647, %v6946_v53  ;;  %v1231_v20 = vshrl.u32 %v5213_v34, 16  ;;  %v988_v33 = vsel %vm948_vm8, %v928_v60, %v968_v41  ;;  %v1386_v40 = vld [vmem:[#allocation2 + $0x5c] sm:$0x1] }
 0x1a3   : > { %v806_v9 = vmul.f32 %v6890_v44, %v786_v22  ;;  %v512_v32 = vadd.f32 %v6796_v55, %v488_v7  ;;  %v1383_v43 = vsel %vm6583_vm12, %v1253_v50, %v1382_v2  ;;  %v1008_v35 = vadd.f32 1.0, %v988_v33 }
 0x1a4   : > { %v771_v4 = vmul.f32 %v6902_v31, %v751_v57  ;;  %v589_v10 = vmul.f32 0.3275911, %v569_v49  ;;  %1384 = vst [vmem:[#allocation2 + $0x54] sm:$0xf] %v1383_v43  ;;  %v6962_v52 = vrot.slane %v1231_v20, 7  ;;  %v1234_v25 = vshll.u32 %v5213_v34, 16 }
 0x1a5   : > { %v906_v58 = vmul.f32 %v5894_v0, %v806_v9  ;;  %v829_v12 = vsub.f32 0.0, %v569_v49  ;;  %v1446_v27 = vld [vmem:[#allocation2 + $0x38] sm:$0x1]  ;;  %v1028_v59 = vmul.f32 %v1008_v35, %v6845_v42  ;;  %vm951_vm10 = vcmp.ge.f32.partialorder %v6863_v62, 0.0 }
 0x1a6   : > { %v791_v44 = vadd.f32 0.2548296, %v771_v4  ;;  %v609_v30 = vadd.f32 1.0, %v589_v10  ;;  %v1447_v3 = vsel %vm6677_vm0, 0, %v1446_v27  ;;  %v1236_v61 = vor.u32 %v1234_v25, %v6962_v52  ;;  %v1379_v27 = vld [vmem:[#allocation2 + $0x50] sm:$0x1] }
 0x1a7   : > { %v926_v29 = vsub.f32 1.0, %v906_v58  ;;  %v6969_v38 = vmul.f32 0.5, %v509_v26  ;;  %1448 = vst [vmem:[#allocation2 + $0x38] sm:$0x1] %v1447_v3  ;;  %v5216_v28 = vpack.c.bf16 %v1028_v59, %v1028_v59  ;;  %v849_v23 = vmul.f32 %v829_v12, %v569_v49 }
 0x1a8   : > { %v811_v0 = vmul.f32 %v6902_v31, %v791_v44  ;;  %5897 = vrcp.f32 %v609_v30  ;;  %v1376_v42 = vsel %vm6583_vm12, %v1236_v61, %v1375_v45  ;;  %v6974_v54 = vmul.f32 0.70710677, %v512_v32 }
 0x1a9   : > { %v966_v21 = vsub.f32 0.0, %v926_v29  ;;  %v486_v5 = vmul.f32 %v6816_v18, %v6446_v51  ;;  %v1254_v14 = vrot.slane %v6943_v36, 4  ;;  %1377 = vst [vmem:[#allocation2 + $0x48] sm:$0xf] %v1376_v42  ;;  %v1256_v26 = vshrl.u32 %v5216_v28, 16 }
 0x1aa   : > { %v911_v63 = vmul.f32 %v5896_v8, %v811_v0  ;;  %vm6979_vm11 = vcmp.eq.s32.totalorder %v1039_v11, 1  ;;  %v885_v31 = vmul.f32 1.442695, %v849_v23  ;;  %v6985_v46 = vmul.f32 0.5, %v512_v32  ;;  %v6989_v51 = vld [vmem:[#allocation2 + $0xc] sm:$0xf] }
 0x1ab   : > { %v986_v19 = vsel %vm946_vm9, %v926_v29, %v966_v21  ;;  %v572_v7 = vand.u32 2147483647, %v6974_v54  ;;  %v510_v15 = vadd.f32 %v6796_v55, %v486_v5  ;;  %v1424_v18 = vld [vmem:[#allocation2 + $0x54] sm:$0x1]  ;;  %v1258_v24 = vrot.slane %v1256_v26, 7 }
 0x1ac   : > { %v1259_v60 = vshll.u32 %v5216_v28, 16  ;;  %v1006_v17 = vadd.f32 1.0, %v986_v19  ;;  %v931_v36 = vsub.f32 1.0, %v911_v63  ;;  %v1425_v37 = vsel %vm6604_vm13, 0, %v1424_v18  ;;  %v7003_v32 = vld [vmem:[#allocation2 + $0x10] sm:$0xf] }
 0x1ad   : > { %5899 = vpow2.f32 %v885_v31  ;;  %v592_v13 = vmul.f32 0.3275911, %v572_v7  ;;  %v832_v2 = vsub.f32 0.0, %v572_v7  ;;  %1426 = vst [vmem:[#allocation2 + $0x54] sm:$0x1] %v1425_v37  ;;  %v1263_v41 = vrot.slane %v1258_v24, 4 }
 0x1ae   : > { %v1261_v34 = vor.u32 %v1259_v60, %v1258_v24  ;;  %v1026_v22 = vmul.f32 %v1006_v17, %v6871_v47  ;;  %v971_v55 = vsub.f32 0.0, %v931_v36  ;;  %v6994_v57 = vmul.f32 0.70710677, %v510_v15 }
 0x1af   : > { %v612_v8 = vadd.f32 1.0, %v592_v13  ;;  %v852_v50 = vmul.f32 %v832_v2, %v572_v7  ;;  %v1800_v11 = vshrl.u32 %v6989_v51, 16  ;;  %v1387_v20 = vsel %vm6604_vm13, %v1263_v41, %v1386_v40  ;;  %v1683_v13 = vld [vmem:[#allocation2] sm:$0xe] }
 0x1b0   : > { %v1262_v49 = vsel %vm6617_vm15, %v1254_v14, %v1261_v34  ;;  %v5214_v33 = vpack.c.bf16 %v1026_v22, %v1026_v22  ;;  %v991_v9 = vsel %vm951_vm10, %v931_v36, %v971_v55  ;;  %v1237_v47 = vrot.slane %v6962_v52, 4  ;;  %v1421_v43 = vld [vmem:[#allocation2 + $0x48] sm:$0x1]  ;;  %1388 = vst [vmem:[#allocation2 + $0x5c] sm:$0x1] %v1387_v20 }
 0x1b1   : > { %1385 = vst [vmem:[#allocation2 + $0x58] sm:$0xf] %v1262_v49  ;;  %v1011_v35 = vadd.f32 1.0, %v991_v9  ;;  %5901 = vrcp.f32 %v612_v8  ;;  %v7006_v4 = vmul.f32 0.5, %v510_v15  ;;  %v1422_v25 = vsel %vm6604_vm13, 0, %v1421_v43 }
 0x1b2   : > { %v7008_v10 = vpop.eup %5897  ;;  %v1239_v45 = vshrl.u32 %v5214_v33, 16  ;;  %v891_v58 = vmul.f32 1.442695, %v852_v50  ;;  %v570_v62 = vand.u32 2147483647, %v6994_v57  ;;  %v1242_v12 = vshll.u32 %v5214_v33, 16 }
 0x1b3   : > { %1423 = vst [vmem:[#allocation2 + $0x48] sm:$0x1] %v1422_v25  ;;  %v1031_v52 = vmul.f32 %v1011_v35, %v6949_v1  ;;  %v649_v59 = vmul.f32 1.0614054, %v7008_v10  ;;  %v1802_v44 = vrot.slane %v1800_v11, 4  ;;  %v1803_v29 = vshll.u32 %v6989_v51, 16 }
 0x1b4   : > { %v1241_v30 = vrot.slane %v1239_v45, 7  ;;  %v590_v3 = vmul.f32 0.3275911, %v570_v62  ;;  %v830_v61 = vsub.f32 0.0, %v570_v62  ;;  %v1809_v23 = vshll.u32 %v7003_v32, 16 }
 0x1b5   : > { %v1063_v28 = vsel %vm6979_vm11, %v1031_v52, 0.0  ;;  %v669_v0 = vadd.f32 -1.4531521, %v649_v59  ;;  %v1813_v42 = vshrl.u32 %v7003_v32, 16  ;;  %5903 = vpow2.f32 %v891_v58  ;;  %v1396_v36 = vld [vmem:[#allocation2 + $0x6c] sm:$0xf] }
 0x1b6   : > { %v1244_v21 = vor.u32 %v1242_v12, %v1241_v30  ;;  %v1246_v5 = vrot.slane %v1241_v30, 4  ;;  %v5219_v14 = vpack.c.bf16 %v1063_v28, %v1063_v28  ;;  %v610_v1 = vadd.f32 1.0, %v590_v3  ;;  %v7035_v55 = vld [vmem:[#allocation2 + $0x4] sm:$0xf]  ;;  %v7037_v8 = vld [vmem:[#allocation2 + $0x8] sm:$0x1] }
 0x1b7   : > { %v7020_v26 = vpop.eup %5899  ;;  %v689_v63 = vmul.f32 %v7008_v10, %v669_v0  ;;  %v850_v31 = vmul.f32 %v830_v61, %v570_v62  ;;  %v1805_v19 = vrot.slane %v1803_v29, 5  ;;  %v1455_v7 = vld [vmem:[#allocation2 + $0x5c] sm:$0x1]  ;;  %v7029_v40 = vrot.slane %v1809_v23, 5  ;;  %v1777_v20 = vld [vmem:[#allocation2 + $0x18] sm:$0xf] }
 0x1b8   : > { %v1245_v15 = vsel %vm6617_vm15, %v1237_v47, %v1244_v21  ;;  %v1380_v18 = vsel %vm6604_vm13, %v1246_v5, %v1379_v27  ;;  %v1282_v24 = vshrl.u32 %v5219_v14, 16  ;;  %v1285_v60 = vshll.u32 %v5219_v14, 16  ;;  %v7051_v45 = vld [vmem:[#allocation2 + $0x1c] sm:$0xf]  ;;  %v7066_v61 = vld [vmem:[#allocation2] sm:$0xf] }
 0x1b9   : > { %v1456_v17 = vsel %vm6677_vm0, 0, %v1455_v7  ;;  %1378 = vst [vmem:[#allocation2 + $0x4c] sm:$0xf] %v1245_v15  ;;  %1381 = vst [vmem:[#allocation2 + $0x50] sm:$0x1] %v1380_v18  ;;  %5905 = vrcp.f32 %v610_v1  ;;  %v1806_v34 = vor.u32 %v1805_v19, %v1802_v44  ;;  %v1815_v41 = vrot.slane %v1813_v42, 4 }
 0x1ba   : > { %v709_v37 = vadd.f32 1.4214138, %v689_v63  ;;  %1457 = vst [vmem:[#allocation2 + $0x5c] sm:$0x1] %v1456_v17  ;;  %v7031_v2 = vrot.slane %v1282_v24, 7  ;;  %v5060_v22 = vcombine.low %v6989_v51, %v7003_v32  ;;  %vm1715_vm14 = vcmask 1042432  }
 0x1bb   : > { %v7039_v50 = vpop.eup %5901  ;;  %v7042_v49 = vmul.f32 1.442695, %v850_v31  ;;  %vm1716_vm1 = vcmask 1046532   ;;  %v7047_v51 = vrot.slane %v1806_v34, 4  ;;  %v1816_v43 = vor.u32 %v1815_v41, %v7029_v40  ;;  %v5776_v31 = vld [vmem:[%s8784_s2 + $0x180] sm:$0xff]   ;;  %v5778_v18 = vld [vmem:[%s8784_s2 + $0x1c8] sm:$0xff]  }
 0x1bc   : > { %v729_v11 = vmul.f32 %v7008_v10, %v709_v37  ;;  %v1287_v33 = vor.u32 %v1285_v60, %v7031_v2  ;;  %v1288_v9 = vrot.slane %v7031_v2, 4  ;;  %v652_v47 = vmul.f32 1.0614054, %v7039_v50  ;;  %3401 = vmatprep.mubr.bf16.mxu0 %v5060_v22  ;;  %vm7056_vm2 = vmor %vm1715_vm14, %vm1716_vm1  ;;  %v7097_v22 = vld [vmem:[#allocation2 + $0xc] sm:$0xf] }
 0x1bd   : > { %v5012_v35 = vrot.slane %v1683_v13, 9  ;;  %v1720_v25 = vrot.slane %v7035_v55, 5  ;;  %v1723_v27 = vrot.slane %v7037_v8, 5  ;;  %v1824_v52 = vshrl.u32 %v1777_v20, 16 }
 0x1be   : > { %v749_v32 = vadd.f32 -0.28449672, %v729_v11  ;;  %v1397_v58 = vsel %vm6583_vm12, %v1287_v33, %v1396_v36  ;;  %v672_v62 = vadd.f32 -1.4531521, %v652_v47  ;;  %v7062_v44 = vrot.slane %v1816_v43, 4  ;;  %v5781_v47 = vld [vmem:[%s8784_s2 + $0x188] sm:$0xff]  }
 0x1bf   : > { %1398 = vst [vmem:[#allocation2 + $0x6c] sm:$0xf] %v1397_v58  ;;  %v1721_v30 = vsel %vm7056_vm2, %v5012_v35, %v1720_v25  ;;  %v1722_v3 = vrot.slane %v1720_v25, 4  ;;  %vm949_vm3 = vcmp.ge.f32.partialorder %v6946_v53, 0.0  ;;  %v7070_v0 = vrot.slane %v1824_v52, 4  ;;  %v7073_v21 = vpop.eup %5903  ;;  %v5789_v53 = vld [vmem:[%s8784_s2 + $0x198] sm:$0xff]  }
 0x1c0   : > { %v769_v59 = vmul.f32 %v7008_v10, %v749_v32  ;;  %v1452_v29 = vld [vmem:[#allocation2 + $0x50] sm:$0x1]  ;;  %v692_v28 = vmul.f32 %v7039_v50, %v672_v62  ;;  %v1827_v23 = vshll.u32 %v1777_v20, 16  ;;  %v1837_v42 = vshrl.u32 %v7051_v45, 16 }
 0x1c1   : > { %v1453_v5 = vsel %vm6677_vm0, 0, %v1452_v29  ;;  %v1724_v1 = vsel %vm7056_vm2, %v1722_v3, %v1723_v27  ;;  %v5061_v63 = vcombine.low %v1777_v20, %v7051_v45  ;;  %vm1488_vm4 = vsmask.f32 3328  ;;  %v5782_v32 = vld [vmem:[%s8784_s2 + $0x1d0] sm:$0xff]   ;;  %v7534_v45 = vld [vmem:[#allocation2 + $0x40] sm:$0xf] }
 0x1c2   : > { %v789_v14 = vadd.f32 0.2548296, %v769_v59  ;;  %1454 = vst [vmem:[#allocation2 + $0x50] sm:$0x1] %v1453_v5  ;;  %v712_v19 = vadd.f32 1.4214138, %v692_v28  ;;  %v5052_v7 = vcombine.low %v1721_v30, %v1724_v1  ;;  %5907 = vpow2.f32 %v7042_v49 }
 0x1c3   : > { %v7083_v15 = vrot.slane %v1827_v23, 5  ;;  %v7088_v24 = vpop.eup %5905  ;;  %vm1489_vm5 = vsmask.f32 7440  ;;  %v1492_v17 = vshrl.u32 %v7066_v61, 16  ;;  %v1495_v36 = vshll.u32 %v7066_v61, 16 }
 0x1c4   : > { %v809_v60 = vmul.f32 %v7008_v10, %v789_v14  ;;  %v732_v37 = vmul.f32 %v7039_v50, %v712_v19  ;;  %v650_v13 = vmul.f32 1.0614054, %v7088_v24  ;;  %3402 = vmatmul.mubr.bf16.vlgmr.msra.gmra.mrb[20].mxu0 %v5052_v7  ;;  %v1501_v34 = vshll.u32 %v7035_v55, 16  ;;  %v7110_v27 = vld [vmem:[#allocation2 + $0x10] sm:$0xf]  ;;  %vm7124_vm7 = vmor %vm1488_vm4, %vm1489_vm5 }
 0x1c5   : > { %v1505_v41 = vshrl.u32 %v7035_v55, 16  ;;  %3409 = vmatprep.mubr.bf16.mxu0 %v5061_v63  ;;  %v1494_v10 = vrot.slane %v1492_v17, 4  ;;  %v1497_v20 = vrot.slane %v1495_v36, 5  ;;  %v1511_v33 = vshll.u32 %v7037_v8, 16  ;;  %5433 = vmatpush3.bf16.msra.mxu0 %v5776_v31  ;;  %v7114_v29 = vld [vmem:[#allocation2 + $0x14] sm:$0x1] }
 0x1c6   : > { %v909_v11 = vmul.f32 %v7020_v26, %v809_v60  ;;  %v1430_v43 = vld [vmem:[#allocation2 + $0x6c] sm:$0x1]  ;;  %v752_v35 = vadd.f32 -0.28449672, %v732_v37  ;;  %v670_v25 = vadd.f32 -1.4531521, %v650_v13  ;;  %5434 = vmatprep.subr.bf16.mxu0 %v5778_v18 }
 0x1c7   : > { %v1431_v26 = vsel %vm6604_vm13, 0, %v1430_v43  ;;  %v1498_v8 = vor.u32 %v1497_v20, %v1494_v10  ;;  %v1503_v62 = vrot.slane %v1501_v34, 5  ;;  %v1507_v30 = vrot.slane %v1505_v41, 4  ;;  %v5784_v14 = vld [vmem:[%s8784_s2 + $0x190] sm:$0xff]   ;;  %v5786_v18 = vld [vmem:[%s8784_s2 + $0x1d8] sm:$0xff]  }
 0x1c8   : > { %v929_v58 = vsub.f32 1.0, %v909_v11  ;;  %1432 = vst [vmem:[#allocation2 + $0x6c] sm:$0x1] %v1431_v26  ;;  %v772_v52 = vmul.f32 %v7039_v50, %v752_v35  ;;  %v690_v59 = vmul.f32 %v7088_v24, %v670_v25  ;;  %v1513_v3 = vrot.slane %v1511_v33, 5  ;;  %v1684_v25 = vld [vmem:[#allocation2 + $0xc] sm:$0xe] }
 0x1c9   : > { %vm952_vm6 = vcmp.ge.f32.partialorder %v6974_v54, 0.0  ;;  %v1499_v49 = vrot.slane %v1498_v8, 4  ;;  %v1516_v23 = vshrl.u32 %v7097_v22, 16  ;;  %v1519_v5 = vshll.u32 %v7097_v22, 16  ;;  %5435 = vmatpush3.bf16.msra.mxu0 %v5781_v47  ;;  %v5790_v26 = vld [vmem:[%s8784_s2 + $0x1e0] sm:$0xff]  }
 0x1ca   : > { %v969_v28 = vsub.f32 0.0, %v929_v58  ;;  %v792_v1 = vadd.f32 0.2548296, %v772_v52  ;;  %v710_v63 = vadd.f32 1.4214138, %v690_v59  ;;  %v1508_v19 = vor.u32 %v1507_v30, %v1503_v62  ;;  %5436 = vmatprep.subr.bf16.mxu0 %v5782_v32 }
 0x1cb   : > { %v1525_v7 = vshll.u32 %v7110_v27, 16  ;;  %v1504_v17 = vsel %vm7124_vm7, %v1499_v49, %v1503_v62  ;;  %v1518_v36 = vrot.slane %v1516_v23, 4  ;;  %v1521_v37 = vrot.slane %v1519_v5, 5  ;;  %v7156_v49 = vld [vmem:[#allocation2 + $0x24] sm:$0xf]  ;;  %v5763_v23 = vld [vmem:[%s8784_s2 + $0x148] sm:$0xff]  }
 0x1cc   : > { %v989_v60 = vsel %vm949_vm3, %v929_v58, %v969_v28  ;;  %v812_v34 = vmul.f32 %v7039_v50, %v792_v1  ;;  %v730_v41 = vmul.f32 %v7088_v24, %v710_v63  ;;  %v1509_v11 = vrot.slane %v1508_v19, 4  ;;  %v5908_v52 = vpop.eup %5907  ;;  %v5792_v1 = vld [vmem:[%s8784_s2 + $0x1a0] sm:$0xff]  }
 0x1cd   : > { %v1009_v13 = vadd.f32 1.0, %v989_v60  ;;  %v1522_v10 = vor.u32 %v1521_v37, %v1518_v36  ;;  %v1527_v20 = vrot.slane %v1525_v7, 5  ;;  %v1529_v33 = vshrl.u32 %v7110_v27, 16  ;;  %5437 = vmatpush3.bf16.msra.mxu0 %v5784_v14  ;;  %v5794_v60 = vld [vmem:[%s8784_s2 + $0x1e8] sm:$0xff]  }
 0x1ce   : > { %v1535_v47 = vshll.u32 %v7114_v29, 16  ;;  %v912_v43 = vmul.f32 %v7073_v21, %v812_v34  ;;  %v750_v35 = vadd.f32 -0.28449672, %v730_v41  ;;  %v1514_v50 = vsel %vm7124_vm7, %v1509_v11, %v1513_v3  ;;  %5438 = vmatprep.subr.bf16.mxu0 %v5786_v18  ;;  %v7172_v37 = vld [vmem:[#allocation2 + $0x28] sm:$0xf] }
 0x1cf   : > { %v1029_v32 = vmul.f32 %v1009_v13, %v6969_v38  ;;  %v5044_v58 = vcombine.low %v1504_v17, %v1514_v50  ;;  %v5036_v8 = vcombine.low %v7066_v61, %v7035_v55  ;;  %v5761_v38 = vld [vmem:[%s8784_s2 + $0x100] sm:$0xff]   ;;  %v1523_v62 = vrot.slane %v1522_v10, 4  ;;  %v5765_v34 = vld [vmem:[%s8784_s2 + $0x108] sm:$0xff]  }
 0x1d0   : > { %v1531_v21 = vrot.slane %v1529_v33, 4  ;;  %v932_v30 = vsub.f32 1.0, %v912_v43  ;;  %v770_v3 = vmul.f32 %v7088_v24, %v750_v35  ;;  %v1537_v28 = vrot.slane %v1535_v47, 5  ;;  %v5767_v33 = vld [vmem:[%s8784_s2 + $0x150] sm:$0xff]   ;;  %v1389_v47 = vld [vmem:[#allocation2 + $0x60] sm:$0xf] }
 0x1d1   : > { %v5217_v59 = vpack.c.bf16 %v1029_v32, %v1029_v32  ;;  %vm950_vm8 = vcmp.ge.f32.partialorder %v6994_v57, 0.0  ;;  %3304 = vmatprep.mubr.bf16.mxu1 %v5044_v58  ;;  %v5013_v61 = vrot.slane %v1684_v25, 9  ;;  %v1727_v5 = vrot.slane %v7110_v27, 5  ;;  %5439 = vmatpush3.bf16.msra.mxu0 %v5789_v53  ;;  %v7198_v58 = vld [vmem:[#allocation2 + $0x1c] sm:$0xf] }
 0x1d2   : > { %v1532_v55 = vor.u32 %v1531_v21, %v1527_v20  ;;  %v1730_v14 = vrot.slane %v7114_v29, 5  ;;  %v972_v7 = vsub.f32 0.0, %v932_v30  ;;  %v790_v18 = vadd.f32 0.2548296, %v770_v3  ;;  %3305 = vmatmul.mubr.bf16.vlgmr.msra.gmra.mrb[0].mxu1 %v5036_v8  ;;  %5440 = vmatprep.subr.bf16.mxu0 %v5790_v26 }
 0x1d3   : > { %v1265_v63 = vshrl.u32 %v5217_v59, 16  ;;  %v1268_v19 = vshll.u32 %v5217_v59, 16  ;;  %5369 = vmatpush3.bf16.msra.mxu1 %v5761_v38  ;;  %v1528_v17 = vsel %vm7124_vm7, %v1523_v62, %v1527_v20  ;;  %v1729_v36 = vrot.slane %v1727_v5, 4  ;;  %v7204_v59 = vld [vmem:[#allocation2 + $0x20] sm:$0x1] }
 0x1d4   : > { %v1533_v29 = vrot.slane %v1532_v55, 4  ;;  %v1848_v13 = vshrl.u32 %v7156_v49, 16  ;;  %v992_v11 = vsel %vm952_vm6, %v932_v30, %v972_v7  ;;  %v810_v10 = vmul.f32 %v7088_v24, %v790_v18  ;;  %5370 = vmatprep.subr.bf16.mxu1 %v5763_v23  ;;  %v7194_v24 = vld [vmem:[#allocation2 + $0x18] sm:$0xf]  ;;  %v5797_v30 = vld [vmem:[%s8784_s2 + $0x1a8] sm:$0xff]   ;;  %v5798_v55 = vld [vmem:[%s8784_s2 + $0x1f0] sm:$0xff]  }
 0x1d5   : > { %v7178_v41 = vrot.slane %v1265_v63, 7  ;;  %v5062_v20 = vcombine.low %v7156_v49, %v7172_v37  ;;  %v1012_v53 = vadd.f32 1.0, %v992_v11  ;;  %v1728_v43 = vsel %vm7056_vm2, %v5013_v61, %v1727_v5  ;;  %5441 = vmatpush3.bf16.msra.mxu0 %v5792_v1  ;;  %v5771_v23 = vld [vmem:[%s8784_s2 + $0x158] sm:$0xff]   ;;  %v5799_v7 = vld [vmem:[%s8784_s2 + $0x1b0] sm:$0xff]  }
 0x1d6   : > { %v1538_v32 = vsel %vm7124_vm7, %v1533_v29, %v1537_v28  ;;  %v1731_v54 = vsel %vm7056_vm2, %v1729_v36, %v1730_v14  ;;  %v910_v50 = vmul.f32 %v5908_v52, %v810_v10  ;;  %v1851_v26 = vshll.u32 %v7156_v49, 16  ;;  %5442 = vmatprep.subr.bf16.mxu0 %v5794_v60  ;;  %v5769_v52 = vld [vmem:[%s8784_s2 + $0x110] sm:$0xff]   ;;  %v1685_v5 = vld [vmem:[#allocation2 + $0x18] sm:$0xe] }
 0x1d7   : > { %v1270_v35 = vor.u32 %v1268_v19, %v7178_v41  ;;  %v5045_v25 = vcombine.low %v1528_v17, %v1538_v32  ;;  %v1271_v8 = vrot.slane %v7178_v41, 4  ;;  %v1032_v38 = vmul.f32 %v1012_v53, %v6985_v46  ;;  %5371 = vmatpush3.bf16.msra.mxu1 %v5765_v34  ;;  %v7237_v36 = vld [vmem:[#allocation2 + $0x30] sm:$0xf] }
 0x1d8   : > { %v5053_v62 = vcombine.low %v1728_v43, %v1731_v54  ;;  %v7202_v21 = vrot.slane %v1848_v13, 4  ;;  %v930_v28 = vsub.f32 1.0, %v910_v50  ;;  %v5037_v46 = vcombine.low %v7097_v22, %v7110_v27  ;;  %5372 = vmatprep.subr.bf16.mxu1 %v5767_v33  ;;  %v5801_v33 = vld [vmem:[%s8784_s2 + $0x1f8] sm:$0xff]  }
 0x1d9   : > { %v1390_v3 = vsel %vm6583_vm12, %v1270_v35, %v1389_v47  ;;  %3312 = vmatprep.mubr.bf16.mxu1 %v5045_v25  ;;  %v1540_v49 = vshrl.u32 %v7194_v24, 16  ;;  %v1064_v16 = vsel %vm6979_vm11, %v1032_v38, 0.0  ;;  %v1543_v61 = vshll.u32 %v7194_v24, 16  ;;  %5443 = vmatpush3.bf16.msra.mxu0 %v5797_v30  ;;  %v1400_v35 = vld [vmem:[#allocation2 + $0x74] sm:$0x1]  ;;  %v5780_v30 = vld [vmem:[%s8784_s2 + $0x120] sm:$0xff]  }
 0x1da   : > { %1391 = vst [vmem:[#allocation2 + $0x60] sm:$0xf] %v1390_v3  ;;  %3410 = vmatmul.mubr.bf16.gmra.mrb[24].mxu0 %v5053_v62  ;;  %v1549_v22 = vshll.u32 %v7198_v58, 16  ;;  %v1553_v27 = vshrl.u32 %v7198_v58, 16  ;;  %v5220_v14 = vpack.c.bf16 %v1064_v16, %v1064_v16  ;;  %v970_v1 = vsub.f32 0.0, %v930_v28  ;;  %3313 = vmatmul.mubr.bf16.gmra.mrb[4].mxu1 %v5037_v46  ;;  %v5804_v3 = vld [vmem:[%s8784_s2 + $0x1b8] sm:$0xff]  }
 0x1db   : > { %3417 = vmatprep.mubr.bf16.mxu0 %v5062_v20  ;;  %v1542_v63 = vrot.slane %v1540_v49, 4  ;;  %v1559_v19 = vshll.u32 %v7204_v59, 16  ;;  %v7235_v18 = vrot.slane %v1851_v26, 5  ;;  %v1545_v60 = vrot.slane %v1543_v61, 5  ;;  %5373 = vmatpush3.bf16.msra.mxu1 %v5769_v52  ;;  %v5777_v20 = vld [vmem:[%s8784_s2 + $0x160] sm:$0xff]  }
 0x1dc   : > { %v1551_v17 = vrot.slane %v1549_v22, 5  ;;  %v1555_v29 = vrot.slane %v1553_v27, 4  ;;  %v1290_v13 = vshrl.u32 %v5220_v14, 16  ;;  %v1293_v34 = vshll.u32 %v5220_v14, 16  ;;  %5374 = vmatprep.subr.bf16.mxu1 %v5771_v23  ;;  %5444 = vmatprep.subr.bf16.mxu0 %v5798_v55  ;;  %v5785_v23 = vld [vmem:[%s8784_s2 + $0x168] sm:$0xff]  }
 0x1dd   : > { %v990_v11 = vsel %vm950_vm8, %v930_v28, %v970_v1  ;;  %v1561_v10 = vrot.slane %v1559_v19, 5  ;;  %v1546_v53 = vor.u32 %v1545_v60, %v1542_v63  ;;  %v1734_v43 = vrot.slane %v7198_v58, 5  ;;  %5445 = vmatpush3.bf16.msra.mxu0 %v5799_v7  ;;  %v7269_v27 = vld [vmem:[#allocation2 + $0x24] sm:$0xf]  ;;  %v7279_v19 = vld [vmem:[#allocation2 + $0x28] sm:$0xf] }
 0x1de   : > { %v1010_v47 = vadd.f32 1.0, %v990_v11  ;;  %v1556_v32 = vor.u32 %v1555_v29, %v1551_v17  ;;  %v1292_v54 = vrot.slane %v1290_v13, 7  ;;  %v5014_v57 = vrot.slane %v1685_v5, 9  ;;  %5446 = vmatprep.subr.bf16.mxu0 %v5801_v33  ;;  %v7282_v29 = vld [vmem:[#allocation2 + $0x34] sm:$0xf] }
 0x1df   : > { %v1737_v50 = vrot.slane %v7204_v59, 5  ;;  %v1872_v25 = vshrl.u32 %v7237_v36, 16  ;;  %v1547_v38 = vrot.slane %v1546_v53, 4  ;;  %v1875_v52 = vshll.u32 %v7237_v36, 16  ;;  %5375 = vmatpush3.bf16.msra.mxu1 %v5773_v39  ;;  %v1483_v39 = vld [vmem:[#allocation2 + $0x2c] sm:$0x1] }
 0x1e0   : > { %v1030_v26 = vmul.f32 %v1010_v47, %v7006_v4  ;;  %v1557_v62 = vrot.slane %v1556_v32, 4  ;;  %v1295_v59 = vor.u32 %v1293_v34, %v1292_v54  ;;  %v1297_v46 = vrot.slane %v1292_v54, 4  ;;  %5376 = vmatprep.subr.bf16.mxu1 %v5777_v20  ;;  %v5793_v20 = vld [vmem:[%s8784_s2 + $0x170] sm:$0xff]  }
 0x1e1   : > { %v1427_v28 = vld [vmem:[#allocation2 + $0x60] sm:$0x1]  ;;  %v1735_v4 = vsel %vm7056_vm2, %v5014_v57, %v1734_v43  ;;  %v1736_v49 = vrot.slane %v1734_v43, 4  ;;  %v1552_v61 = vsel %vm7124_vm7, %v1547_v38, %v1551_v17  ;;  %v1861_v17 = vshrl.u32 %v7172_v37, 16  ;;  %5447 = vmatpush3.bf16.msra.mxu0 %v5804_v3  ;;  %v1686_v43 = vld [vmem:[#allocation2 + $0x24] sm:$0xe] }
 0x1e2   : > { %v1428_v55 = vsel %vm6604_vm13, 0, %v1427_v28  ;;  %v5218_v16 = vpack.c.bf16 %v1030_v26, %v1030_v26  ;;  %v1562_v22 = vsel %vm7124_vm7, %v1557_v62, %v1561_v10  ;;  %v1296_v5 = vsel %vm6617_vm15, %v1288_v9, %v1295_v59  ;;  %v5788_v9 = vld [vmem:[%s8784_s2 + $0x128] sm:$0xff]   ;;  %v7303_v38 = vld [vmem:[#allocation2 + $0x3c] sm:$0xf]  ;;  %v5796_v62 = vld [vmem:[%s8784_s2 + $0x130] sm:$0xff]  }
 0x1e3   : > { %1429 = vst [vmem:[#allocation2 + $0x60] sm:$0x1] %v1428_v55  ;;  %v1401_v14 = vsel %vm6604_vm13, %v1297_v46, %v1400_v35  ;;  %v5046_v1 = vcombine.low %v1552_v61, %v1562_v22  ;;  %v1738_v63 = vsel %vm7056_vm2, %v1736_v49, %v1737_v50  ;;  %1399 = vst [vmem:[#allocation2 + $0x70] sm:$0xf] %v1296_v5  ;;  %5377 = vmatpush3.bf16.msra.mxu1 %v5780_v30  ;;  %v5800_v59 = vld [vmem:[%s8784_s2 + $0x178] sm:$0xff]  }
 0x1e4   : > { %1402 = vst [vmem:[#allocation2 + $0x74] sm:$0x1] %v1401_v14  ;;  %v1273_v7 = vshrl.u32 %v5218_v16, 16  ;;  %v1276_v60 = vshll.u32 %v5218_v16, 16  ;;  %v5054_v2 = vcombine.low %v1735_v4, %v1738_v63  ;;  %v7287_v13 = vrot.slane %v1872_v25, 4  ;;  %5378 = vmatprep.subr.bf16.mxu1 %v5785_v23 }
 0x1e5   : > { %3320 = vmatprep.mubr.bf16.mxu1 %v5046_v1  ;;  %v5063_v34 = vcombine.low %v7237_v36, %v7282_v29  ;;  %v5038_v11 = vcombine.low %v7194_v24, %v7198_v58  ;;  %v1564_v10 = vshrl.u32 %v7269_v27, 16  ;;  %v1567_v47 = vshll.u32 %v7269_v27, 16  ;;  %v1393_v36 = vld [vmem:[#allocation2 + $0x68] sm:$0x1]  ;;  %v7318_v55 = vld [vmem:[#allocation2 + $0x40] sm:$0xf] }
 0x1e6   : > { %v1275_v33 = vrot.slane %v1273_v7, 7  ;;  %3418 = vmatmul.mubr.bf16.gmra.mrb[28].mxu0 %v5054_v2  ;;  %v1573_v53 = vshll.u32 %v7279_v19, 16  ;;  %v1577_v32 = vshrl.u32 %v7279_v19, 16  ;;  %v7300_v54 = vrot.slane %v1875_v52, 5  ;;  %v7320_v16 = vld [vmem:[#allocation2 + $0x30] sm:$0xf] }
 0x1e7   : > { %3425 = vmatprep.mubr.bf16.mxu0 %v5063_v34  ;;  %3321 = vmatmul.mubr.bf16.gmra.mrb[8].mxu1 %v5038_v11  ;;  %v1566_v24 = vrot.slane %v1564_v10, 4  ;;  %v1583_v58 = vshll.u32 %v1483_v39, 16  ;;  %v1741_v35 = vrot.slane %v7279_v19, 5  ;;  %v1569_v25 = vrot.slane %v1567_v47, 5  ;;  %v5803_v7 = vld [vmem:[%s8784_s2 + $0x138] sm:$0xff]   ;;  %v7341_v11 = vld [vmem:[%s8784_s2 + $0x200] sm:$0xff]  }
 0x1e8   : > { %v1278_v57 = vor.u32 %v1276_v60, %v1275_v33  ;;  %v1280_v50 = vrot.slane %v1275_v33, 4  ;;  %v1575_v26 = vrot.slane %v1573_v53, 5  ;;  %5379 = vmatpush3.bf16.msra.mxu1 %v5788_v9  ;;  %v1885_v52 = vshrl.u32 %v7282_v29, 16  ;;  %v1687_v53 = vld [vmem:[#allocation2 + $0x30] sm:$0xe] }
 0x1e9   : > { %v1579_v30 = vrot.slane %v1577_v32, 4  ;;  %v5015_v3 = vrot.slane %v1686_v43, 9  ;;  %v1743_v28 = vrot.slane %v1741_v35, 4  ;;  %5380 = vmatprep.subr.bf16.mxu1 %v5793_v20  ;;  %v1570_v49 = vor.u32 %v1569_v25, %v1566_v24 }
 0x1ea   : > { %v1279_v46 = vsel %vm6617_vm15, %v1271_v8, %v1278_v57  ;;  %v1394_v4 = vsel %vm6604_vm13, %v1280_v50, %v1393_v36  ;;  %v1744_v23 = vrot.slane %v1483_v39, 5  ;;  %v1585_v5 = vrot.slane %v1583_v58, 5  ;;  %v7325_v8 = vld [vmem:[#allocation2 + $0x34] sm:$0xf]  ;;  %v1484_v39 = vld [vmem:[#allocation2 + $0x38] sm:$0x1] }
 0x1eb   : > { %v1461_v61 = vld [vmem:[#allocation2 + $0x74] sm:$0x1]  ;;  %1392 = vst [vmem:[#allocation2 + $0x64] sm:$0xf] %v1279_v46  ;;  %1395 = vst [vmem:[#allocation2 + $0x68] sm:$0x1] %v1394_v4  ;;  %v1580_v22 = vor.u32 %v1579_v30, %v1575_v26  ;;  %v1742_v41 = vsel %vm7056_vm2, %v5015_v3, %v1741_v35  ;;  %v5064_v34 = vcombine.low %v7303_v38, %v7318_v55 }
 0x1ec   : > { %v1896_v6 = vshrl.u32 %v7303_v38, 16  ;;  %v1462_v48 = vsel %vm6677_vm0, 0, %v1461_v61  ;;  %v1571_v14 = vrot.slane %v1570_v49, 4  ;;  %v1745_v1 = vsel %vm7056_vm2, %v1743_v28, %v1744_v23  ;;  %5381 = vmatpush3.bf16.msra.mxu1 %v5796_v62  ;;  %v1785_v58 = vld [vmem:[#allocation2 + $0x48] sm:$0xf] }
 0x1ed   : > { %v1899_v63 = vshll.u32 %v7303_v38, 16  ;;  %1463 = vst [vmem:[#allocation2 + $0x74] sm:$0x1] %v1462_v48  ;;  %v1581_v60 = vrot.slane %v1580_v22, 4  ;;  %v5055_v2 = vcombine.low %v1742_v41, %v1745_v1  ;;  %v1909_v9 = vshrl.u32 %v7318_v55, 16  ;;  %5382 = vmatprep.subr.bf16.mxu1 %v5800_v59 }
 0x1ee   : > { %v1576_v10 = vsel %vm7124_vm7, %v1571_v14, %v1575_v26  ;;  %v7345_v20 = vrot.slane %v1896_v6, 4  ;;  %v1588_v33 = vshrl.u32 %v7320_v16, 16  ;;  %v1591_v47 = vshll.u32 %v7320_v16, 16  ;;  %v7356_v3 = vld [vmem:[#allocation2 + $0x3c] sm:$0xf] }
 0x1ef   : > { %v1586_v32 = vsel %vm7124_vm7, %v1581_v60, %v1585_v5  ;;  %3426 = vmatmul.mubr.bf16.gmra.mrb[32].mxu0 %v5055_v2  ;;  %v1597_v43 = vshll.u32 %v7325_v8, 16  ;;  %v1601_v36 = vshrl.u32 %v7325_v8, 16  ;;  %v1607_v24 = vshll.u32 %v1484_v39, 16  ;;  %v7359_v23 = vld [vmem:[#allocation2 + $0x40] sm:$0xf] }
 0x1f0   : > { %v5047_v35 = vcombine.low %v1576_v10, %v1586_v32  ;;  %3433 = vmatprep.mubr.bf16.mxu0 %v5064_v34  ;;  %v5039_v57 = vcombine.low %v7269_v27, %v7279_v19  ;;  %v1590_v50 = vrot.slane %v1588_v33, 4  ;;  %v1593_v25 = vrot.slane %v1591_v47, 5  ;;  %5383 = vmatpush3.bf16.msra.mxu1 %v5803_v7  ;;  %v1485_v5 = vld [vmem:[#allocation2 + $0x44] sm:$0x1]  ;;  %v7367_v14 = vld [vmem:[#allocation2 + $0x4c] sm:$0xf] }
 0x1f1   : > { %v1599_v26 = vrot.slane %v1597_v43, 5  ;;  %v1603_v38 = vrot.slane %v1601_v36, 4  ;;  %v5016_v62 = vrot.slane %v1687_v53, 9  ;;  %v1748_v30 = vrot.slane %v7325_v8, 5  ;;  %5564 = vmatprep.subr.bf16.mxu1 %v7341_v11  ;;  %v1688_v33 = vld [vmem:[#allocation2 + $0x3c] sm:$0xe] }
 0x1f2   : > { %v1458_v28 = vld [vmem:[#allocation2 + $0x68] sm:$0x1]  ;;  %3328 = vmatprep.mubr.bf16.mxu1 %v5047_v35  ;;  %v1594_v59 = vor.u32 %v1593_v25, %v1590_v50  ;;  %v1751_v46 = vrot.slane %v1484_v39, 5  ;;  %v1920_v4 = vshrl.u32 %v1785_v58, 16  ;;  %v1923_v49 = vshll.u32 %v1785_v58, 16 }
 0x1f3   : > { %v1459_v27 = vsel %vm6677_vm0, 0, %v1458_v28  ;;  %3329 = vmatmul.mubr.bf16.gmra.mrb[12].mxu1 %v5039_v57  ;;  %v1604_v19 = vor.u32 %v1603_v38, %v1599_v26  ;;  %v1609_v61 = vrot.slane %v1607_v24, 5  ;;  %v1750_v22 = vrot.slane %v1748_v30, 4  ;;  %v1787_v36 = vld [vmem:[#allocation2 + $0x54] sm:$0xf] }
 0x1f4   : > { %1460 = vst [vmem:[#allocation2 + $0x68] sm:$0x1] %v1459_v27  ;;  %v7363_v41 = vrot.slane %v1899_v63, 5  ;;  %v1595_v6 = vrot.slane %v1594_v59, 4  ;;  %v1749_v48 = vsel %vm7056_vm2, %v5016_v62, %v1748_v30  ;;  %v7369_v1 = vrot.slane %v1920_v4, 4 }
 0x1f5   : > { %v1605_v39 = vrot.slane %v1604_v19, 4  ;;  %v1752_v56 = vsel %vm7056_vm2, %v1750_v22, %v1751_v46  ;;  %v7373_v7 = vrot.slane %v1923_v49, 5  ;;  %v5065_v60 = vcombine.low %v1785_v58, %v7367_v14  ;;  %v7388_v62 = vld [vmem:[#allocation2 + $0x58] sm:$0xf]  ;;  %v7390_v4 = vld [vmem:[#allocation2 + $0x48] sm:$0xf] }
 0x1f6   : > { %v1600_v63 = vsel %vm7124_vm7, %v1595_v6, %v1599_v26  ;;  %v5056_v2 = vcombine.low %v1749_v48, %v1752_v56  ;;  %v1612_v34 = vshrl.u32 %v7356_v3, 16  ;;  %v1615_v10 = vshll.u32 %v7356_v3, 16  ;;  %v7392_v22 = vld [vmem:[#allocation2 + $0x4c] sm:$0xf]  ;;  %v7466_v58 = vld [vmem:[#allocation2 + $0x28] sm:$0xf] }
 0x1f7   : > { %v1610_v47 = vsel %vm7124_vm7, %v1605_v39, %v1609_v61  ;;  %v1621_v53 = vshll.u32 %v7359_v23, 16  ;;  %v1625_v32 = vshrl.u32 %v7359_v23, 16  ;;  %v1631_v43 = vshll.u32 %v1485_v5, 16  ;;  %v1486_v39 = vld [vmem:[#allocation2 + $0x50] sm:$0x1] }
 0x1f8   : > { %v5048_v24 = vcombine.low %v1600_v63, %v1610_v47  ;;  %3434 = vmatmul.mubr.bf16.gmra.mrb[36].mxu0 %v5056_v2  ;;  %v1614_v35 = vrot.slane %v1612_v34, 4  ;;  %v1617_v57 = vrot.slane %v1615_v10, 5  ;;  %v5040_v50 = vcombine.low %v7320_v16, %v7325_v8  ;;  %v1689_v47 = vld [vmem:[#allocation2 + $0x48] sm:$0xe] }
 0x1f9   : > { %3441 = vmatprep.mubr.bf16.mxu0 %v5065_v60  ;;  %v1623_v25 = vrot.slane %v1621_v53, 5  ;;  %v1627_v26 = vrot.slane %v1625_v32, 4  ;;  %v1755_v38 = vrot.slane %v7359_v23, 5  ;;  %v5017_v28 = vrot.slane %v1688_v33, 9 }
 0x1fa   : > { %3336 = vmatprep.mubr.bf16.mxu1 %v5048_v24  ;;  %v1618_v30 = vor.u32 %v1617_v57, %v1614_v35  ;;  %v1758_v59 = vrot.slane %v1485_v5, 5  ;;  %v1944_v46 = vshrl.u32 %v1787_v36, 16  ;;  %v1633_v27 = vrot.slane %v1631_v43, 5  ;;  %v7410_v35 = vld [vmem:[#allocation2 + $0x60] sm:$0xf] }
 0x1fb   : > { %3337 = vmatmul.mubr.bf16.gmra.mrb[16].mxu1 %v5040_v50  ;;  %v1628_v49 = vor.u32 %v1627_v26, %v1623_v25  ;;  %v1757_v19 = vrot.slane %v1755_v38, 4  ;;  %v1947_v61 = vshll.u32 %v1787_v36, 16  ;;  %v1756_v8 = vsel %vm7056_vm2, %v5017_v28, %v1755_v38  ;;  %v7414_v26 = vld [vmem:[#allocation2 + $0x64] sm:$0xf] }
 0x1fc   : > { %v1619_v16 = vrot.slane %v1618_v30, 4  ;;  %v7396_v6 = vrot.slane %v1944_v46, 4  ;;  %v5066_v60 = vcombine.low %v1787_v36, %v7388_v62  ;;  %v1636_v63 = vshrl.u32 %v7390_v4, 16 }
 0x1fd   : > { %v1629_v5 = vrot.slane %v1628_v49, 4  ;;  %v1759_v56 = vsel %vm7056_vm2, %v1757_v19, %v1758_v59  ;;  %v1639_v10 = vshll.u32 %v7390_v4, 16  ;;  %v1645_v33 = vshll.u32 %v7392_v22, 16 }
 0x1fe   : > { %v1624_v2 = vsel %vm7124_vm7, %v1619_v16, %v1623_v25  ;;  %v5057_v34 = vcombine.low %v1756_v8, %v1759_v56  ;;  %v1638_v32 = vrot.slane %v1636_v63, 4  ;;  %v1649_v43 = vshrl.u32 %v7392_v22, 16  ;;  %v7447_v56 = vld [vmem:[#allocation2 + $0x20] sm:$0x1] }
 0x1ff   : > { %v1634_v53 = vsel %vm7124_vm7, %v1629_v5, %v1633_v27  ;;  %v1655_v24 = vshll.u32 %v1486_v39, 16  ;;  %v7412_v57 = vrot.slane %v1947_v61, 5  ;;  %v1641_v50 = vrot.slane %v1639_v10, 5  ;;  %v7420_v61 = vld [vmem:[#allocation2 + $0x54] sm:$0xf] }
 0x200   : > { %v5049_v36 = vcombine.low %v1624_v2, %v1634_v53  ;;  %3442 = vmatmul.mubr.bf16.gmra.mrb[40].mxu0 %v5057_v34  ;;  %v1647_v25 = vrot.slane %v1645_v33, 5  ;;  %v5041_v38 = vcombine.low %v7356_v3, %v7359_v23  ;;  %v1651_v30 = vrot.slane %v1649_v43, 4  ;;  %v7424_v3 = vld [vmem:[#allocation2 + $0x58] sm:$0xf]  ;;  %v1487_v2 = vld [vmem:[#allocation2 + $0x5c] sm:$0x1] }
 0x201   : > { %3449 = vmatprep.mubr.bf16.mxu0 %v5066_v60  ;;  %v1762_v28 = vrot.slane %v7392_v22, 5  ;;  %v1765_v59 = vrot.slane %v1486_v39, 5  ;;  %v1642_v46 = vor.u32 %v1641_v50, %v1638_v32  ;;  %v1657_v49 = vrot.slane %v1655_v24, 5  ;;  %v1690_v53 = vld [vmem:[#allocation2 + $0x54] sm:$0xe] }
 0x202   : > { %3344 = vmatprep.mubr.bf16.mxu1 %v5049_v36  ;;  %v5018_v27 = vrot.slane %v1689_v47, 9  ;;  %v1968_v19 = vshrl.u32 %v7410_v35, 16  ;;  %v1652_v16 = vor.u32 %v1651_v30, %v1647_v25  ;;  %v1971_v5 = vshll.u32 %v7410_v35, 16  ;;  %v7440_v50 = vld [vmem:[#allocation2 + $0x18] sm:$0xf] }
 0x203   : > { %3345 = vmatmul.mubr.bf16.gmra.mrb[20].mxu1 %v5041_v38  ;;  %v1764_v8 = vrot.slane %v1762_v28, 4  ;;  %v1643_v23 = vrot.slane %v1642_v46, 4  ;;  %v5067_v60 = vcombine.low %v7410_v35, %v7414_v26  ;;  %v5042_v63 = vcombine.low %v7390_v4, %v7392_v22 }
 0x204   : > { %v1763_v39 = vsel %vm7056_vm2, %v5018_v27, %v1762_v28  ;;  %v1653_v34 = vrot.slane %v1652_v16, 4  ;;  %v1660_v33 = vshrl.u32 %v7420_v61, 16  ;;  %v1663_v47 = vshll.u32 %v7420_v61, 16  ;;  %v7444_v28 = vld [vmem:[#allocation2 + $0x1c] sm:$0xf] }
 0x205   : > { %v1766_v10 = vsel %vm7056_vm2, %v1764_v8, %v1765_v59  ;;  %v1648_v32 = vsel %vm7124_vm7, %v1643_v23, %v1647_v25  ;;  %v1669_v24 = vshll.u32 %v7424_v3, 16  ;;  %v1673_v36 = vshrl.u32 %v7424_v3, 16 }
 0x206   : > { %v5058_v43 = vcombine.low %v1763_v39, %v1766_v10  ;;  %v1658_v4 = vsel %vm7124_vm7, %v1653_v34, %v1657_v49  ;;  %v1662_v22 = vrot.slane %v1660_v33, 4  ;;  %v1665_v38 = vrot.slane %v1663_v47, 5 }
 0x207   : > { %v1679_v30 = vshll.u32 %v1487_v2, 16  ;;  %v5050_v59 = vcombine.low %v1648_v32, %v1658_v4  ;;  %v1671_v46 = vrot.slane %v1669_v24, 5  ;;  %v1675_v27 = vrot.slane %v1673_v36, 4  ;;  %v1791_v4 = vld [vmem:[#allocation2 + $0x14] sm:$0x1] }
 0x208   : > { %3450 = vmatmul.mubr.bf16.gmra.mrb[44].mxu0 %v5058_v43  ;;  %v5019_v25 = vrot.slane %v1690_v53, 9  ;;  %v1666_v16 = vor.u32 %v1665_v38, %v1662_v22  ;;  %v1769_v23 = vrot.slane %v7424_v3, 5  ;;  %v1772_v39 = vrot.slane %v1487_v2, 5 }
 0x209   : > { %3457 = vmatprep.mubr.bf16.mxu0 %v5067_v60  ;;  %v1681_v8 = vrot.slane %v1679_v30, 5  ;;  %3352 = vmatprep.mubr.bf16.mxu1 %v5050_v59  ;;  %v1676_v10 = vor.u32 %v1675_v27, %v1671_v46  ;;  %v2105_v49 = vshrl.u32 %v7440_v50, 16  ;;  %v2108_v34 = vshll.u32 %v7440_v50, 16  ;;  %v1991_v59 = vld [vmem:[#allocation2 + $0xc] sm:$0xe] }
 0x20a   : > { %v2114_v33 = vshll.u32 %v7444_v28, 16  ;;  %v1667_v47 = vrot.slane %v1666_v16, 4  ;;  %v1770_v60 = vsel %vm7056_vm2, %v5019_v25, %v1769_v23  ;;  %v1771_v53 = vrot.slane %v1769_v23, 4 }
 0x20b   : > { %3353 = vmatmul.mubr.bf16.gmra.mrb[24].mxu1 %v5042_v63  ;;  %v2118_v32 = vshrl.u32 %v7444_v28, 16  ;;  %v1677_v43 = vrot.slane %v1676_v10, 4  ;;  %v2107_v2 = vrot.slane %v2105_v49, 4  ;;  %v2110_v24 = vrot.slane %v2108_v34, 5  ;;  %v7464_v10 = vld [vmem:[#allocation2 + $0x24] sm:$0xf] }
 0x20c   : > { %v2116_v36 = vrot.slane %v2114_v33, 5  ;;  %v1672_v22 = vsel %vm7124_vm7, %v1667_v47, %v1671_v46  ;;  %v1773_v38 = vsel %vm7056_vm2, %v1771_v53, %v1772_v39  ;;  %v2124_v63 = vshll.u32 %v7447_v56, 16  ;;  %v6039_v53 = vld [vmem:[#allocation2 + $0x10] sm:$0xf] }
 0x20d   : > { %v2120_v30 = vrot.slane %v2118_v32, 4  ;;  %v7460_v27 = vrot.slane %v1968_v19, 4  ;;  %v1682_v25 = vsel %vm7124_vm7, %v1677_v43, %v1681_v8  ;;  %v5059_v16 = vcombine.low %v1770_v60, %v1773_v38  ;;  %v7470_v43 = vld [vmem:[#allocation2 + $0x2c] sm:$0x1] }
 0x20e   : > { %v2111_v23 = vor.u32 %v2110_v24, %v2107_v2  ;;  %v5051_v49 = vcombine.low %v1672_v22, %v1682_v25  ;;  %v2126_v33 = vrot.slane %v2124_v63, 5  ;;  %v1819_v46 = vshll.u32 %v1791_v4, 16 }
 0x20f   : > { %v2121_v34 = vor.u32 %v2120_v30, %v2116_v36  ;;  %v5020_v39 = vrot.slane %v1991_v59, 9  ;;  %v2025_v32 = vrot.slane %v6039_v53, 5  ;;  %v2028_v48 = vrot.slane %v1791_v4, 5 }
 0x210   : > { %3458 = vmatmul.mubr.bf16.gmra.mrb[48].mxu0 %v5059_v16  ;;  %v2112_v47 = vrot.slane %v2111_v23, 4  ;;  %3360 = vmatprep.mubr.bf16.mxu1 %v5051_v49  ;;  %v5043_v8 = vcombine.low %v7420_v61, %v7424_v3  ;;  %v1821_v60 = vrot.slane %v1819_v46, 5  ;;  %v2129_v2 = vshrl.u32 %v7464_v10, 16  ;;  %v1992_v23 = vld [vmem:[#allocation2 + $0x18] sm:$0xe] }
 0x211   : > { %v2122_v19 = vrot.slane %v2121_v34, 4  ;;  %v2026_v22 = vsel %vm7056_vm2, %v5020_v39, %v2025_v32  ;;  %v2027_v38 = vrot.slane %v2025_v32, 4  ;;  %v2132_v4 = vshll.u32 %v7464_v10, 16  ;;  %v7487_v39 = vld [vmem:[#allocation2 + $0x30] sm:$0xf] }
 0x212   : > { %v2117_v24 = vsel %vm7124_vm7, %v2112_v47, %v2116_v36  ;;  %v2131_v63 = vrot.slane %v2129_v2, 4  ;;  %v2138_v61 = vshll.u32 %v7466_v58, 16  ;;  %v2142_v3 = vshrl.u32 %v7466_v58, 16  ;;  %v1792_v47 = vld [vmem:[#allocation2 + $0x20] sm:$0x1] }
 0x213   : > { %v2127_v30 = vsel %vm7124_vm7, %v2122_v19, %v2126_v33  ;;  %3361 = vmatmul.mubr.bf16.gmra.mrb[28].mxu1 %v5043_v8  ;;  %v2029_v25 = vsel %vm7056_vm2, %v2027_v38, %v2028_v48  ;;  %v2134_v36 = vrot.slane %v2132_v4, 5  ;;  %v2148_v16 = vshll.u32 %v7470_v43, 16  ;;  %v7496_v38 = vld [vmem:[#allocation2 + $0x34] sm:$0xf] }
 0x214   : > { %v5092_v59 = vcombine.low %v2117_v24, %v2127_v30  ;;  %v5076_v49 = vcombine.low %v2026_v22, %v2029_v25  ;;  %v5084_v34 = vcombine.low %v7440_v50, %v7444_v28  ;;  %v2140_v46 = vrot.slane %v2138_v61, 5  ;;  %v6040_v24 = vld [vmem:[#allocation2 + $0x1c] sm:$0xf]  ;;  %v7500_v61 = vld [vmem:[#allocation2 + $0x38] sm:$0x1] }
 0x215   : > { %v2144_v33 = vrot.slane %v2142_v3, 4  ;;  %v2135_v53 = vor.u32 %v2134_v36, %v2131_v63  ;;  %v2150_v32 = vrot.slane %v2148_v16, 5  ;;  %v1812_v48 = vsel %vm7124_vm7, %v7047_v51, %v7029_v40 }
 0x216   : > { %3595 = vmatprep.mubr.bf16.mxu0 %v5092_v59  ;;  %v1822_v19 = vsel %vm7124_vm7, %v7062_v44, %v1821_v60  ;;  %3498 = vmatprep.mubr.bf16.mxu1 %v5076_v49  ;;  %v5021_v2 = vrot.slane %v1992_v23, 9  ;;  %v2032_v22 = vrot.slane %v6040_v24, 5  ;;  %v2035_v30 = vrot.slane %v1792_v47, 5  ;;  %v5808_v59 = vld [vmem:[%s8784_s2 + $0x208] sm:$0xff]  }
 0x217   : > { %v2145_v8 = vor.u32 %v2144_v33, %v2140_v46  ;;  %v5068_v50 = vcombine.low %v1812_v48, %v1822_v19  ;;  %v2136_v4 = vrot.slane %v2135_v53, 4  ;;  %v5085_v63 = vcombine.low %v7464_v10, %v7466_v58  ;;  %v1993_v53 = vld [vmem:[#allocation2 + $0x24] sm:$0xe] }
 0x218   : > { %3596 = vmatmul.mubr.bf16.vlgmr.msra.gmra.mrb[52].mxu0 %v5084_v34  ;;  %v2153_v40 = vshrl.u32 %v7487_v39, 16  ;;  %v2033_v44 = vsel %vm7056_vm2, %v5021_v2, %v2032_v22  ;;  %v2034_v60 = vrot.slane %v2032_v22, 4  ;;  %v2156_v3 = vshll.u32 %v7487_v39, 16 }
 0x219   : > { %v2146_v51 = vrot.slane %v2145_v8, 4  ;;  %v2141_v25 = vsel %vm7124_vm7, %v2136_v4, %v2140_v46  ;;  %v2162_v10 = vshll.u32 %v7496_v38, 16  ;;  %v2166_v16 = vshrl.u32 %v7496_v38, 16  ;;  %v7521_v4 = vld [vmem:[#allocation2 + $0x2c] sm:$0x1] }
 0x21a   : > { %v2155_v36 = vrot.slane %v2153_v40, 4  ;;  %v2036_v49 = vsel %vm7056_vm2, %v2034_v60, %v2035_v30  ;;  %v2158_v34 = vrot.slane %v2156_v3, 5  ;;  %v2172_v33 = vshll.u32 %v7500_v61, 16  ;;  %v5810_v30 = vld [vmem:[%s8784_s2 + $0x210] sm:$0xff]  }
 0x21b   : > { %v2151_v23 = vsel %vm7124_vm7, %v2146_v51, %v2150_v32  ;;  %3499 = vmatmul.mubr.bf16.vlgmr.msra.gmra.mrb[32].mxu1 %v5068_v50  ;;  %v5077_v46 = vcombine.low %v2033_v44, %v2036_v49  ;;  %v2164_v19 = vrot.slane %v2162_v10, 5  ;;  %v2168_v8 = vrot.slane %v2166_v16, 4  ;;  %v7542_v49 = vld [vmem:[#allocation2 + $0x44] sm:$0x1] }
 0x21c   : > { %v5093_v48 = vcombine.low %v2141_v25, %v2151_v23  ;;  %5565 = vmatpush3.bf16.msra.mxu1 %v7341_v11  ;;  %v2159_v2 = vor.u32 %v2158_v34, %v2155_v36  ;;  %v2174_v22 = vrot.slane %v2172_v33, 5  ;;  %v1830_v32 = vor.u32 %v7083_v15, %v7070_v0  ;;  %v7529_v15 = vld [vmem:[#allocation2 + $0x3c] sm:$0xf] }
 0x21d   : > { %5566 = vmatprep.subr.bf16.mxu1 %v5808_v59  ;;  %v1833_v50 = vshll.u32 %v6040_v24, 16  ;;  %3506 = vmatprep.mubr.bf16.mxu1 %v5077_v46  ;;  %v2169_v40 = vor.u32 %v2168_v8, %v2164_v19  ;;  %v1839_v11 = vrot.slane %v1837_v42, 4  ;;  %v1843_v51 = vshll.u32 %v1792_v47, 16 }
 0x21e   : > { %3603 = vmatprep.mubr.bf16.mxu0 %v5093_v48  ;;  %v5022_v44 = vrot.slane %v1993_v53, 9  ;;  %v2160_v60 = vrot.slane %v2159_v2, 4  ;;  %v1831_v3 = vrot.slane %v1830_v32, 4  ;;  %v2039_v0 = vrot.slane %v7172_v37, 5 }
 0x21f   : > { %v1835_v25 = vrot.slane %v1833_v50, 5  ;;  %v2170_v24 = vrot.slane %v2169_v40, 4  ;;  %v1845_v36 = vrot.slane %v1843_v51, 5  ;;  %v2042_v10 = vrot.slane %v7521_v4, 5 }
 0x220   : > { %3604 = vmatmul.mubr.bf16.gmra.mrb[56].mxu0 %v5085_v63  ;;  %5567 = vmatpush3.bf16.msra.mxu1 %v5808_v59  ;;  %v5086_v16 = vcombine.low %v7487_v39, %v7496_v38  ;;  %v2165_v42 = vsel %vm7124_vm7, %v2160_v60, %v2164_v19  ;;  %v2040_v63 = vsel %vm7056_vm2, %v5022_v44, %v2039_v0  ;;  %v5812_v59 = vld [vmem:[%s8784_s2 + $0x218] sm:$0xff]   ;;  %v2041_v34 = vrot.slane %v2039_v0, 4  ;;  %v1994_v60 = vld [vmem:[#allocation2 + $0x30] sm:$0xe] }
 0x221   : > { %v1836_v47 = vsel %vm7124_vm7, %v1831_v3, %v1835_v25  ;;  %v1840_v23 = vor.u32 %v1839_v11, %v1835_v25  ;;  %5568 = vmatprep.subr.bf16.mxu1 %v5810_v30  ;;  %v2175_v39 = vsel %vm7124_vm7, %v2170_v24, %v2174_v22  ;;  %v2177_v33 = vshrl.u32 %v7529_v15, 16 }
 0x222   : > { %v2180_v53 = vshll.u32 %v7529_v15, 16  ;;  %v5094_v48 = vcombine.low %v2165_v42, %v2175_v39  ;;  %v2186_v19 = vshll.u32 %v7534_v45, 16  ;;  %v2190_v8 = vshrl.u32 %v7534_v45, 16 }
 0x223   : > { %v1841_v46 = vrot.slane %v1840_v23, 4  ;;  %v2043_v2 = vsel %vm7056_vm2, %v2041_v34, %v2042_v10  ;;  %v2179_v32 = vrot.slane %v2177_v33, 4  ;;  %v2196_v40 = vshll.u32 %v7542_v49, 16  ;;  %v7560_v10 = vld [vmem:[#allocation2 + $0x38] sm:$0x1] }
 0x224   : > { %v2182_v50 = vrot.slane %v2180_v53, 5  ;;  %5569 = vmatpush3.bf16.msra.mxu1 %v5810_v30  ;;  %3611 = vmatprep.mubr.bf16.mxu0 %v5094_v48  ;;  %v5078_v11 = vcombine.low %v2040_v63, %v2043_v2  ;;  %v2188_v51 = vrot.slane %v2186_v19, 5  ;;  %v2192_v44 = vrot.slane %v2190_v8, 4  ;;  %v5814_v30 = vld [vmem:[%s8784_s2 + $0x220] sm:$0xff]   ;;  %v7573_v19 = vld [vmem:[#allocation2 + $0x4c] sm:$0xf] }
 0x225   : > { %v1846_v22 = vsel %vm7124_vm7, %v1841_v46, %v1845_v36  ;;  %5570 = vmatprep.subr.bf16.mxu1 %v5812_v59  ;;  %v2198_v0 = vrot.slane %v2196_v40, 5  ;;  %v1854_v24 = vor.u32 %v7235_v18, %v7202_v21  ;;  %v1857_v36 = vshll.u32 %v7172_v37, 16  ;;  %v7570_v18 = vld [vmem:[#allocation2 + $0x48] sm:$0xf] }
 0x226   : > { %v5069_v3 = vcombine.low %v1836_v47, %v1846_v22  ;;  %v2183_v25 = vor.u32 %v2182_v50, %v2179_v32  ;;  %v2193_v42 = vor.u32 %v2192_v44, %v2188_v51  ;;  %v1863_v23 = vrot.slane %v1861_v17, 4  ;;  %v5816_v8 = vld [vmem:[%s8784_s2 + $0x228] sm:$0xff]   ;;  %v7588_v50 = vld [vmem:[#allocation2 + $0x50] sm:$0x1] }
 0x227   : > { %v1867_v63 = vshll.u32 %v7521_v4, 16  ;;  %v1855_v39 = vrot.slane %v1854_v24, 4  ;;  %v5023_v34 = vrot.slane %v1994_v60, 9  ;;  %v2046_v21 = vrot.slane %v7282_v29, 5 }
 0x228   : > { %3507 = vmatmul.mubr.bf16.gmra.mrb[36].mxu1 %v5069_v3  ;;  %3612 = vmatmul.mubr.bf16.gmra.mrb[60].mxu0 %v5086_v16  ;;  %v2184_v47 = vrot.slane %v2183_v25, 4  ;;  %v2194_v33 = vrot.slane %v2193_v42, 4  ;;  %v1859_v53 = vrot.slane %v1857_v36, 5  ;;  %v2049_v46 = vrot.slane %v7560_v10, 5 }
 0x229   : > { %3514 = vmatprep.mubr.bf16.mxu1 %v5078_v11  ;;  %v1869_v48 = vrot.slane %v1867_v63, 5  ;;  %5571 = vmatpush3.bf16.msra.mxu1 %v5812_v59  ;;  %v2047_v17 = vsel %vm7056_vm2, %v5023_v34, %v2046_v21  ;;  %v2048_v4 = vrot.slane %v2046_v21, 4  ;;  %v5087_v16 = vcombine.low %v7529_v15, %v7534_v45  ;;  %v5818_v63 = vld [vmem:[%s8784_s2 + $0x230] sm:$0xff]   ;;  %v7607_v21 = vld [vmem:[#allocation2 + $0x44] sm:$0x1] }
 0x22a   : > { %v2189_v37 = vsel %vm7124_vm7, %v2184_v47, %v2188_v51  ;;  %5572 = vmatprep.subr.bf16.mxu1 %v5814_v30  ;;  %v2199_v2 = vsel %vm7124_vm7, %v2194_v33, %v2198_v0  ;;  %v1860_v59 = vsel %vm7124_vm7, %v1855_v39, %v1859_v53  ;;  %v1864_v32 = vor.u32 %v1863_v23, %v1859_v53  ;;  %v1995_v23 = vld [vmem:[#allocation2 + $0x3c] sm:$0xe] }
 0x22b   : > { %v2201_v40 = vshrl.u32 %v7570_v18, 16  ;;  %v5095_v22 = vcombine.low %v2189_v37, %v2199_v2  ;;  %v2050_v15 = vsel %vm7056_vm2, %v2048_v4, %v2049_v46  ;;  %v2204_v11 = vshll.u32 %v7570_v18, 16  ;;  %v7610_v2 = vld [vmem:[#allocation2 + $0x54] sm:$0xf] }
 0x22c   : > { %v2210_v51 = vshll.u32 %v7573_v19, 16  ;;  %v1865_v44 = vrot.slane %v1864_v32, 4  ;;  %v5079_v60 = vcombine.low %v2047_v17, %v2050_v15  ;;  %v2214_v25 = vshrl.u32 %v7573_v19, 16 }
 0x22d   : > { %v2203_v3 = vrot.slane %v2201_v40, 4  ;;  %5573 = vmatpush3.bf16.msra.mxu1 %v5814_v30  ;;  %3619 = vmatprep.mubr.bf16.mxu0 %v5095_v22  ;;  %v2206_v0 = vrot.slane %v2204_v11, 5  ;;  %v2220_v42 = vshll.u32 %v7588_v50, 16  ;;  %v1878_v36 = vor.u32 %v7300_v54, %v7287_v13 }
 0x22e   : > { %v2212_v24 = vrot.slane %v2210_v51, 5  ;;  %5574 = vmatprep.subr.bf16.mxu1 %v5816_v8  ;;  %v1870_v47 = vsel %vm7124_vm7, %v1865_v44, %v1869_v48  ;;  %v2216_v39 = vrot.slane %v2214_v25, 4  ;;  %v1881_v30 = vshll.u32 %v7282_v29, 16 }
 0x22f   : > { %v1887_v34 = vrot.slane %v1885_v52, 4  ;;  %v5070_v33 = vcombine.low %v1860_v59, %v1870_v47  ;;  %v2207_v13 = vor.u32 %v2206_v0, %v2203_v3  ;;  %v2222_v54 = vrot.slane %v2220_v42, 5  ;;  %v7616_v59 = vld [vmem:[#allocation2 + $0x58] sm:$0xf] }
 0x230   : > { %3620 = vmatmul.mubr.bf16.gmra.mrb[64].mxu0 %v5087_v16  ;;  %v1879_v53 = vrot.slane %v1878_v36, 4  ;;  %v2217_v46 = vor.u32 %v2216_v39, %v2212_v24  ;;  %v1883_v37 = vrot.slane %v1881_v30, 5  ;;  %v1891_v17 = vshll.u32 %v7560_v10, 16  ;;  %v5820_v10 = vld [vmem:[%s8784_s2 + $0x238] sm:$0xff]  }
 0x231   : > { %v5024_v4 = vrot.slane %v1995_v23, 9  ;;  %5575 = vmatpush3.bf16.msra.mxu1 %v5816_v8  ;;  %v2208_v48 = vrot.slane %v2207_v13, 4  ;;  %v2053_v29 = vrot.slane %v7318_v55, 5  ;;  %v2056_v52 = vrot.slane %v7607_v21, 5 }
 0x232   : > { %3515 = vmatmul.mubr.bf16.gmra.mrb[40].mxu1 %v5070_v33  ;;  %v5088_v16 = vcombine.low %v7570_v18, %v7573_v19  ;;  %5576 = vmatprep.subr.bf16.mxu1 %v5818_v63  ;;  %v2218_v32 = vrot.slane %v2217_v46, 4  ;;  %v1884_v8 = vsel %vm7124_vm7, %v1879_v53, %v1883_v37  ;;  %v1888_v40 = vor.u32 %v1887_v34, %v1883_v37  ;;  %v7642_v53 = vld [vmem:[#allocation2 + $0x50] sm:$0x1]  ;;  %v1996_v46 = vld [vmem:[#allocation2 + $0x48] sm:$0xe] }
 0x233   : > { %3522 = vmatprep.mubr.bf16.mxu1 %v5079_v60  ;;  %v1893_v22 = vrot.slane %v1891_v17, 5  ;;  %v2213_v15 = vsel %vm7124_vm7, %v2208_v48, %v2212_v24  ;;  %v2054_v18 = vsel %vm7056_vm2, %v5024_v4, %v2053_v29  ;;  %v2055_v11 = vrot.slane %v2053_v29, 4  ;;  %v7630_v60 = vld [vmem:[#allocation2 + $0x5c] sm:$0x1]  ;;  %v7648_v29 = vld [vmem:[#allocation2 + $0x60] sm:$0xf] }
 0x234   : > { %v2225_v51 = vshrl.u32 %v7610_v2, 16  ;;  %v2223_v44 = vsel %vm7124_vm7, %v2218_v32, %v2222_v54  ;;  %v1889_v3 = vrot.slane %v1888_v40, 4  ;;  %v2228_v25 = vshll.u32 %v7610_v2, 16 }
 0x235   : > { %v2234_v0 = vshll.u32 %v7616_v59, 16  ;;  %5577 = vmatpush3.bf16.msra.mxu1 %v5818_v63  ;;  %v5096_v42 = vcombine.low %v2213_v15, %v2223_v44  ;;  %v2057_v24 = vsel %vm7056_vm2, %v2055_v11, %v2056_v52  ;;  %v2238_v23 = vshrl.u32 %v7616_v59, 16  ;;  %v7656_v15 = vld [vmem:[#allocation2 + $0x64] sm:$0xf] }
 0x236   : > { %v2227_v36 = vrot.slane %v2225_v51, 4  ;;  %5578 = vmatprep.subr.bf16.mxu1 %v5820_v10  ;;  %v1894_v47 = vsel %vm7124_vm7, %v1889_v3, %v1893_v22  ;;  %v5080_v39 = vcombine.low %v2054_v18, %v2057_v24  ;;  %v2230_v30 = vrot.slane %v2228_v25, 5  ;;  %v7665_v51 = vld [vmem:[#allocation2 + $0x68] sm:$0x1] }
 0x237   : > { %v2236_v34 = vrot.slane %v2234_v0, 5  ;;  %3627 = vmatprep.mubr.bf16.mxu0 %v5096_v42  ;;  %v5071_v33 = vcombine.low %v1884_v8, %v1894_v47  ;;  %v2240_v13 = vrot.slane %v2238_v23, 4  ;;  %v2244_v54 = vshll.u32 %v7630_v60, 16 }
 0x238   : > { %v1902_v63 = vor.u32 %v7363_v41, %v7345_v20  ;;  %3628 = vmatmul.mubr.bf16.gmra.mrb[68].mxu0 %v5088_v16  ;;  %v2231_v37 = vor.u32 %v2230_v30, %v2227_v36  ;;  %v1905_v17 = vshll.u32 %v7318_v55, 16  ;;  %v1911_v4 = vrot.slane %v1909_v9, 4 }
 0x239   : > { %v1915_v48 = vshll.u32 %v7607_v21, 16  ;;  %5579 = vmatpush3.bf16.msra.mxu1 %v5820_v10  ;;  %v7652_v52 = vrot.slane %v1971_v5, 5  ;;  %v2241_v20 = vor.u32 %v2240_v13, %v2236_v34  ;;  %v2246_v41 = vrot.slane %v2244_v54, 5 }
 0x23a   : > { %3523 = vmatmul.mubr.bf16.gmra.mrb[44].mxu1 %v5071_v33  ;;  %v1903_v32 = vrot.slane %v1902_v63, 4  ;;  %v2232_v16 = vrot.slane %v2231_v37, 4  ;;  %v1907_v8 = vrot.slane %v1905_v17, 5  ;;  %v5025_v40 = vrot.slane %v1996_v46, 9  ;;  %v1997_v63 = vld [vmem:[#allocation2 + $0x54] sm:$0xe] }
 0x23b   : > { %3530 = vmatprep.mubr.bf16.mxu1 %v5080_v39  ;;  %v2060_v55 = vrot.slane %v7367_v14, 5  ;;  %v2242_v9 = vrot.slane %v2241_v20, 4  ;;  %v1917_v22 = vrot.slane %v1915_v48, 5  ;;  %v2063_v21 = vrot.slane %v7642_v53, 5  ;;  %v1797_v48 = vld [vmem:[#allocation2 + $0x5c] sm:$0x1] }
 0x23c   : > { %v2249_v35 = vshrl.u32 %v7648_v29, 16  ;;  %v2237_v5 = vsel %vm7124_vm7, %v2232_v16, %v2236_v34  ;;  %v1908_v10 = vsel %vm7124_vm7, %v1903_v32, %v1907_v8  ;;  %v1912_v18 = vor.u32 %v1911_v4, %v1907_v8  ;;  %v7685_v16 = vld [vmem:[#allocation2 + $0x6c] sm:$0xf] }
 0x23d   : > { %v5089_v11 = vcombine.low %v7610_v2, %v7616_v59  ;;  %v2247_v44 = vsel %vm7124_vm7, %v2242_v9, %v2246_v41  ;;  %v2062_v3 = vrot.slane %v2060_v55, 4  ;;  %v2252_v0 = vshll.u32 %v7648_v29, 16 }
 0x23e   : > { %v2251_v25 = vrot.slane %v2249_v35, 4  ;;  %v5097_v42 = vcombine.low %v2237_v5, %v2247_v44  ;;  %v1913_v24 = vrot.slane %v1912_v18, 4  ;;  %v2258_v36 = vshll.u32 %v7656_v15, 16 }
 0x23f   : > { %v2262_v23 = vshrl.u32 %v7656_v15, 16  ;;  %v2064_v47 = vsel %vm7056_vm2, %v2062_v3, %v2063_v21  ;;  %v2254_v39 = vrot.slane %v2252_v0, 5  ;;  %v2268_v2 = vshll.u32 %v7665_v51, 16  ;;  %v7699_v0 = vld [vmem:[#allocation2 + $0x74] sm:$0x1] }
 0x240   : > { %v1926_v30 = vor.u32 %v7373_v7, %v7369_v1  ;;  %3635 = vmatprep.mubr.bf16.mxu0 %v5097_v42  ;;  %v1918_v34 = vsel %vm7124_vm7, %v1913_v24, %v1917_v22  ;;  %v2061_v33 = vsel %vm7056_vm2, %v5025_v40, %v2060_v55  ;;  %v2260_v13 = vrot.slane %v2258_v36, 5 }
 0x241   : > { %v2264_v54 = vrot.slane %v2262_v23, 4  ;;  %v5072_v46 = vcombine.low %v1908_v10, %v1918_v34  ;;  %v5081_v37 = vcombine.low %v2061_v33, %v2064_v47  ;;  %3636 = vmatmul.mubr.bf16.gmra.mrb[72].mxu0 %v5089_v11  ;;  %v2255_v17 = vor.u32 %v2254_v39, %v2251_v25  ;;  %v7688_v10 = vld [vmem:[#allocation2 + $0x70] sm:$0xf] }
 0x242   : > { %v2270_v4 = vrot.slane %v2268_v2, 5  ;;  %v1929_v41 = vshll.u32 %v7367_v14, 16  ;;  %v8812_v1 = vshrl.u32 %v7367_v14, 16  ;;  %v1939_v32 = vshll.u32 %v7642_v53, 16 }
 0x243   : > { %v2265_v20 = vor.u32 %v2264_v54, %v2260_v13  ;;  %3531 = vmatmul.mubr.bf16.gmra.mrb[48].mxu1 %v5072_v46  ;;  %v2256_v8 = vrot.slane %v2255_v17, 4  ;;  %v1927_v40 = vrot.slane %v1926_v30, 4  ;;  %v5026_v55 = vrot.slane %v1997_v63, 9 }
 0x244   : > { %v1935_v7 = vrot.slane %v8812_v1, 4  ;;  %v2067_v9 = vrot.slane %v7388_v62, 5  ;;  %3538 = vmatprep.mubr.bf16.mxu1 %v5081_v37  ;;  %v1931_v21 = vrot.slane %v1929_v41, 5  ;;  %v1941_v35 = vrot.slane %v1939_v32, 5  ;;  %v1998_v41 = vld [vmem:[#allocation2 + $0x60] sm:$0xe] }
 0x245   : > { %v2266_v22 = vrot.slane %v2265_v20, 4  ;;  %v2070_v5 = vrot.slane %v1797_v48, 5  ;;  %v2261_v14 = vsel %vm7124_vm7, %v2256_v8, %v2260_v13  ;;  %v5090_v18 = vcombine.low %v7648_v29, %v7656_v15  ;;  %v1798_v20 = vld [vmem:[#allocation2 + $0x68] sm:$0x1] }
 0x246   : > { %v2068_v53 = vsel %vm7056_vm2, %v5026_v55, %v2067_v9  ;;  %v2273_v11 = vshrl.u32 %v7685_v16, 16  ;;  %v1936_v3 = vor.u32 %v1935_v7, %v1931_v21  ;;  %v2069_v25 = vrot.slane %v2067_v9, 4 }
 0x247   : > { %v2271_v44 = vsel %vm7124_vm7, %v2266_v22, %v2270_v4  ;;  %v2276_v42 = vshll.u32 %v7685_v16, 16  ;;  %v1932_v36 = vsel %vm7124_vm7, %v1927_v40, %v1931_v21  ;;  %v2282_v47 = vshll.u32 %v7688_v10, 16 }
 0x248   : > { %v5098_v24 = vcombine.low %v2261_v14, %v2271_v44  ;;  %v2275_v23 = vrot.slane %v2273_v11, 4  ;;  %v1937_v39 = vrot.slane %v1936_v3, 4  ;;  %v2071_v29 = vsel %vm7056_vm2, %v2069_v25, %v2070_v5 }
 0x249   : > { %v2278_v2 = vrot.slane %v2276_v42, 5  ;;  %v2286_v30 = vshrl.u32 %v7688_v10, 16  ;;  %v2284_v34 = vrot.slane %v2282_v47, 5  ;;  %v2292_v33 = vshll.u32 %v7699_v0, 16 }
 0x24a   : > { %3643 = vmatprep.mubr.bf16.mxu0 %v5098_v24  ;;  %v1950_v13 = vor.u32 %v7412_v57, %v7396_v6  ;;  %v1953_v54 = vshll.u32 %v7388_v62, 16  ;;  %v1942_v63 = vsel %vm7124_vm7, %v1937_v39, %v1941_v35  ;;  %v8813_v17 = vshrl.u32 %v7388_v62, 16 }
 0x24b   : > { %3644 = vmatmul.mubr.bf16.gmra.mrb[76].mxu0 %v5090_v18  ;;  %v2279_v46 = vor.u32 %v2278_v2, %v2275_v23  ;;  %v2288_v37 = vrot.slane %v2286_v30, 4  ;;  %v5073_v1 = vcombine.low %v1932_v36, %v1942_v63  ;;  %v5082_v7 = vcombine.low %v2068_v53, %v2071_v29 }
 0x24c   : > { %v1959_v4 = vrot.slane %v8813_v17, 4  ;;  %v1951_v32 = vrot.slane %v1950_v13, 4  ;;  %v1955_v8 = vrot.slane %v1953_v54, 5  ;;  %v2294_v6 = vrot.slane %v2292_v33, 5  ;;  %v2298_v13 = vld [vmem:[#allocation2 + $0x30] sm:$0xe] }
 0x24d   : > { %v2280_v40 = vrot.slane %v2279_v46, 4  ;;  %v2289_v55 = vor.u32 %v2288_v37, %v2284_v34  ;;  %v1963_v57 = vshll.u32 %v1797_v48, 16  ;;  %3539 = vmatmul.mubr.bf16.gmra.mrb[52].mxu1 %v5073_v1  ;;  %v5027_v22 = vrot.slane %v1998_v41, 9  ;;  %v2296_v37 = vld [vmem:[#allocation2 + $0x18] sm:$0xe] }
 0x24e   : > { %v1960_v9 = vor.u32 %v1959_v4, %v1955_v8  ;;  %v2074_v21 = vrot.slane %v7414_v26, 5  ;;  %v2077_v35 = vrot.slane %v1798_v20, 5  ;;  %3546 = vmatprep.mubr.bf16.mxu1 %v5082_v7  ;;  %v1956_v53 = vsel %vm7124_vm7, %v1951_v32, %v1955_v8 }
 0x24f   : > { %v2285_v62 = vsel %vm7124_vm7, %v2280_v40, %v2284_v34  ;;  %v2290_v5 = vrot.slane %v2289_v55, 4  ;;  %v1965_v14 = vrot.slane %v1963_v57, 5  ;;  %v1974_v48 = vor.u32 %v7652_v52, %v7460_v27 }
 0x250   : > { %v1961_v18 = vrot.slane %v1960_v9, 4  ;;  %v2076_v11 = vrot.slane %v2074_v21, 4  ;;  %v1977_v3 = vshll.u32 %v7414_v26, 16  ;;  %v8814_v25 = vshrl.u32 %v7414_v26, 16 }
 0x251   : > { %v2295_v44 = vsel %vm7124_vm7, %v2290_v5, %v2294_v6  ;;  %v1987_v24 = vshll.u32 %v1798_v20, 16  ;;  %v2075_v23 = vsel %vm7056_vm2, %v5027_v22, %v2074_v21  ;;  %v5091_v27 = vcombine.low %v7685_v16, %v7688_v10 }
 0x252   : > { %v1983_v42 = vrot.slane %v8814_v25, 4  ;;  %v5099_v36 = vcombine.low %v2285_v62, %v2295_v44  ;;  %v2078_v47 = vsel %vm7056_vm2, %v2076_v11, %v2077_v35  ;;  %v1966_v39 = vsel %vm7124_vm7, %v1961_v18, %v1965_v14  ;;  %v2297_v35 = vld [vmem:[#allocation2 + $0x24] sm:$0xe] }
 0x253   : > { %v1979_v52 = vrot.slane %v1977_v3, 5  ;;  %v5074_v29 = vcombine.low %v1956_v53, %v1966_v39  ;;  %v2330_v26 = vrot.slane %v7444_v28, 5  ;;  %v5083_v2 = vcombine.low %v2075_v23, %v2078_v47  ;;  %v2299_v28 = vld [vmem:[#allocation2 + $0x3c] sm:$0xe] }
 0x254   : > { %3651 = vmatprep.mubr.bf16.mxu0 %v5099_v36  ;;  %v1975_v30 = vrot.slane %v1974_v48, 4  ;;  %v1989_v33 = vrot.slane %v1987_v24, 5  ;;  %v2333_v54 = vrot.slane %v7447_v56, 5  ;;  %v2344_v63 = vrot.slane %v7496_v38, 5  ;;  %v2300_v48 = vld [vmem:[#allocation2 + $0x48] sm:$0xe] }
 0x255   : > { %3652 = vmatmul.mubr.bf16.gmra.mrb[80].mxu0 %v5091_v27  ;;  %v1984_v34 = vor.u32 %v1983_v42, %v1979_v52  ;;  %3547 = vmatmul.mubr.bf16.gmra.mrb[56].mxu1 %v5074_v29  ;;  %v2347_v46 = vrot.slane %v7500_v61, 5  ;;  %v2332_v17 = vrot.slane %v2330_v26, 4  ;;  %v5030_v4 = vrot.slane %v2298_v13, 9  ;;  %v2302_v36 = vld [vmem:[#allocation2 + $0x60] sm:$0xe] }
 0x256   : > { %3554 = vmatprep.mubr.bf16.mxu1 %v5083_v2  ;;  %v2346_v20 = vrot.slane %v2344_v63, 4  ;;  %v2351_v41 = vrot.slane %v7534_v45, 5  ;;  %v1980_v1 = vsel %vm7124_vm7, %v1975_v30, %v1979_v52  ;;  %v2354_v56 = vrot.slane %v7542_v49, 5  ;;  %v2303_v30 = vld [vmem:[#allocation2 + $0x6c] sm:$0xe] }
 0x257   : > { %v1985_v16 = vrot.slane %v1984_v34, 4  ;;  %v5028_v38 = vrot.slane %v2296_v37, 9  ;;  %v2334_v61 = vsel %vm7056_vm2, %v2332_v17, %v2333_v54  ;;  %v2345_v32 = vsel %vm7056_vm2, %v5030_v4, %v2344_v63 }
 0x258   : > { %v2348_v8 = vsel %vm7056_vm2, %v2346_v20, %v2347_v46  ;;  %v2337_v45 = vrot.slane %v7466_v58, 5  ;;  %v5031_v55 = vrot.slane %v2299_v28, 9  ;;  %v2353_v6 = vrot.slane %v2351_v41, 4 }
 0x259   : > { %v1990_v7 = vsel %vm7124_vm7, %v1985_v16, %v1989_v33  ;;  %v5102_v40 = vcombine.low %v2345_v32, %v2348_v8  ;;  %v2331_v31 = vsel %vm7056_vm2, %v5028_v38, %v2330_v26  ;;  %v2340_v49 = vrot.slane %v7470_v43, 5 }
 0x25a   : > { %v5075_v57 = vcombine.low %v1980_v1, %v1990_v7  ;;  %v5100_v9 = vcombine.low %v2331_v31, %v2334_v61  ;;  %v2352_v22 = vsel %vm7056_vm2, %v5031_v55, %v2351_v41  ;;  %v2355_v21 = vsel %vm7056_vm2, %v2353_v6, %v2354_v56 }
 0x25b   : > { %v5103_v62 = vcombine.low %v2352_v22, %v2355_v21  ;;  %v2339_v58 = vrot.slane %v2337_v45, 4  ;;  %v5029_v5 = vrot.slane %v2297_v35, 9  ;;  %v2358_v18 = vrot.slane %v7573_v19, 5 }
 0x25c   : > { %v2361_v11 = vrot.slane %v7588_v50, 5  ;;  %v5032_v3 = vrot.slane %v2300_v48, 9  ;;  %v2372_v42 = vrot.slane %v7656_v15, 5  ;;  %v2365_v24 = vrot.slane %v7616_v59, 5  ;;  %v2301_v50 = vld [vmem:[#allocation2 + $0x54] sm:$0xe] }
 0x25d   : > { %3555 = vmatmul.mubr.bf16.gmra.mrb[60].mxu1 %v5075_v57  ;;  %v2341_v14 = vsel %vm7056_vm2, %v2339_v58, %v2340_v49  ;;  %v2338_v53 = vsel %vm7056_vm2, %v5029_v5, %v2337_v45  ;;  %v2360_v44 = vrot.slane %v2358_v18, 4  ;;  %v2368_v19 = vrot.slane %v7630_v60, 5 }
 0x25e   : > { %5580 = vmatprep.mubr.bf16.mxu1 %v5100_v9  ;;  %v5101_v43 = vcombine.low %v2338_v53, %v2341_v14  ;;  %v2359_v23 = vsel %vm7056_vm2, %v5032_v3, %v2358_v18  ;;  %v5034_v39 = vrot.slane %v2302_v36, 9  ;;  %v2374_v27 = vrot.slane %v2372_v42, 4 }
 0x25f   : > { %v2362_v25 = vsel %vm7056_vm2, %v2360_v44, %v2361_v11  ;;  %v2375_v52 = vrot.slane %v7665_v51, 5  ;;  %v2367_v29 = vrot.slane %v2365_v24, 4  ;;  %v5033_v26 = vrot.slane %v2301_v50, 9 }
 0x260   : > { %v5104_v47 = vcombine.low %v2359_v23, %v2362_v25  ;;  %v2379_v59 = vrot.slane %v7688_v10, 5  ;;  %v2373_v2 = vsel %vm7056_vm2, %v5034_v39, %v2372_v42  ;;  %v5035_v13 = vrot.slane %v2303_v30, 9 }
 0x261   : > { %v2369_v15 = vsel %vm7056_vm2, %v2367_v29, %v2368_v19  ;;  %v2376_v60 = vsel %vm7056_vm2, %v2374_v27, %v2375_v52  ;;  %v2366_v34 = vsel %vm7056_vm2, %v5033_v26, %v2365_v24  ;;  %v2382_v63 = vrot.slane %v7699_v0, 5 }
 0x262   : > { %v5105_v33 = vcombine.low %v2366_v34, %v2369_v15  ;;  %v5106_v51 = vcombine.low %v2373_v2, %v2376_v60  ;;  %v2381_v54 = vrot.slane %v2379_v59, 4  ;;  %v2380_v10 = vsel %vm7056_vm2, %v5035_v13, %v2379_v59 }
 0x264   : > { %v2383_v46 = vsel %vm7056_vm2, %v2381_v54, %v2382_v63 }
 0x265   : > { %5581 = vmatmul.mubr.bf16.vlgmr.msra.gmra.mrb[64].mxu1 %v5101_v43  ;;  %v5107_v16 = vcombine.low %v2380_v10, %v2383_v46 }
 0x266   : > { %5584 = vmatprep.mubr.bf16.mxu1 %v5102_v40 }
 0x26d   : > { %5585 = vmatmul.mubr.bf16.gmra.mrb[68].mxu1 %v5103_v62 }
 0x26e   : > { %5588 = vmatprep.mubr.bf16.mxu1 %v5104_v47 }
 0x275   : > { %5589 = vmatmul.mubr.bf16.gmra.mrb[72].mxu1 %v5105_v33 }
 0x276   : > { %5592 = vmatprep.mubr.bf16.mxu1 %v5106_v51 }
 0x27d   : > { %5593 = vmatmul.mubr.bf16.gmra.mrb[76].mxu1 %v5107_v16 }
 0x297   : > { %v5320_v37 = vpop.f32.mrb[20].mxu0 }
 0x298   : > { %v5321_v17 = vpop.f32.mrb[21].mxu0 }
 0x299   : > { %v5322_v4 = vadd.f32 %v5321_v17, %v5320_v37  ;;  %v5323_v20 = vpop.f32.mrb[22].mxu0 }
 0x29a   : > { %v5324_v28 = vpop.f32.mrb[23].mxu0 }
 0x29b   : > { %v5325_v41 = vadd.f32 %v5324_v28, %v5323_v20 }
 0x2a5   : > { %v5256_v1 = vpop.f32.mrb[0].mxu1 }
 0x2a6   : > { %v5257_v7 = vpop.f32.mrb[1].mxu1 }
 0x2a7   : > { %v5258_v56 = vadd.f32 %v5257_v7, %v5256_v1  ;;  %v5259_v0 = vpop.f32.mrb[2].mxu1 }
 0x2a8   : > { %v5260_v38 = vpop.f32.mrb[3].mxu1 }
 0x2a9   : > { %v7788_v61 = vadd.f32 %v5322_v4, %v5258_v56  ;;  %v5261_v32 = vadd.f32 %v5260_v38, %v5259_v0 }
 0x2ab   : > { %v7790_v8 = vadd.f32 %v5325_v41, %v5261_v32 }
 0x2ad   : > { %v5326_v12 = vpop.f32.mrb[24].mxu0  ;;  %v5262_v40 = vpop.f32.mrb[4].mxu1 }
 0x2ae   : > { %v5327_v45 = vpop.f32.mrb[25].mxu0  ;;  %v5263_v57 = vpop.f32.mrb[5].mxu1 }
 0x2af   : > { %v5328_v55 = vadd.f32 %v5327_v45, %v5326_v12  ;;  %v5329_v6 = vpop.f32.mrb[26].mxu0  ;;  %v5264_v49 = vadd.f32 %v5263_v57, %v5262_v40  ;;  %v5265_v9 = vpop.f32.mrb[6].mxu1 }
 0x2b0   : > { %v5330_v31 = vpop.f32.mrb[27].mxu0  ;;  %v5266_v21 = vpop.f32.mrb[7].mxu1 }
 0x2b1   : > { %v5331_v22 = vadd.f32 %v5330_v31, %v5329_v6  ;;  %v7792_v35 = vadd.f32 %v5328_v55, %v5264_v49  ;;  %v5267_v62 = vadd.f32 %v5266_v21, %v5265_v9 }
 0x2b3   : > { %v7794_v58 = vadd.f32 %v5331_v22, %v5267_v62 }
 0x2b9   : > { %v5332_v5 = vpop.f32.mrb[28].mxu0 }
 0x2ba   : > { %v5333_v14 = vpop.f32.mrb[29].mxu0  ;;  %v5268_v53 = vpop.f32.mrb[8].mxu1 }
 0x2bb   : > { %v5334_v43 = vadd.f32 %v5333_v14, %v5332_v5  ;;  %v5335_v18 = vpop.f32.mrb[30].mxu0  ;;  %v5269_v11 = vpop.f32.mrb[9].mxu1 }
 0x2bc   : > { %v5336_v48 = vpop.f32.mrb[31].mxu0  ;;  %v5270_v44 = vadd.f32 %v5269_v11, %v5268_v53  ;;  %v5271_v3 = vpop.f32.mrb[10].mxu1 }
 0x2bd   : > { %v5337_v25 = vadd.f32 %v5336_v48, %v5335_v18  ;;  %v5272_v42 = vpop.f32.mrb[11].mxu1 }
 0x2be   : > { %v7796_v24 = vadd.f32 %v5334_v43, %v5270_v44  ;;  %v5273_v36 = vadd.f32 %v5272_v42, %v5271_v3 }
 0x2c0   : > { %v7798_v23 = vadd.f32 %v5337_v25, %v5273_v36 }
 0x2c2   : > { %v5338_v47 = vpop.f32.mrb[32].mxu0 }
 0x2c3   : > { %v5339_v19 = vpop.f32.mrb[33].mxu0 }
 0x2c4   : > { %v5340_v50 = vadd.f32 %v5339_v19, %v5338_v47  ;;  %v5341_v39 = vpop.f32.mrb[34].mxu0 }
 0x2c5   : > { %v5342_v27 = vpop.f32.mrb[35].mxu0 }
 0x2c6   : > { %v5343_v52 = vadd.f32 %v5342_v27, %v5341_v39  ;;  %v5274_v29 = vpop.f32.mrb[12].mxu1 }
 0x2c7   : > { %v5275_v26 = vpop.f32.mrb[13].mxu1 }
 0x2c8   : > { %v5276_v15 = vadd.f32 %v5275_v26, %v5274_v29  ;;  %v5277_v59 = vpop.f32.mrb[14].mxu1 }
 0x2c9   : > { %v5278_v2 = vpop.f32.mrb[15].mxu1 }
 0x2ca   : > { %v7800_v60 = vadd.f32 %v5340_v50, %v5276_v15  ;;  %v5279_v30 = vadd.f32 %v5278_v2, %v5277_v59 }
 0x2cb   : > { %v5344_v34 = vpop.f32.mrb[36].mxu0 }
 0x2cc   : > { %v7802_v33 = vadd.f32 %v5343_v52, %v5279_v30  ;;  %v5345_v51 = vpop.f32.mrb[37].mxu0 }
 0x2cd   : > { %v5346_v13 = vadd.f32 %v5345_v51, %v5344_v34  ;;  %v5347_v54 = vpop.f32.mrb[38].mxu0 }
 0x2ce   : > { %v5348_v63 = vpop.f32.mrb[39].mxu0  ;;  %v5280_v10 = vpop.f32.mrb[16].mxu1 }
 0x2cf   : > { %v5349_v46 = vadd.f32 %v5348_v63, %v5347_v54  ;;  %v5281_v16 = vpop.f32.mrb[17].mxu1 }
 0x2d0   : > { %v5282_v37 = vadd.f32 %v5281_v16, %v5280_v10  ;;  %v5283_v17 = vpop.f32.mrb[18].mxu1 }
 0x2d1   : > { %v5284_v4 = vpop.f32.mrb[19].mxu1 }
 0x2d2   : > { %v7804_v20 = vadd.f32 %v5346_v13, %v5282_v37  ;;  %v5285_v28 = vadd.f32 %v5284_v4, %v5283_v17 }
 0x2d3   : > { %v5350_v41 = vpop.f32.mrb[40].mxu0 }
 0x2d4   : > { %v7806_v1 = vadd.f32 %v5349_v46, %v5285_v28  ;;  %v5351_v7 = vpop.f32.mrb[41].mxu0 }
 0x2d5   : > { %v5352_v56 = vadd.f32 %v5351_v7, %v5350_v41  ;;  %v5353_v0 = vpop.f32.mrb[42].mxu0 }
 0x2d6   : > { %v5354_v38 = vpop.f32.mrb[43].mxu0  ;;  %v5286_v32 = vpop.f32.mrb[20].mxu1 }
 0x2d7   : > { %v5355_v12 = vadd.f32 %v5354_v38, %v5353_v0  ;;  %v5287_v45 = vpop.f32.mrb[21].mxu1 }
 0x2d8   : > { %v5288_v40 = vadd.f32 %v5287_v45, %v5286_v32  ;;  %v5289_v55 = vpop.f32.mrb[22].mxu1 }
 0x2d9   : > { %v5290_v6 = vpop.f32.mrb[23].mxu1 }
 0x2da   : > { %v7808_v57 = vadd.f32 %v5352_v56, %v5288_v40  ;;  %v5291_v31 = vadd.f32 %v5290_v6, %v5289_v55 }
 0x2db   : > { %v5356_v49 = vpop.f32.mrb[44].mxu0 }
 0x2dc   : > { %v7810_v9 = vadd.f32 %v5355_v12, %v5291_v31  ;;  %v5357_v22 = vpop.f32.mrb[45].mxu0 }
 0x2dd   : > { %v5358_v21 = vadd.f32 %v5357_v22, %v5356_v49  ;;  %v5359_v62 = vpop.f32.mrb[46].mxu0 }
 0x2de   : > { %v5360_v5 = vpop.f32.mrb[47].mxu0  ;;  %v5292_v14 = vpop.f32.mrb[24].mxu1 }
 0x2df   : > { %v5361_v53 = vadd.f32 %v5360_v5, %v5359_v62  ;;  %v5293_v43 = vpop.f32.mrb[25].mxu1 }
 0x2e0   : > { %v5294_v18 = vadd.f32 %v5293_v43, %v5292_v14  ;;  %v5295_v11 = vpop.f32.mrb[26].mxu1 }
 0x2e1   : > { %v5296_v48 = vpop.f32.mrb[27].mxu1 }
 0x2e2   : > { %v7812_v44 = vadd.f32 %v5358_v21, %v5294_v18  ;;  %v5297_v3 = vadd.f32 %v5296_v48, %v5295_v11 }
 0x2e3   : > { %v5362_v25 = vpop.f32.mrb[48].mxu0 }
 0x2e4   : > { %v7814_v42 = vadd.f32 %v5361_v53, %v5297_v3  ;;  %v5363_v36 = vpop.f32.mrb[49].mxu0 }
 0x2e5   : > { %v5364_v47 = vadd.f32 %v5363_v36, %v5362_v25  ;;  %v5365_v19 = vpop.f32.mrb[50].mxu0 }
 0x2e6   : > { %v5366_v50 = vpop.f32.mrb[51].mxu0  ;;  %v5298_v39 = vpop.f32.mrb[28].mxu1 }
 0x2e7   : > { %v5367_v27 = vadd.f32 %v5366_v50, %v5365_v19  ;;  %v5299_v52 = vpop.f32.mrb[29].mxu1 }
 0x2e8   : > { %v5300_v29 = vadd.f32 %v5299_v52, %v5298_v39  ;;  %v5301_v26 = vpop.f32.mrb[30].mxu1 }
 0x2e9   : > { %v5302_v15 = vpop.f32.mrb[31].mxu1 }
 0x2ea   : > { %v7816_v59 = vadd.f32 %v5364_v47, %v5300_v29  ;;  %v5303_v2 = vadd.f32 %v5302_v15, %v5301_v26  ;;  %v5821_v47 = vld [vmem:[%s8785_s3] sm:$0xff]  }
 0x2eb   : > { %v5448_v30 = vpop.f32.mrb[52].mxu0  ;;  %5596 = vmatprep.subr.bf16.mxu0 %v5821_v47  ;;  %5628 = vmatprep.subr.bf16.mxu1 %v5821_v47 }
 0x2ec   : > { %v7818_v34 = vadd.f32 %v5367_v27, %v5303_v2  ;;  %v5449_v51 = vpop.f32.mrb[53].mxu0  ;;  %5597 = vmatpush3.bf16.msra.mxu0 %v5821_v47  ;;  %5636 = vmatpush3.bf16.msra.mxu1 %v5821_v47 }
 0x2ed   : > { %v5450_v13 = vadd.f32 %v5449_v51, %v5448_v30  ;;  %v5451_v54 = vpop.f32.mrb[54].mxu0 }
 0x2ee   : > { %v5452_v63 = vpop.f32.mrb[55].mxu0  ;;  %v5384_v10 = vpop.f32.mrb[32].mxu1 }
 0x2ef   : > { %v5453_v46 = vadd.f32 %v5452_v63, %v5451_v54  ;;  %v5385_v16 = vpop.f32.mrb[33].mxu1  ;;  %v5822_v54 = vld [vmem:[%s8785_s3 + $0x8] sm:$0xff]   ;;  %v5823_v63 = vld [vmem:[%s8785_s3 + $0x10] sm:$0xff]  }
 0x2f0   : > { %v5386_v37 = vadd.f32 %v5385_v16, %v5384_v10  ;;  %v5387_v17 = vpop.f32.mrb[34].mxu1  ;;  %5598 = vmatprep.subr.bf16.mxu0 %v5822_v54  ;;  %5629 = vmatprep.subr.bf16.mxu1 %v5822_v54 }
 0x2f1   : > { %v5388_v4 = vpop.f32.mrb[35].mxu1  ;;  %5599 = vmatpush3.bf16.msra.mxu0 %v5822_v54  ;;  %5637 = vmatpush3.bf16.msra.mxu1 %v5822_v54 }
 0x2f2   : > { %v3501_v28 = vadd.f32 %v5386_v37, %v7788_v61  ;;  %v5389_v41 = vadd.f32 %v5388_v4, %v5387_v17  ;;  %5600 = vmatprep.subr.bf16.mxu0 %v5823_v63  ;;  %5630 = vmatprep.subr.bf16.mxu1 %v5823_v63 }
 0x2f3   : > { %v5454_v7 = vpop.f32.mrb[56].mxu0 }
 0x2f4   : > { %v3504_v56 = vadd.f32 %v5389_v41, %v7790_v8  ;;  %v5455_v0 = vpop.f32.mrb[57].mxu0  ;;  %v7822_v38 = vadd.f32 %v5450_v13, %v3501_v28 }
 0x2f5   : > { %v5456_v32 = vadd.f32 %v5455_v0, %v5454_v7  ;;  %v5457_v12 = vpop.f32.mrb[58].mxu0  ;;  %5601 = vmatpush3.bf16.msra.mxu0 %v5823_v63  ;;  %5638 = vmatpush3.bf16.msra.mxu1 %v5823_v63 }
 0x2f6   : > { %v5458_v45 = vpop.f32.mrb[59].mxu0  ;;  %v7824_v40 = vadd.f32 %v5453_v46, %v3504_v56  ;;  %v5824_v56 = vld [vmem:[%s8785_s3 + $0x18] sm:$0xff]  }
 0x2f7   : > { %v5459_v55 = vadd.f32 %v5458_v45, %v5457_v12  ;;  %5602 = vmatprep.subr.bf16.mxu0 %v5824_v56  ;;  %5631 = vmatprep.subr.bf16.mxu1 %v5824_v56 }
 0x2f9   : > { %5603 = vmatpush3.bf16.msra.mxu0 %v5824_v56  ;;  %5639 = vmatpush3.bf16.msra.mxu1 %v5824_v56 }
 0x2fb   : > { %v5390_v6 = vpop.f32.mrb[36].mxu1  ;;  %v5460_v31 = vpop.f32.mrb[60].mxu0 }
 0x2fc   : > { %v5391_v49 = vpop.f32.mrb[37].mxu1  ;;  %v5461_v22 = vpop.f32.mrb[61].mxu0 }
 0x2fd   : > { %v5392_v21 = vadd.f32 %v5391_v49, %v5390_v6  ;;  %v5393_v62 = vpop.f32.mrb[38].mxu1  ;;  %v5462_v61 = vadd.f32 %v5461_v22, %v5460_v31  ;;  %v5463_v5 = vpop.f32.mrb[62].mxu0 }
 0x2fe   : > { %v5394_v14 = vpop.f32.mrb[39].mxu1  ;;  %v5464_v53 = vpop.f32.mrb[63].mxu0 }
 0x2ff   : > { %v3509_v8 = vadd.f32 %v5392_v21, %v7792_v35  ;;  %v5395_v43 = vadd.f32 %v5394_v14, %v5393_v62  ;;  %v5465_v18 = vadd.f32 %v5464_v53, %v5463_v5 }
 0x301   : > { %v3512_v11 = vadd.f32 %v5395_v43, %v7794_v58  ;;  %v7828_v48 = vadd.f32 %v5456_v32, %v3509_v8 }
 0x303   : > { %v5466_v3 = vpop.f32.mrb[64].mxu0  ;;  %v7830_v25 = vadd.f32 %v5459_v55, %v3512_v11  ;;  %v5825_v55 = vld [vmem:[%s8785_s3 + $0x20] sm:$0xff]   ;;  %v5827_v11 = vld [vmem:[%s8785_s3 + $0x30] sm:$0xff]  }
 0x304   : > { %v5467_v36 = vpop.f32.mrb[65].mxu0  ;;  %5604 = vmatprep.subr.bf16.mxu0 %v5825_v55  ;;  %5632 = vmatprep.subr.bf16.mxu1 %v5825_v55 }
 0x305   : > { %v5396_v19 = vpop.f32.mrb[40].mxu1  ;;  %v5468_v50 = vadd.f32 %v5467_v36, %v5466_v3  ;;  %v5469_v39 = vpop.f32.mrb[66].mxu0  ;;  %5605 = vmatpush3.bf16.msra.mxu0 %v5825_v55  ;;  %5640 = vmatpush3.bf16.msra.mxu1 %v5825_v55 }
 0x306   : > { %v5397_v27 = vpop.f32.mrb[41].mxu1  ;;  %v5470_v52 = vpop.f32.mrb[67].mxu0 }
 0x307   : > { %v5398_v35 = vadd.f32 %v5397_v27, %v5396_v19  ;;  %v5399_v29 = vpop.f32.mrb[42].mxu1  ;;  %v5471_v58 = vadd.f32 %v5470_v52, %v5469_v39  ;;  %v5828_v27 = vld [vmem:[%s8785_s3 + $0x38] sm:$0xff]  }
 0x308   : > { %v5400_v26 = vpop.f32.mrb[43].mxu1 }
 0x309   : > { %v3517_v15 = vadd.f32 %v5398_v35, %v7796_v24  ;;  %v5401_v2 = vadd.f32 %v5400_v26, %v5399_v29 }
 0x30b   : > { %v3520_v30 = vadd.f32 %v5401_v2, %v7798_v23  ;;  %v7837_v51 = vadd.f32 %v5462_v61, %v3517_v15  ;;  %v5472_v13 = vpop.f32.mrb[68].mxu0  ;;  %v5826_v61 = vld [vmem:[%s8785_s3 + $0x28] sm:$0xff]  }
 0x30c   : > { %v5473_v46 = vpop.f32.mrb[69].mxu0  ;;  %5606 = vmatprep.subr.bf16.mxu0 %v5826_v61  ;;  %5633 = vmatprep.subr.bf16.mxu1 %v5826_v61 }
 0x30d   : > { %v5402_v10 = vpop.f32.mrb[44].mxu1  ;;  %v7845_v16 = vadd.f32 %v5465_v18, %v3520_v30  ;;  %v5474_v24 = vadd.f32 %v5473_v46, %v5472_v13  ;;  %v5475_v17 = vpop.f32.mrb[70].mxu0  ;;  %5607 = vmatpush3.bf16.msra.mxu0 %v5826_v61  ;;  %5641 = vmatpush3.bf16.msra.mxu1 %v5826_v61 }
 0x30e   : > { %v5403_v37 = vpop.f32.mrb[45].mxu1  ;;  %v5476_v28 = vpop.f32.mrb[71].mxu0  ;;  %5608 = vmatprep.subr.bf16.mxu0 %v5827_v11  ;;  %5634 = vmatprep.subr.bf16.mxu1 %v5827_v11 }
 0x30f   : > { %v5404_v23 = vadd.f32 %v5403_v37, %v5402_v10  ;;  %v5405_v4 = vpop.f32.mrb[46].mxu1  ;;  %v5477_v7 = vadd.f32 %v5476_v28, %v5475_v17 }
 0x310   : > { %v5406_v41 = vpop.f32.mrb[47].mxu1 }
 0x311   : > { %v3525_v0 = vadd.f32 %v5404_v23, %v7800_v60  ;;  %v5407_v32 = vadd.f32 %v5406_v41, %v5405_v4  ;;  %5609 = vmatpush3.bf16.msra.mxu0 %v5827_v11  ;;  %5642 = vmatpush3.bf16.msra.mxu1 %v5827_v11 }
 0x312   : > { %5610 = vmatprep.subr.bf16.mxu0 %v5828_v27  ;;  %5635 = vmatprep.subr.bf16.mxu1 %v5828_v27 }
 0x313   : > { %v3528_v12 = vadd.f32 %v5407_v32, %v7802_v33  ;;  %v7852_v45 = vadd.f32 %v5468_v50, %v3525_v0 }
 0x314   : > { %v5478_v6 = vpop.f32.mrb[72].mxu0 }
 0x315   : > { %v7857_v31 = vadd.f32 %v5471_v58, %v3528_v12  ;;  %v5479_v49 = vpop.f32.mrb[73].mxu0  ;;  %5611 = vmatpush3.bf16.msra.mxu0 %v5828_v27  ;;  %5643 = vmatpush3.bf16.msra.mxu1 %v5828_v27 }
 0x316   : > { %v5408_v22 = vpop.f32.mrb[48].mxu1  ;;  %v5480_v21 = vadd.f32 %v5479_v49, %v5478_v6  ;;  %v5481_v60 = vpop.f32.mrb[74].mxu0 }
 0x317   : > { %v5409_v33 = vpop.f32.mrb[49].mxu1  ;;  %v5482_v62 = vpop.f32.mrb[75].mxu0 }
 0x318   : > { %v5410_v5 = vadd.f32 %v5409_v33, %v5408_v22  ;;  %v5411_v14 = vpop.f32.mrb[50].mxu1  ;;  %v5483_v53 = vadd.f32 %v5482_v62, %v5481_v60 }
 0x319   : > { %v5412_v8 = vpop.f32.mrb[51].mxu1 }
 0x31a   : > { %v3533_v43 = vadd.f32 %v5410_v5, %v7804_v20  ;;  %v5413_v18 = vadd.f32 %v5412_v8, %v5411_v14 }
 0x31c   : > { %v3536_v3 = vadd.f32 %v5413_v18, %v7806_v1  ;;  %v7867_v36 = vadd.f32 %v5474_v24, %v3533_v43 }
 0x31e   : > { %v5484_v47 = vpop.f32.mrb[76].mxu0  ;;  %v7869_v50 = vadd.f32 %v5477_v7, %v3536_v3 }
 0x31f   : > { %v5485_v19 = vpop.f32.mrb[77].mxu0 }
 0x320   : > { %v5486_v20 = vadd.f32 %v5485_v19, %v5484_v47  ;;  %v5487_v39 = vpop.f32.mrb[78].mxu0  ;;  %v5414_v52 = vpop.f32.mrb[52].mxu1 }
 0x321   : > { %v5488_v35 = vpop.f32.mrb[79].mxu0  ;;  %v5415_v29 = vpop.f32.mrb[53].mxu1 }
 0x322   : > { %v5489_v1 = vadd.f32 %v5488_v35, %v5487_v39  ;;  %v5416_v58 = vadd.f32 %v5415_v29, %v5414_v52  ;;  %v5417_v26 = vpop.f32.mrb[54].mxu1 }
 0x323   : > { %v5418_v15 = vpop.f32.mrb[55].mxu1 }
 0x324   : > { %v3541_v2 = vadd.f32 %v5416_v58, %v7808_v57  ;;  %v5419_v30 = vadd.f32 %v5418_v15, %v5417_v26 }
 0x326   : > { %v3544_v13 = vadd.f32 %v5419_v30, %v7810_v9  ;;  %v7876_v54 = vadd.f32 %v5480_v21, %v3541_v2 }
 0x328   : > { %v5490_v63 = vpop.f32.mrb[80].mxu0  ;;  %v5420_v10 = vpop.f32.mrb[56].mxu1  ;;  %v7878_v37 = vadd.f32 %v5483_v53, %v3544_v13 }
 0x329   : > { %v5491_v46 = vpop.f32.mrb[81].mxu0  ;;  %v5421_v24 = vpop.f32.mrb[57].mxu1 }
 0x32a   : > { %v5492_v17 = vadd.f32 %v5491_v46, %v5490_v63  ;;  %v5493_v23 = vpop.f32.mrb[82].mxu0  ;;  %v5422_v4 = vadd.f32 %v5421_v24, %v5420_v10  ;;  %v5423_v28 = vpop.f32.mrb[58].mxu1 }
 0x32b   : > { %v5494_v41 = vpop.f32.mrb[83].mxu0  ;;  %v5424_v7 = vpop.f32.mrb[59].mxu1 }
 0x32c   : > { %v5495_v57 = vadd.f32 %v5494_v41, %v5493_v23  ;;  %v3549_v56 = vadd.f32 %v5422_v4, %v7812_v44  ;;  %v5425_v9 = vadd.f32 %v5424_v7, %v5423_v28  ;;  %v7893_v44 = vld [vmem:[%s8786_s4 + $0x2] ss:$0 sm:$0xff] }
 0x32e   : > { %v3552_v0 = vadd.f32 %v5425_v9, %v7814_v42  ;;  %v7882_v32 = vadd.f32 %v5486_v20, %v3549_v56 }
 0x330   : > { %v5426_v12 = vpop.f32.mrb[60].mxu1  ;;  %v7884_v55 = vadd.f32 %v5489_v1, %v3552_v0 }
 0x331   : > { %v5427_v6 = vpop.f32.mrb[61].mxu1 }
 0x332   : > { %v5428_v49 = vadd.f32 %v5427_v6, %v5426_v12  ;;  %v5429_v22 = vpop.f32.mrb[62].mxu1 }
 0x333   : > { %v5430_v21 = vpop.f32.mrb[63].mxu1 }
 0x334   : > { %v3557_v60 = vadd.f32 %v5428_v49, %v7816_v59  ;;  %v5431_v33 = vadd.f32 %v5430_v21, %v5429_v22  ;;  %v7901_v59 = vld [vmem:[%s8786_s4 + $0x3] ss:$0 sm:$0xff] }
 0x336   : > { %v3560_v62 = vadd.f32 %v5431_v33, %v7818_v34  ;;  %v7888_v61 = vadd.f32 %v5492_v17, %v3557_v60 }
 0x338   : > { %v5582_v42 = vpop.f32.mrb[64].mxu1  ;;  %v7895_v5 = vadd.f32 %v5495_v57, %v3560_v62 }
 0x339   : > { %v3703_v14 = vadd.f32 %v5582_v42, %v7828_v48  ;;  %v3694_v53 = vpop.f32.mrb[65].mxu1 }
 0x33a   : > { %v3695_v34 = vadd.f32 %v3694_v53, %v7822_v38  ;;  %v5583_v8 = vpop.f32.mrb[66].mxu1 }
 0x33b   : > { %v3763_v43 = vmul.f32 %v7893_v44, %v3703_v14  ;;  %v3706_v18 = vadd.f32 %v5583_v8, %v7830_v25  ;;  %v3697_v11 = vpop.f32.mrb[67].mxu1 }
 0x33c   : > { %v3761_v3 = vmul.f32 %v7893_v44, %v3695_v34  ;;  %v3698_v47 = vadd.f32 %v3697_v11, %v7824_v40 }
 0x33d   : > { %v3783_v48 = vadd.f32 %v7901_v59, %v3763_v43  ;;  %v3764_v19 = vmul.f32 %v7893_v44, %v3706_v18 }
 0x33e   : > { %v7911_v20 = vadd.f32 %v7901_v59, %v3761_v3  ;;  %v3762_v39 = vmul.f32 %v7893_v44, %v3698_v47 }
 0x33f   : > { %v7914_v38 = vmul.f32 0.70710677, %v3783_v48  ;;  %v7917_v27 = vadd.f32 %v7901_v59, %v3764_v19  ;;  %v7969_v47 = vmul.f32 0.5, %v3783_v48 }
 0x340   : > { %v7920_v25 = vmul.f32 0.70710677, %v7911_v20  ;;  %v5586_v52 = vpop.f32.mrb[68].mxu1  ;;  %v7927_v29 = vadd.f32 %v7901_v59, %v3762_v39 }
 0x341   : > { %v3831_v40 = vand.u32 2147483647, %v7914_v38  ;;  %v7924_v35 = vmul.f32 0.70710677, %v7917_v27  ;;  %v3710_v13 = vpop.f32.mrb[69].mxu1  ;;  %v3719_v41 = vadd.f32 %v5586_v52, %v7852_v45  ;;  %vm4135_vm12 = vcmp.ge.f32.partialorder %v7914_v38, 0.0 }
 0x342   : > { %v3829_v26 = vand.u32 2147483647, %v7920_v25  ;;  %v7932_v30 = vmul.f32 0.70710677, %v7927_v29  ;;  %v5587_v10 = vpop.f32.mrb[70].mxu1  ;;  %v3711_v7 = vadd.f32 %v3710_v13, %v7837_v51  ;;  %vm4133_vm9 = vcmp.ge.f32.partialorder %v7920_v25, 0.0 }
 0x343   : > { %v3847_v1 = vmul.f32 0.3275911, %v3831_v40  ;;  %v3832_v58 = vand.u32 2147483647, %v7924_v35  ;;  %v4039_v63 = vsub.f32 0.0, %v3831_v40  ;;  %v3713_v24 = vpop.f32.mrb[71].mxu1  ;;  %v3722_v0 = vadd.f32 %v5587_v10, %v7857_v31 }
 0x344   : > { %v4037_v17 = vsub.f32 0.0, %v3829_v26  ;;  %v3830_v28 = vand.u32 2147483647, %v7932_v30  ;;  %v3845_v9 = vmul.f32 0.3275911, %v3829_v26  ;;  %v3714_v12 = vadd.f32 %v3713_v24, %v7845_v16 }
 0x345   : > { %v3863_v15 = vadd.f32 1.0, %v3847_v1  ;;  %v3848_v2 = vmul.f32 0.3275911, %v3832_v58  ;;  %v4040_v4 = vsub.f32 0.0, %v3832_v58  ;;  %v4055_v56 = vmul.f32 %v4039_v63, %v3831_v40 }
 0x346   : > { %v3767_v49 = vmul.f32 %v7893_v44, %v3719_v41  ;;  %v3765_v22 = vmul.f32 %v7893_v44, %v3711_v7  ;;  %v4053_v45 = vmul.f32 %v4037_v17, %v3829_v26  ;;  %v3768_v51 = vmul.f32 %v7893_v44, %v3722_v0 }
 0x347   : > { %5909 = vrcp.f32 %v3863_v15  ;;  %v3864_v46 = vadd.f32 1.0, %v3848_v2  ;;  %v4056_v62 = vmul.f32 %v4040_v4, %v3832_v58  ;;  %v4038_v31 = vsub.f32 0.0, %v3830_v28 }
 0x348   : > { %v5590_v23 = vpop.f32.mrb[72].mxu1  ;;  %v7949_v16 = vadd.f32 %v7901_v59, %v3767_v49  ;;  %v7952_v42 = vadd.f32 %v7901_v59, %v3765_v22  ;;  %v3861_v14 = vadd.f32 1.0, %v3845_v9  ;;  %v7955_v53 = vadd.f32 %v7901_v59, %v3768_v51 }
 0x349   : > { %v3726_v57 = vpop.f32.mrb[73].mxu1  ;;  %5911 = vrcp.f32 %v3864_v46  ;;  %v3735_v21 = vadd.f32 %v5590_v23, %v7876_v54  ;;  %v3766_v54 = vmul.f32 %v7893_v44, %v3714_v12  ;;  %v4073_v34 = vmul.f32 1.442695, %v4055_v56 }
 0x34a   : > { %v7939_v6 = vpop.f32.mrb[74].mxu1  ;;  %v3727_v33 = vadd.f32 %v3726_v57, %v7867_v36  ;;  %v7959_v8 = vmul.f32 0.70710677, %v7949_v16  ;;  %v7962_v36 = vmul.f32 0.70710677, %v7952_v42  ;;  %v4054_v39 = vmul.f32 %v4038_v31, %v3830_v28 }
 0x34b   : > { %v7944_v60 = vpop.f32.mrb[75].mxu1  ;;  %v4069_v43 = vmul.f32 1.442695, %v4053_v45  ;;  %v3846_v18 = vmul.f32 0.3275911, %v3830_v28  ;;  %5913 = vrcp.f32 %v3861_v14  ;;  %v7975_v58 = vadd.f32 %v7901_v59, %v3766_v54 }
 0x34c   : > { %v7965_v11 = vmul.f32 0.70710677, %v7955_v53  ;;  %v4075_v19 = vmul.f32 1.442695, %v4056_v62  ;;  %v3835_v52 = vand.u32 2147483647, %v7959_v8  ;;  %5915 = vpow2.f32 %v4073_v34 }
 0x34d   : > { %v3833_v15 = vand.u32 2147483647, %v7962_v36  ;;  %v3771_v2 = vmul.f32 %v7893_v44, %v3735_v21  ;;  %5917 = vpow2.f32 %v4069_v43  ;;  %v3862_v13 = vadd.f32 1.0, %v3846_v18 }
 0x34e   : > { %v3836_v1 = vand.u32 2147483647, %v7965_v11  ;;  %v3851_v26 = vmul.f32 0.3275911, %v3835_v52  ;;  %5919 = vpow2.f32 %v4075_v19  ;;  %v4071_v24 = vmul.f32 1.442695, %v4054_v39 }
 0x34f   : > { %v3769_v23 = vmul.f32 %v7893_v44, %v3727_v33  ;;  %v4043_v7 = vsub.f32 0.0, %v3835_v52  ;;  %v7989_v57 = vmul.f32 0.70710677, %v7975_v58  ;;  %v3849_v9 = vmul.f32 0.3275911, %v3833_v15 }
 0x350   : > { %v3852_v63 = vmul.f32 0.3275911, %v3836_v1  ;;  %v7979_v10 = vpop.f32.mrb[76].mxu1  ;;  %v3867_v17 = vadd.f32 1.0, %v3851_v26  ;;  %v7994_v12 = vadd.f32 %v7901_v59, %v3771_v2  ;;  %v4041_v21 = vsub.f32 0.0, %v3833_v15 }
 0x351   : > { %v7967_v3 = vpop.eup %5909  ;;  %v7984_v4 = vpop.f32.mrb[77].mxu1  ;;  %v7997_v45 = vmul.f32 0.5, %v7911_v20  ;;  %v8000_v51 = vmul.f32 0.5, %v7917_v27  ;;  %v4044_v33 = vsub.f32 0.0, %v3836_v1  ;;  %v4059_v54 = vmul.f32 %v4043_v7, %v3835_v52 }
 0x352   : > { %v3895_v40 = vmul.f32 1.0614054, %v7967_v3  ;;  %v7991_v56 = vpop.f32.mrb[78].mxu1  ;;  %5921 = vrcp.f32 %v3867_v17  ;;  %v3868_v0 = vadd.f32 1.0, %v3852_v63  ;;  %v3834_v34 = vand.u32 2147483647, %v7989_v57 }
 0x353   : > { %v7981_v46 = vpop.eup %5911  ;;  %5923 = vrcp.f32 %v3862_v13  ;;  %v8002_v62 = vpop.f32.mrb[79].mxu1  ;;  %v8008_v43 = vmul.f32 0.5, %v7927_v29  ;;  %v8011_v20 = vmul.f32 0.70710677, %v7994_v12  ;;  %v8014_v27 = vadd.f32 %v7901_v59, %v3769_v23 }
 0x354   : > { %v3911_v48 = vadd.f32 -1.4531521, %v3895_v40  ;;  %v3896_v41 = vmul.f32 1.0614054, %v7981_v46  ;;  %5925 = vpow2.f32 %v4071_v24  ;;  %v3865_v40 = vadd.f32 1.0, %v3849_v9 }
 0x355   : > { %5927 = vrcp.f32 %v3868_v0  ;;  %v8016_v18 = vpop.eup %5913  ;;  %v4057_v26 = vmul.f32 %v4041_v21, %v3833_v15  ;;  %v8019_v52 = vmul.f32 0.5, %v7949_v16  ;;  %v8022_v29 = vmul.f32 0.5, %v7952_v42 }
 0x356   : > { %v3927_v28 = vmul.f32 %v7967_v3, %v3911_v48  ;;  %v3912_v22 = vadd.f32 -1.4531521, %v3896_v41  ;;  %v5916_v2 = vpop.eup %5915  ;;  %v8025_v48 = vmul.f32 0.5, %v7955_v53  ;;  %v4060_v13 = vmul.f32 %v4044_v33, %v3836_v1 }
 0x357   : > { %v8027_v63 = vpop.eup %5917  ;;  %v4081_v23 = vmul.f32 1.442695, %v4059_v54  ;;  %v3839_v41 = vand.u32 2147483647, %v8011_v20  ;;  %v8033_v16 = vmul.f32 0.70710677, %v8014_v27  ;;  %v3738_v42 = vadd.f32 %v7939_v6, %v7878_v37 }
 0x358   : > { %v3943_v49 = vadd.f32 1.4214138, %v3927_v28  ;;  %v3928_v14 = vmul.f32 %v7981_v46, %v3912_v22  ;;  %v4042_v28 = vsub.f32 0.0, %v3834_v34  ;;  %v5920_v15 = vpop.eup %5919  ;;  %v3730_v53 = vadd.f32 %v7944_v60, %v7869_v50 }
 0x359   : > { %5929 = vrcp.f32 %v3865_v40  ;;  %v4077_v9 = vmul.f32 1.442695, %v4057_v26  ;;  %v3850_v22 = vmul.f32 0.3275911, %v3834_v34  ;;  %v3772_v21 = vmul.f32 %v7893_v44, %v3738_v42 }
 0x35a   : > { %v3959_v31 = vmul.f32 %v7967_v3, %v3943_v49  ;;  %v3944_v39 = vadd.f32 1.4214138, %v3928_v14  ;;  %v4083_v49 = vmul.f32 1.442695, %v4060_v13  ;;  %v3770_v33 = vmul.f32 %v7893_v44, %v3730_v53 }
 0x35b   : > { %5931 = vpow2.f32 %v4081_v23  ;;  %v4058_v14 = vmul.f32 %v4042_v28, %v3834_v34  ;;  %v4047_v54 = vsub.f32 0.0, %v3839_v41  ;;  %vm4136_vm13 = vcmp.ge.f32.partialorder %v7924_v35, 0.0 }
 0x35c   : > { %v3975_v19 = vadd.f32 -0.28449672, %v3959_v31  ;;  %v3960_v17 = vmul.f32 %v7981_v46, %v3944_v39  ;;  %v8039_v0 = vpop.eup %5921  ;;  %v8053_v39 = vadd.f32 %v7901_v59, %v3772_v21  ;;  %5933 = vpow2.f32 %v4077_v9 }
 0x35d   : > { %v8044_v31 = vpop.eup %5923  ;;  %v3899_v6 = vmul.f32 1.0614054, %v8039_v0  ;;  %5935 = vpow2.f32 %v4083_v49  ;;  %v8059_v23 = vadd.f32 %v7901_v59, %v3770_v33  ;;  %v4079_v53 = vmul.f32 1.442695, %v4058_v14 }
 0x35e   : > { %v3991_v24 = vmul.f32 %v7967_v3, %v3975_v19  ;;  %v3976_v7 = vadd.f32 -0.28449672, %v3960_v17  ;;  %v8049_v60 = vpop.eup %5925  ;;  %v3837_v19 = vand.u32 2147483647, %v8033_v16  ;;  %v3855_v17 = vmul.f32 0.3275911, %v3839_v41 }
 0x35f   : > { %v3915_v13 = vadd.f32 -1.4531521, %v3899_v6  ;;  %v8065_v9 = vmul.f32 0.70710677, %v8053_v39  ;;  %v8068_v33 = vmul.f32 0.5, %v7975_v58  ;;  %v8084_v38 = vmul.f32 0.5, %v8014_v27 }
 0x360   : > { %v4007_v1 = vadd.f32 0.2548296, %v3991_v24  ;;  %v3992_v50 = vmul.f32 %v7981_v46, %v3976_v7  ;;  %v8055_v24 = vpop.eup %5927  ;;  %v4045_v7 = vsub.f32 0.0, %v3837_v19  ;;  %vm4139_vm15 = vcmp.ge.f32.partialorder %v7959_v8, 0.0 }
 0x361   : > { %v3931_v42 = vmul.f32 %v8039_v0, %v3915_v13  ;;  %8815 = vst [vmem:[#allocation6_spill] sm:$0xff] %v8068_v33  ;;  %v3840_v58 = vand.u32 2147483647, %v8065_v9  ;;  %v8081_v33 = vmul.f32 0.5, %v7994_v12  ;;  %vm4140_vm0 = vcmp.ge.f32.partialorder %v7965_v11, 0.0 }
 0x362   : > { %v4023_v37 = vmul.f32 %v7967_v3, %v4007_v1  ;;  %v4008_v26 = vadd.f32 0.2548296, %v3992_v50  ;;  %v3866_v3 = vadd.f32 1.0, %v3850_v22  ;;  %v4063_v1 = vmul.f32 %v4047_v54, %v3839_v41 }
 0x363   : > { %v3947_v22 = vadd.f32 1.4214138, %v3931_v42  ;;  %v3871_v50 = vadd.f32 1.0, %v3855_v17  ;;  %v8073_v6 = vpop.eup %5929  ;;  %v4061_v13 = vmul.f32 %v4045_v7, %v3837_v19  ;;  %v4048_v27 = vsub.f32 0.0, %v3840_v58 }
 0x364   : > { %v4103_v40 = vmul.f32 %v5916_v2, %v4023_v37  ;;  %v4024_v28 = vmul.f32 %v7981_v46, %v4008_v26  ;;  %v3900_v2 = vmul.f32 1.0614054, %v8055_v24  ;;  %5937 = vrcp.f32 %v3866_v3 }
 0x365   : > { %v8071_v46 = vmul.f32 0.70710677, %v8059_v23  ;;  %v3963_v54 = vmul.f32 %v8039_v0, %v3947_v22  ;;  %v3853_v26 = vmul.f32 0.3275911, %v3837_v19  ;;  %v5932_v3 = vpop.eup %5931  ;;  %5939 = vpow2.f32 %v4079_v53 }
 0x366   : > { %v4119_v34 = vsub.f32 1.0, %v4103_v40  ;;  %v4104_v49 = vmul.f32 %v5920_v15, %v4024_v28  ;;  %v3916_v37 = vadd.f32 -1.4531521, %v3900_v2  ;;  %v4089_v40 = vmul.f32 1.442695, %v4063_v1 }
 0x367   : > { %v3979_v28 = vadd.f32 -0.28449672, %v3963_v54  ;;  %5941 = vrcp.f32 %v3871_v50  ;;  %v3869_v12 = vadd.f32 1.0, %v3853_v26  ;;  %v4085_v22 = vmul.f32 1.442695, %v4061_v13 }
 0x368   : > { %v4151_v21 = vsub.f32 0.0, %v4119_v34  ;;  %v4120_v14 = vsub.f32 1.0, %v4104_v49  ;;  %v3932_v15 = vmul.f32 %v8055_v24, %v3916_v37  ;;  %5943 = vpow2.f32 %v4089_v40 }
 0x369   : > { %v3995_v1 = vmul.f32 %v8039_v0, %v3979_v28  ;;  %v3743_v54 = vadd.f32 %v7984_v4, %v7882_v32  ;;  %5945 = vrcp.f32 %v3869_v12  ;;  %vm4134_vm10 = vcmp.ge.f32.partialorder %v7932_v30, 0.0 }
 0x36a   : > { %v4167_v41 = vsel %vm4135_vm12, %v4119_v34, %v4151_v21  ;;  %v4152_v17 = vsub.f32 0.0, %v4120_v14  ;;  %v3948_v42 = vadd.f32 1.4214138, %v3932_v15  ;;  %v8086_v34 = vpop.eup %5933  ;;  %v3838_v21 = vand.u32 2147483647, %v8071_v46 }
 0x36b   : > { %v4183_v2 = vadd.f32 1.0, %v4167_v41  ;;  %v5936_v53 = vpop.eup %5935  ;;  %v4011_v37 = vadd.f32 0.2548296, %v3995_v1  ;;  %v3751_v41 = vadd.f32 %v7979_v10, %v7888_v61  ;;  %v3754_v15 = vadd.f32 %v7991_v56, %v7895_v5 }
 0x36c   : > { %v4168_v19 = vsel %vm4136_vm13, %v4120_v14, %v4152_v17  ;;  %v3964_v7 = vmul.f32 %v8055_v24, %v3948_v42  ;;  %v3854_v13 = vmul.f32 0.3275911, %v3838_v21  ;;  %v4046_v61 = vsub.f32 0.0, %v3838_v21 }
 0x36d   : > { %v4184_v49 = vadd.f32 1.0, %v4168_v19  ;;  %v8096_v35 = vmul.f32 %v4183_v2, %v7969_v47  ;;  %v4027_v40 = vmul.f32 %v8039_v0, %v4011_v37  ;;  %v3773_v17 = vmul.f32 %v7893_v44, %v3743_v54 }
 0x36e   : > { %v3980_v50 = vadd.f32 -0.28449672, %v3964_v7  ;;  %v8108_v10 = vpop.eup %5937  ;;  %v3776_v32 = vmul.f32 %v7893_v44, %v3754_v15  ;;  %v3856_v5 = vmul.f32 0.3275911, %v3840_v58  ;;  %v3746_v56 = vadd.f32 %v8002_v62, %v7884_v55 }
 0x36f   : > { %v8099_v14 = vmul.f32 %v4184_v49, %v8000_v51  ;;  %v3775_v51 = vmul.f32 %v7893_v44, %v3751_v41  ;;  %v4107_v4 = vmul.f32 %v5932_v3, %v4027_v40  ;;  %v4064_v0 = vmul.f32 %v4048_v27, %v3840_v58  ;;  %v8127_v1 = vpop.eup %5939 }
 0x370   : > { %v3996_v26 = vmul.f32 %v8055_v24, %v3980_v50  ;;  %v8122_v2 = vadd.f32 %v7901_v59, %v3773_v17  ;;  %v8125_v19 = vadd.f32 %v7901_v59, %v3776_v32  ;;  %v8131_v49 = vmul.f32 0.5, %v8053_v39 }
 0x371   : > { %v8119_v42 = vadd.f32 %v7901_v59, %v3775_v51  ;;  %v4123_v3 = vsub.f32 1.0, %v4107_v4  ;;  %v3870_v55 = vadd.f32 1.0, %v3854_v13  ;;  %v8133_v62 = vpop.eup %5941  ;;  %v4062_v58 = vmul.f32 %v4046_v61, %v3838_v21 }
 0x372   : > { %v4012_v28 = vadd.f32 0.2548296, %v3996_v26  ;;  %8817 = vst [vmem:[#allocation8_spill] sm:$0xff] %v8125_v19  ;;  %v8139_v50 = vmul.f32 0.70710677, %v8122_v2  ;;  %v3872_v54 = vadd.f32 1.0, %v3856_v5  ;;  %5947 = vpow2.f32 %v4085_v22 }
 0x373   : > { %8816 = vst [vmem:[#allocation7_spill] sm:$0xff] %v8119_v42  ;;  %v8136_v37 = vmul.f32 0.70710677, %v8119_v42  ;;  %v4155_v27 = vsub.f32 0.0, %v4123_v3  ;;  %v8142_v15 = vmul.f32 0.70710677, %v8125_v19  ;;  %5949 = vrcp.f32 %v3870_v55 }
 0x374   : > { %v4028_v7 = vmul.f32 %v8055_v24, %v4012_v28  ;;  %v8144_v24 = vpop.eup %5943  ;;  %v4091_v39 = vmul.f32 1.442695, %v4064_v0  ;;  %v3841_v21 = vand.u32 2147483647, %v8139_v50  ;;  %v3774_v17 = vmul.f32 %v7893_v44, %v3746_v56 }
 0x375   : > { %8818 = vst [vmem:[#allocation9_spill] sm:$0xff] %v8136_v37  ;;  %8819 = vst [vmem:[#allocation10_spill] sm:$0xff] %v8142_v15  ;;  %v3843_v40 = vand.u32 2147483647, %v8136_v37  ;;  %v4171_v12 = vsel %vm4139_vm15, %v4123_v3, %v4155_v27  ;;  %v3844_v13 = vand.u32 2147483647, %v8142_v15  ;;  %5951 = vrcp.f32 %v3872_v54 }
 0x376   : > { %v4108_v41 = vmul.f32 %v5936_v53, %v4028_v7  ;;  %v4087_v53 = vmul.f32 1.442695, %v4062_v58  ;;  %v4187_v32 = vadd.f32 1.0, %v4171_v12  ;;  %v4049_v22 = vsub.f32 0.0, %v3841_v21  ;;  %v8165_v12 = vpop.eup %5945 }
 0x377   : > { %v3859_v61 = vmul.f32 0.3275911, %v3843_v40  ;;  %v4051_v51 = vsub.f32 0.0, %v3843_v40  ;;  %v3893_v28 = vmul.f32 1.0614054, %v8016_v18  ;;  %v8154_v5 = vmul.f32 0.5, %v8059_v23 }
 0x378   : > { %v4124_v26 = vsub.f32 1.0, %v4108_v41  ;;  %v3857_v8 = vmul.f32 0.3275911, %v3841_v21  ;;  %v3860_v0 = vmul.f32 0.3275911, %v3844_v13  ;;  %5953 = vpow2.f32 %v4091_v39 }
 0x379   : > { %v4052_v7 = vsub.f32 0.0, %v3844_v13  ;;  %v3894_v55 = vmul.f32 1.0614054, %v8044_v31  ;;  %v3875_v44 = vadd.f32 1.0, %v3859_v61  ;;  %v4067_v56 = vmul.f32 %v4051_v51, %v3843_v40 }
 0x37a   : > { %v4156_v4 = vsub.f32 0.0, %v4124_v26  ;;  %v8160_v27 = vadd.f32 %v7901_v59, %v3774_v17  ;;  %v8163_v41 = vmul.f32 %v4187_v32, %v8019_v52  ;;  %5955 = vpow2.f32 %v4087_v53 }
 0x37b   : > { %v4065_v23 = vmul.f32 %v4049_v22, %v3841_v21  ;;  %v3909_v54 = vadd.f32 -1.4531521, %v3893_v28  ;;  %v3873_v39 = vadd.f32 1.0, %v3857_v8  ;;  %v4068_v40 = vmul.f32 %v4052_v7, %v3844_v13 }
 0x37c   : > { %v4172_v3 = vsel %vm4140_vm0, %v4124_v26, %v4156_v4  ;;  %v3876_v26 = vadd.f32 1.0, %v3860_v0  ;;  %v8171_v4 = vmul.f32 0.70710677, %v8160_v27  ;;  %v3910_v61 = vadd.f32 -1.4531521, %v3894_v55  ;;  %v8175_v51 = vpop.eup %5947 }
 0x37d   : > { %v4188_v58 = vadd.f32 1.0, %v4172_v3  ;;  %v3925_v59 = vmul.f32 %v8016_v18, %v3909_v54  ;;  %v3897_v52 = vmul.f32 1.0614054, %v8073_v6  ;;  %5957 = vrcp.f32 %v3875_v44  ;;  %v8182_v17 = vpop.eup %5949 }
 0x37e   : > { %v8179_v53 = vmul.f32 1.442695, %v4067_v56  ;;  %v8184_v32 = vmul.f32 1.442695, %v4065_v23  ;;  %v3926_v13 = vmul.f32 %v8044_v31, %v3910_v61  ;;  %v3898_v28 = vmul.f32 1.0614054, %v8108_v10 }
 0x37f   : > { %v8168_v11 = vmul.f32 %v4188_v58, %v8025_v48  ;;  %v3842_v48 = vand.u32 2147483647, %v8171_v4  ;;  %v3941_v22 = vadd.f32 1.4214138, %v3925_v59  ;;  %5959 = vrcp.f32 %v3873_v39  ;;  %v8190_v56 = vpop.eup %5951 }
 0x380   : > { %v3913_v3 = vadd.f32 -1.4531521, %v3897_v52  ;;  %v3942_v7 = vadd.f32 1.4214138, %v3926_v13  ;;  %v3914_v58 = vadd.f32 -1.4531521, %v3898_v28  ;;  %5961 = vrcp.f32 %v3876_v26 }
 0x381   : > { %v3858_v8 = vmul.f32 0.3275911, %v3842_v48  ;;  %v4050_v0 = vsub.f32 0.0, %v3842_v48  ;;  %v3957_v55 = vmul.f32 %v8016_v18, %v3941_v22  ;;  %v3901_v44 = vmul.f32 1.0614054, %v8165_v12 }
 0x382   : > { %v8192_v54 = vmul.f32 1.442695, %v4068_v40  ;;  %v3929_v61 = vmul.f32 %v8073_v6, %v3913_v3  ;;  %v3902_v59 = vmul.f32 1.0614054, %v8182_v17  ;;  %v8196_v21 = vpop.eup %5953  ;;  %v3958_v39 = vmul.f32 %v8044_v31, %v3942_v7 }
 0x383   : > { %v4066_v23 = vmul.f32 %v4050_v0, %v3842_v48  ;;  %v3973_v52 = vadd.f32 -0.28449672, %v3957_v55  ;;  %v3930_v13 = vmul.f32 %v8108_v10, %v3914_v58  ;;  %v3917_v22 = vadd.f32 -1.4531521, %v3901_v44 }
 0x384   : > { %v3874_v28 = vadd.f32 1.0, %v3858_v8  ;;  %v3945_v47 = vadd.f32 1.4214138, %v3929_v61  ;;  %v3918_v19 = vadd.f32 -1.4531521, %v3902_v59  ;;  %v8200_v42 = vpop.eup %5955  ;;  %vm4137_vm11 = vcmp.ge.f32.partialorder %v7962_v36, 0.0 }
 0x385   : > { %v3974_v40 = vadd.f32 -0.28449672, %v3958_v39  ;;  %v3989_v48 = vmul.f32 %v8016_v18, %v3973_v52  ;;  %v3946_v0 = vadd.f32 1.4214138, %v3930_v13  ;;  %v3933_v3 = vmul.f32 %v8165_v12, %v3917_v22 }
 0x386   : > { %v8204_v15 = vmul.f32 1.442695, %v4066_v23  ;;  %v3961_v7 = vmul.f32 %v8073_v6, %v3945_v47  ;;  %v3934_v55 = vmul.f32 %v8182_v17, %v3918_v19  ;;  %v3903_v58 = vmul.f32 1.0614054, %v8133_v62 }
 0x387   : > { %v3990_v26 = vmul.f32 %v8044_v31, %v3974_v40  ;;  %v4005_v8 = vadd.f32 0.2548296, %v3989_v48  ;;  %v3962_v44 = vmul.f32 %v8108_v10, %v3946_v0  ;;  %v3949_v61 = vadd.f32 1.4214138, %v3933_v3  ;;  %v8211_v59 = vpop.eup %5957 }
 0x388   : > { %5963 = vrcp.f32 %v3874_v28  ;;  %v3977_v39 = vadd.f32 -0.28449672, %v3961_v7  ;;  %v3950_v23 = vadd.f32 1.4214138, %v3934_v55  ;;  %v3904_v52 = vmul.f32 1.0614054, %v8190_v56 }
 0x389   : > { %v4006_v47 = vadd.f32 0.2548296, %v3990_v26  ;;  %v4021_v19 = vmul.f32 %v8016_v18, %v4005_v8  ;;  %v3978_v13 = vadd.f32 -0.28449672, %v3962_v44  ;;  %v3965_v22 = vmul.f32 %v8165_v12, %v3949_v61  ;;  %v8217_v40 = vpop.eup %5959 }
 0x38a   : > { %v3993_v48 = vmul.f32 %v8073_v6, %v3977_v39  ;;  %v3966_v0 = vmul.f32 %v8182_v17, %v3950_v23  ;;  %v3919_v3 = vadd.f32 -1.4531521, %v3903_v58  ;;  %v3920_v28 = vadd.f32 -1.4531521, %v3904_v52 }
 0x38b   : > { %v4022_v7 = vmul.f32 %v8044_v31, %v4006_v47  ;;  %v4101_v55 = vmul.f32 %v8027_v63, %v4021_v19  ;;  %v3994_v26 = vmul.f32 %v8108_v10, %v3978_v13  ;;  %v3981_v18 = vadd.f32 -0.28449672, %v3965_v22  ;;  %v8230_v31 = vpop.eup %5961 }
 0x38c   : > { %v4009_v8 = vadd.f32 0.2548296, %v3993_v48  ;;  %v3982_v44 = vadd.f32 -0.28449672, %v3966_v0  ;;  %v3935_v61 = vmul.f32 %v8133_v62, %v3919_v3  ;;  %v3936_v37 = vmul.f32 %v8190_v56, %v3920_v28 }
 0x38d   : > { %v4102_v39 = vmul.f32 %v8049_v60, %v4022_v7  ;;  %v4117_v23 = vsub.f32 1.0, %v4101_v55  ;;  %v4010_v58 = vadd.f32 0.2548296, %v3994_v26  ;;  %v3997_v52 = vmul.f32 %v8165_v12, %v3981_v18 }
 0x38e   : > { %vm4138_vm14 = vcmp.ge.f32.partialorder %v7989_v57, 0.0  ;;  %v4025_v63 = vmul.f32 %v8073_v6, %v4009_v8  ;;  %v3998_v47 = vmul.f32 %v8182_v17, %v3982_v44  ;;  %v3951_v19 = vadd.f32 1.4214138, %v3935_v61  ;;  %v8820_v57 = vld [vmem:[#allocation6_spill] sm:$0xff] }
 0x38f   : > { %v3952_v13 = vadd.f32 1.4214138, %v3936_v37  ;;  %v4118_v22 = vsub.f32 1.0, %v4102_v39  ;;  %v4149_v48 = vsub.f32 0.0, %v4117_v23  ;;  %v4026_v0 = vmul.f32 %v8108_v10, %v4010_v58 }
 0x390   : > { %v4013_v3 = vadd.f32 0.2548296, %v3997_v52  ;;  %vm4141_vm1 = vcmp.ge.f32.partialorder %v8033_v16, 0.0  ;;  %v4105_v60 = vmul.f32 %v8086_v34, %v4025_v63  ;;  %v4014_v28 = vadd.f32 0.2548296, %v3998_v47 }
 0x391   : > { %v3967_v7 = vmul.f32 %v8133_v62, %v3951_v19  ;;  %v3968_v55 = vmul.f32 %v8190_v56, %v3952_v13  ;;  %vm4142_vm2 = vcmp.ge.f32.partialorder %v8071_v46, 0.0  ;;  %v4150_v6 = vsub.f32 0.0, %v4118_v22 }
 0x392   : > { %v4165_v37 = vsel %vm4133_vm9, %v4117_v23, %v4149_v48  ;;  %v4106_v26 = vmul.f32 %v8127_v1, %v4026_v0  ;;  %v4029_v10 = vmul.f32 %v8165_v12, %v4013_v3  ;;  %v8245_v18 = vpop.eup %5963  ;;  %v4121_v44 = vsub.f32 1.0, %v4105_v60 }
 0x393   : > { %v4181_v8 = vadd.f32 1.0, %v4165_v37  ;;  %v4030_v34 = vmul.f32 %v8182_v17, %v4014_v28  ;;  %v3983_v61 = vadd.f32 -0.28449672, %v3967_v7  ;;  %v4166_v39 = vsel %vm4134_vm10, %v4118_v22, %v4150_v6 }
 0x394   : > { %v4122_v58 = vsub.f32 1.0, %v4106_v26  ;;  %v4109_v52 = vmul.f32 %v8175_v51, %v4029_v10  ;;  %v3984_v63 = vadd.f32 -0.28449672, %v3968_v55  ;;  %v4182_v25 = vadd.f32 1.0, %v4166_v39 }
 0x395   : > { %v4197_v23 = vmul.f32 %v4181_v8, %v7997_v45  ;;  %v4153_v1 = vsub.f32 0.0, %v4121_v44  ;;  %v4110_v12 = vmul.f32 %v8200_v42, %v4030_v34  ;;  %v3999_v13 = vmul.f32 %v8133_v62, %v3983_v61 }
 0x396   : > { %v4154_v47 = vsub.f32 0.0, %v4122_v58  ;;  %v4125_v19 = vsub.f32 1.0, %v4109_v52  ;;  %v4000_v17 = vmul.f32 %v8190_v56, %v3984_v63  ;;  %v4198_v48 = vmul.f32 %v4182_v25, %v8008_v43 }
 0x397   : > { %v4169_v30 = vsel %vm4137_vm11, %v4121_v44, %v4153_v1  ;;  %v4126_v22 = vsub.f32 1.0, %v4110_v12  ;;  %v3905_v51 = vmul.f32 1.0614054, %v8217_v40  ;;  %v4015_v42 = vadd.f32 0.2548296, %v3999_v13 }
 0x398   : > { %v4170_v45 = vsel %vm4138_vm14, %v4122_v58, %v4154_v47  ;;  %v4185_v0 = vadd.f32 1.0, %v4169_v30  ;;  %v4157_v3 = vsub.f32 0.0, %v4125_v19  ;;  %vm4143_vm3 = vcmp.ge.f32.partialorder %v8011_v20, 0.0 }
 0x399   : > { %v4213_v60 = vpack.c.bf16 %v4198_v48, %v4197_v23  ;;  %v4186_v28 = vadd.f32 1.0, %v4170_v45  ;;  %v4158_v7 = vsub.f32 0.0, %v4126_v22  ;;  %v4016_v55 = vadd.f32 0.2548296, %v4000_v17 }
 0x39a   : > { %v4201_v43 = vmul.f32 %v4185_v0, %v8022_v29  ;;  %v4173_v36 = vsel %vm4141_vm1, %v4125_v19, %v4157_v3  ;;  %v4031_v6 = vmul.f32 %v8133_v62, %v4015_v42  ;;  %v3906_v37 = vmul.f32 1.0614054, %v8245_v18 }
 0x39b   : > { %5612 = vmatprep.mubr.bf16.mxu0 %v4213_v60  ;;  %v4202_v26 = vmul.f32 %v4186_v28, %v8820_v57  ;;  %v4174_v10 = vsel %vm4142_vm2, %v4126_v22, %v4158_v7  ;;  %v4189_v8 = vadd.f32 1.0, %v4173_v36  ;;  %v4032_v44 = vmul.f32 %v8190_v56, %v4016_v55 }
 0x39c   : > { %v8821_v34 = vpack.c.bf16 %v8099_v14, %v8096_v35  ;;  %v4190_v29 = vadd.f32 1.0, %v4174_v10  ;;  %v4111_v16 = vmul.f32 %v8144_v24, %v4031_v6  ;;  %v3921_v61 = vadd.f32 -1.4531521, %v3905_v51 }
 0x39d   : > { %v3922_v62 = vadd.f32 -1.4531521, %v3906_v37  ;;  %v4215_v39 = vpack.c.bf16 %v4202_v26, %v4201_v43  ;;  %v4205_v58 = vmul.f32 %v4189_v8, %v8084_v38  ;;  %v4112_v52 = vmul.f32 %v8196_v21, %v4032_v44 }
 0x39e   : > { %5613 = vmatmul.mubr.bf16.vlgmr.msra.gmra.mrb[84].mxu0 %v8821_v34  ;;  %v3907_v46 = vmul.f32 1.0614054, %v8211_v59  ;;  %v4206_v63 = vmul.f32 %v4190_v29, %v8154_v5  ;;  %v4127_v25 = vsub.f32 1.0, %v4111_v16  ;;  %v3937_v56 = vmul.f32 %v8217_v40, %v3921_v61 }
 0x39f   : > { %v3938_v35 = vmul.f32 %v8245_v18, %v3922_v62  ;;  %5965 = vpow2.f32 %v8184_v32  ;;  %5616 = vmatprep.mubr.bf16.mxu1 %v4215_v39  ;;  %v4128_v14 = vsub.f32 1.0, %v4112_v52  ;;  %v3908_v24 = vmul.f32 1.0614054, %v8230_v31 }
 0x3a0   : > { %v3923_v23 = vadd.f32 -1.4531521, %v3907_v46  ;;  %v8822_v38 = vpack.c.bf16 %v8168_v11, %v8163_v41  ;;  %v4217_v21 = vpack.c.bf16 %v4206_v63, %v4205_v58  ;;  %v4159_v1 = vsub.f32 0.0, %v4127_v25 }
 0x3a1   : > { %v3953_v12 = vadd.f32 1.4214138, %v3937_v56  ;;  %v3954_v5 = vadd.f32 1.4214138, %v3938_v35  ;;  %5967 = vpow2.f32 %v8204_v15  ;;  %v4160_v47 = vsub.f32 0.0, %v4128_v14 }
 0x3a2   : > { %5617 = vmatmul.mubr.bf16.vlgmr.msra.gmra.mrb[80].mxu1 %v8822_v38  ;;  %v3924_v19 = vadd.f32 -1.4531521, %v3908_v24  ;;  %v3939_v13 = vmul.f32 %v8211_v59, %v3923_v23  ;;  %vm4144_vm4 = vcmp.ge.f32.partialorder %v8065_v9, 0.0  ;;  %v4175_v32 = vsel %vm4143_vm3, %v4127_v25, %v4159_v1 }
 0x3a3   : > { %5620 = vmatprep.mubr.bf16.mxu1 %v4217_v21  ;;  %v3969_v17 = vmul.f32 %v8217_v40, %v3953_v12  ;;  %v3970_v41 = vmul.f32 %v8245_v18, %v3954_v5  ;;  %v4176_v11 = vsel %vm4144_vm4, %v4128_v14, %v4160_v47  ;;  %v4191_v48 = vadd.f32 1.0, %v4175_v32  ;;  %v8824_v12 = vld [vmem:[#allocation10_spill] sm:$0xff] }
 0x3a4   : > { %v3940_v30 = vmul.f32 %v8230_v31, %v3924_v19  ;;  %v3955_v22 = vadd.f32 1.4214138, %v3939_v13  ;;  %5969 = vpow2.f32 %v8179_v53  ;;  %v4192_v15 = vadd.f32 1.0, %v4176_v11 }
 0x3a5   : > { %v3985_v51 = vadd.f32 -0.28449672, %v3969_v17  ;;  %v3986_v45 = vadd.f32 -0.28449672, %v3970_v41  ;;  %5971 = vpow2.f32 %v8192_v54  ;;  %v4207_v0 = vmul.f32 %v4191_v48, %v8081_v33  ;;  %v8319_v48 = vld [vmem:[%s8786_s4 + $0x4] ss:$0 sm:$0xff] }
 0x3a6   : > { %v3956_v9 = vadd.f32 1.4214138, %v3940_v30  ;;  %v3971_v20 = vmul.f32 %v8211_v59, %v3955_v22  ;;  %v4208_v3 = vmul.f32 %v4192_v15, %v8131_v49  ;;  %vm4145_vm5 = vcmp.ge.f32.partialorder %v8139_v50, 0.0  ;;  %v8324_v30 = vld [vmem:[%s8786_s4 + $0x5] ss:$0 sm:$0xff] }
 0x3a7   : > { %v4001_v42 = vmul.f32 %v8217_v40, %v3985_v51  ;;  %v4002_v60 = vmul.f32 %v8245_v18, %v3986_v45  ;;  %vm4146_vm6 = vcmp.ge.f32.partialorder %v8171_v4, 0.0  ;;  %v3809_v63 = vmul.f32 0.5, %v8122_v2  ;;  %v8825_v2 = vld [vmem:[#allocation7_spill] sm:$0xff] }
 0x3a8   : > { %v3972_v28 = vmul.f32 %v8230_v31, %v3956_v9  ;;  %v3987_v7 = vadd.f32 -0.28449672, %v3971_v20  ;;  %v4218_v53 = vpack.c.bf16 %v4208_v3, %v4207_v0  ;;  %v3810_v25 = vmul.f32 0.5, %v8160_v27  ;;  %v8826_v27 = vld [vmem:[#allocation8_spill] sm:$0xff] }
 0x3a9   : > { %v4017_v55 = vadd.f32 0.2548296, %v4001_v42  ;;  %v4018_v43 = vadd.f32 0.2548296, %v4002_v60  ;;  %v5966_v36 = vpop.eup %5965  ;;  %vm4148_vm8 = vcmp.ge.f32.partialorder %v8824_v12, 0.0  ;;  %v3811_v19 = vmul.f32 0.5, %v8825_v2 }
 0x3aa   : > { %v3988_v6 = vadd.f32 -0.28449672, %v3972_v28  ;;  %v4003_v54 = vmul.f32 %v8211_v59, %v3987_v7  ;;  %5621 = vmatmul.mubr.bf16.gmra.mrb[84].mxu1 %v4218_v53  ;;  %v3812_v13 = vmul.f32 0.5, %v8826_v27  ;;  %v6041_v7 = vld [vmem:[%s6303_s0 + $0x10] sm:$0xff] }
 0x3ab   : > { %v4033_v37 = vmul.f32 %v8217_v40, %v4017_v55  ;;  %v4034_v33 = vmul.f32 %v8245_v18, %v4018_v43  ;;  %v5968_v49 = vpop.eup %5967  ;;  %v6045_v27 = vld [vmem:[%s6303_s0 + $0x30] sm:$0xff] }
 0x3ac   : > { %v4004_v57 = vmul.f32 %v8230_v31, %v3988_v6  ;;  %v4019_v26 = vadd.f32 0.2548296, %v4003_v54 }
 0x3ad   : > { %v4113_v10 = vmul.f32 %v5966_v36, %v4033_v37  ;;  %v4114_v8 = vmul.f32 %v5968_v49, %v4034_v33  ;;  %v6042_v36 = vld [vmem:[%s6303_s0] sm:$0xff]  ;;  %v6043_v49 = vld [vmem:[%s6303_s0 + $0x18] sm:$0xff] }
 0x3ae   : > { %v4020_v44 = vadd.f32 0.2548296, %v4004_v57  ;;  %v4035_v34 = vmul.f32 %v8211_v59, %v4019_v26  ;;  %v5970_v29 = vpop.eup %5969 }
 0x3af   : > { %v4129_v16 = vsub.f32 1.0, %v4113_v10  ;;  %v4130_v61 = vsub.f32 1.0, %v4114_v8  ;;  %v5972_v62 = vpop.eup %5971 }
 0x3b0   : > { %v4036_v39 = vmul.f32 %v8230_v31, %v4020_v44  ;;  %v4115_v58 = vmul.f32 %v5970_v29, %v4035_v34  ;;  %v8823_v31 = vld [vmem:[#allocation9_spill] sm:$0xff]  ;;  %v6044_v44 = vld [vmem:[%s6303_s0 + $0x8] sm:$0xff] }
 0x3b1   : > { %v4161_v52 = vsub.f32 0.0, %v4129_v16  ;;  %v4162_v40 = vsub.f32 0.0, %v4130_v61  ;;  %vm4147_vm7 = vcmp.ge.f32.partialorder %v8823_v31, 0.0 }
 0x3b2   : > { %v4116_v18 = vmul.f32 %v5972_v62, %v4036_v39  ;;  %v4131_v46 = vsub.f32 1.0, %v4115_v58 }
 0x3b3   : > { %v4177_v59 = vsel %vm4145_vm5, %v4129_v16, %v4161_v52  ;;  %v4178_v56 = vsel %vm4146_vm6, %v4130_v61, %v4162_v40 }
 0x3b4   : > { %v4193_v35 = vadd.f32 1.0, %v4177_v59  ;;  %v4194_v14 = vadd.f32 1.0, %v4178_v56  ;;  %v4132_v24 = vsub.f32 1.0, %v4116_v18  ;;  %v4163_v23 = vsub.f32 0.0, %v4131_v46 }
 0x3b6   : > { %v4209_v38 = vmul.f32 %v4193_v35, %v3809_v63  ;;  %v4210_v21 = vmul.f32 %v4194_v14, %v3810_v25  ;;  %v4164_v1 = vsub.f32 0.0, %v4132_v24  ;;  %v4179_v50 = vsel %vm4147_vm7, %v4131_v46, %v4163_v23 }
 0x3b7   : > { %v4195_v4 = vadd.f32 1.0, %v4179_v50 }
 0x3b8   : > { %v4219_v5 = vpack.c.bf16 %v4210_v21, %v4209_v38  ;;  %v4180_v47 = vsel %vm4148_vm8, %v4132_v24, %v4164_v1 }
 0x3b9   : > { %v4196_v32 = vadd.f32 1.0, %v4180_v47  ;;  %v4211_v17 = vmul.f32 %v4195_v4, %v3811_v19 }
 0x3ba   : > { %5624 = vmatprep.mubr.bf16.mxu1 %v4219_v5 }
 0x3bb   : > { %v4212_v41 = vmul.f32 %v4196_v32, %v3812_v13  ;;  %v6046_v32 = vld [vmem:[%s6303_s0 + $0x20] sm:$0xff] }
 0x3bd   : > { %v4220_v11 = vpack.c.bf16 %v4212_v41, %v4211_v17 }
 0x3bf   : > { %5625 = vmatmul.mubr.bf16.gmra.mrb[88].mxu1 %v4220_v11 }
 0x471   : > { %v5614_v22 = vpop.f32.mrb[84].mxu0 }
 0x472   : > { %v4388_v15 = vmul.f32 %v5614_v22, %v8319_v48  ;;  %v4319_v51 = vpop.f32.mrb[85].mxu0 }
 0x473   : > { %v4386_v45 = vmul.f32 %v8319_v48, %v4319_v51  ;;  %v5615_v9 = vpop.f32.mrb[86].mxu0 }
 0x474   : > { %v4408_v20 = vadd.f32 %v8324_v30, %v4388_v15  ;;  %v4389_v0 = vmul.f32 %v5615_v9, %v8319_v48  ;;  %v4322_v3 = vpop.f32.mrb[87].mxu0 }
 0x475   : > { %v4406_v42 = vadd.f32 %v8324_v30, %v4386_v45  ;;  %v4387_v60 = vmul.f32 %v8319_v48, %v4322_v3  ;;  %v5618_v28 = vpop.f32.mrb[80].mxu1 }
 0x476   : > { %v4424_v53 = vadd.f32 %v6041_v7, %v4408_v20  ;;  %v4409_v55 = vadd.f32 %v8324_v30, %v4389_v0  ;;  %v4335_v43 = vpop.f32.mrb[81].mxu1  ;;  %v4392_v26 = vmul.f32 %v5618_v28, %v8319_v48 }
 0x477   : > { %v4422_v6 = vadd.f32 %v6042_v36, %v4406_v42  ;;  %v4407_v54 = vadd.f32 %v8324_v30, %v4387_v60  ;;  %v5619_v37 = vpop.f32.mrb[82].mxu1  ;;  %v4390_v29 = vmul.f32 %v8319_v48, %v4335_v43 }
 0x478   : > { %v8336_v33 = vmul.f32 0.70710677, %v4424_v53  ;;  %v4425_v57 = vadd.f32 %v6043_v49, %v4409_v55  ;;  %v4338_v10 = vpop.f32.mrb[83].mxu1  ;;  %v4412_v18 = vadd.f32 %v8324_v30, %v4392_v26  ;;  %v4393_v22 = vmul.f32 %v5619_v37, %v8319_v48  ;;  %v6047_v55 = vld [vmem:[%s6303_s0 + $0x38] sm:$0xff]  ;;  %v6048_v37 = vld [vmem:[%s6303_s0 + $0x28] sm:$0xff] }
 0x479   : > { %v8340_v8 = vmul.f32 0.70710677, %v4422_v6  ;;  %v8343_v34 = vadd.f32 %v6044_v44, %v4407_v54  ;;  %v4410_v59 = vadd.f32 %v8324_v30, %v4390_v29  ;;  %v4391_v15 = vmul.f32 %v8319_v48, %v4338_v10 }
 0x47a   : > { %v4472_v16 = vand.u32 2147483647, %v8336_v33  ;;  %v8347_v61 = vmul.f32 0.70710677, %v4425_v57  ;;  %v4428_v13 = vadd.f32 %v6045_v27, %v4412_v18  ;;  %v8369_v51 = vmul.f32 0.5, %v4424_v53 }
 0x47b   : > { %v4470_v62 = vand.u32 2147483647, %v8340_v8  ;;  %v8351_v39 = vmul.f32 0.70710677, %v8343_v34  ;;  %v8363_v17 = vadd.f32 %v6046_v32, %v4410_v59  ;;  %v4413_v0 = vadd.f32 %v8324_v30, %v4393_v22 }
 0x47c   : > { %v4488_v58 = vmul.f32 0.3275911, %v4472_v16  ;;  %v4680_v52 = vsub.f32 0.0, %v4472_v16  ;;  %v4473_v40 = vand.u32 2147483647, %v8347_v61  ;;  %v4411_v3 = vadd.f32 %v8324_v30, %v4391_v15 }
 0x47d   : > { %v4486_v46 = vmul.f32 0.3275911, %v4470_v62  ;;  %v4678_v63 = vsub.f32 0.0, %v4470_v62  ;;  %v4471_v25 = vand.u32 2147483647, %v8351_v39  ;;  %v5622_v1 = vpop.f32.mrb[84].mxu1  ;;  %v8385_v43 = vadd.f32 %v6047_v55, %v4413_v0 }
 0x47e   : > { %v4504_v56 = vadd.f32 1.0, %v4488_v58  ;;  %v4696_v35 = vmul.f32 %v4680_v52, %v4472_v16  ;;  %v4489_v14 = vmul.f32 0.3275911, %v4473_v40  ;;  %v4681_v24 = vsub.f32 0.0, %v4473_v40  ;;  %v8357_v4 = vpop.f32.mrb[85].mxu1 }
 0x47f   : > { %v4502_v23 = vadd.f32 1.0, %v4486_v46  ;;  %v4694_v31 = vmul.f32 %v4678_v63, %v4470_v62  ;;  %v4487_v38 = vmul.f32 0.3275911, %v4471_v25  ;;  %v4679_v21 = vsub.f32 0.0, %v4471_v25  ;;  %v8359_v47 = vpop.f32.mrb[86].mxu1 }
 0x480   : > { %5973 = vrcp.f32 %v4504_v56  ;;  %v4505_v50 = vadd.f32 1.0, %v4489_v14  ;;  %v4697_v12 = vmul.f32 %v4681_v24, %v4473_v40  ;;  %v4714_v5 = vmul.f32 1.442695, %v4696_v35  ;;  %v8365_v41 = vpop.f32.mrb[87].mxu1 }
 0x481   : > { %5975 = vrcp.f32 %v4502_v23  ;;  %v4503_v2 = vadd.f32 1.0, %v4487_v38  ;;  %v4695_v19 = vmul.f32 %v4679_v21, %v4471_v25  ;;  %v4710_v11 = vmul.f32 1.442695, %v4694_v31 }
 0x482   : > { %5977 = vrcp.f32 %v4505_v50  ;;  %v4716_v45 = vmul.f32 1.442695, %v4697_v12  ;;  %v8371_v9 = vmul.f32 0.70710677, %v4428_v13  ;;  %v8374_v20 = vmul.f32 0.70710677, %v8363_v17 }
 0x483   : > { %5979 = vpow2.f32 %v4714_v5  ;;  %v8378_v42 = vmul.f32 0.5, %v4422_v6  ;;  %v4712_v60 = vmul.f32 1.442695, %v4695_v19  ;;  %v8381_v7 = vmul.f32 0.5, %v4425_v57 }
 0x484   : > { %5981 = vrcp.f32 %v4503_v2  ;;  %v4476_v28 = vand.u32 2147483647, %v8371_v9  ;;  %v4474_v53 = vand.u32 2147483647, %v8374_v20  ;;  %v8388_v49 = vadd.f32 %v6048_v37, %v4411_v3 }
 0x485   : > { %5983 = vpow2.f32 %v4710_v11  ;;  %v8391_v10 = vmul.f32 0.70710677, %v8385_v43  ;;  %v4396_v44 = vmul.f32 %v5622_v1, %v8319_v48  ;;  %v8405_v25 = vmul.f32 0.5, %v8343_v34 }
 0x486   : > { %5985 = vpow2.f32 %v4716_v45  ;;  %v4492_v36 = vmul.f32 0.3275911, %v4476_v28  ;;  %v4684_v54 = vsub.f32 0.0, %v4476_v28  ;;  %v4490_v6 = vmul.f32 0.3275911, %v4474_v53 }
 0x487   : > { %v4682_v26 = vsub.f32 0.0, %v4474_v53  ;;  %5987 = vpow2.f32 %v4712_v60  ;;  %v8397_v62 = vmul.f32 0.70710677, %v8388_v49  ;;  %v4477_v46 = vand.u32 2147483647, %v8391_v10 }
 0x488   : > { %v4508_v29 = vadd.f32 1.0, %v4492_v36  ;;  %v4700_v16 = vmul.f32 %v4684_v54, %v4476_v28  ;;  %v4506_v40 = vadd.f32 1.0, %v4490_v6  ;;  %v8407_v59 = vmul.f32 0.5, %v4428_v13 }
 0x489   : > { %v4698_v18 = vmul.f32 %v4682_v26, %v4474_v53  ;;  %v4493_v14 = vmul.f32 0.3275911, %v4477_v46  ;;  %v4685_v31 = vsub.f32 0.0, %v4477_v46  ;;  %v4475_v38 = vand.u32 2147483647, %v8397_v62 }
 0x48a   : > { %v8394_v57 = vpop.eup %5973  ;;  %5989 = vrcp.f32 %v4508_v29  ;;  %v4722_v35 = vmul.f32 1.442695, %v4700_v16  ;;  %v4416_v21 = vadd.f32 %v8324_v30, %v4396_v44  ;;  %v6049_v29 = vld [vmem:[%s6303_s0 + $0x50] sm:$0xff]  ;;  %vm4776_vm12 = vcmp.ge.f32.partialorder %v8336_v33, 0.0 }
 0x48b   : > { %v8399_v58 = vpop.eup %5975  ;;  %v4536_v52 = vmul.f32 1.0614054, %v8394_v57  ;;  %5991 = vrcp.f32 %v4506_v40  ;;  %v4718_v12 = vmul.f32 1.442695, %v4698_v18  ;;  %v4509_v5 = vadd.f32 1.0, %v4493_v14 }
 0x48c   : > { %v4534_v63 = vmul.f32 1.0614054, %v8399_v58  ;;  %v8409_v24 = vpop.eup %5977  ;;  %v4701_v27 = vmul.f32 %v4685_v31, %v4477_v46  ;;  %v4491_v13 = vmul.f32 0.3275911, %v4475_v38  ;;  %v4683_v32 = vsub.f32 0.0, %v4475_v38 }
 0x48d   : > { %v4552_v56 = vadd.f32 -1.4531521, %v4536_v52  ;;  %v8413_v1 = vpop.eup %5979  ;;  %v4537_v50 = vmul.f32 1.0614054, %v8409_v24  ;;  %5993 = vrcp.f32 %v4509_v5  ;;  %v8433_v16 = vadd.f32 %v6049_v29, %v4416_v21 }
 0x48e   : > { %v4550_v23 = vadd.f32 -1.4531521, %v4534_v63  ;;  %v8417_v2 = vpop.eup %5981  ;;  %v4724_v60 = vmul.f32 1.442695, %v4701_v27  ;;  %v4507_v28 = vadd.f32 1.0, %v4491_v13  ;;  %v4699_v53 = vmul.f32 %v4683_v32, %v4475_v38 }
 0x48f   : > { %v4568_v34 = vmul.f32 %v8394_v57, %v4552_v56  ;;  %v8420_v11 = vpop.eup %5983  ;;  %v4553_v15 = vadd.f32 -1.4531521, %v4537_v50  ;;  %v4535_v45 = vmul.f32 1.0614054, %v8417_v2  ;;  %5995 = vpow2.f32 %v4722_v35 }
 0x490   : > { %v4566_v19 = vmul.f32 %v8399_v58, %v4550_v23  ;;  %v8423_v0 = vpop.eup %5985  ;;  %5997 = vpow2.f32 %v4718_v12  ;;  %v4720_v44 = vmul.f32 1.442695, %v4699_v53  ;;  %v8443_v14 = vmul.f32 0.5, %v8363_v17 }
 0x491   : > { %v4584_v22 = vadd.f32 1.4214138, %v4568_v34  ;;  %v4569_v36 = vmul.f32 %v8409_v24, %v4553_v15  ;;  %v4551_v54 = vadd.f32 -1.4531521, %v4535_v45  ;;  %v8429_v6 = vpop.eup %5987  ;;  %5999 = vrcp.f32 %v4507_v28 }
 0x492   : > { %v4582_v3 = vadd.f32 1.4214138, %v4566_v19  ;;  %v8427_v37 = vpop.f32.mrb[88].mxu1  ;;  %6001 = vpow2.f32 %v4724_v60  ;;  %v8446_v23 = vmul.f32 0.70710677, %v8433_v16  ;;  %v8465_v60 = vmul.f32 %v8319_v48, %v8357_v4 }
 0x493   : > { %v4600_v55 = vmul.f32 %v8394_v57, %v4584_v22  ;;  %v8435_v52 = vpop.f32.mrb[89].mxu1  ;;  %v4585_v18 = vadd.f32 1.4214138, %v4569_v36  ;;  %v4567_v46 = vmul.f32 %v8417_v2, %v4551_v54  ;;  %6003 = vpow2.f32 %v4720_v44 }
 0x494   : > { %v4598_v26 = vmul.f32 %v8399_v58, %v4582_v3  ;;  %v8438_v63 = vpop.f32.mrb[90].mxu1  ;;  %v8440_v56 = vpop.eup %5989  ;;  %v8458_v19 = vand.u32 2147483647, %v8446_v23  ;;  %vm4774_vm13 = vcmp.ge.f32.partialorder %v8340_v8, 0.0  ;;  %vm4777_vm15 = vcmp.ge.f32.partialorder %v8347_v61, 0.0 }
 0x495   : > { %v4616_v40 = vadd.f32 -0.28449672, %v4600_v55  ;;  %v8448_v31 = vpop.f32.mrb[91].mxu1  ;;  %v8450_v38 = vpop.eup %5991  ;;  %v4601_v34 = vmul.f32 %v8409_v24, %v4585_v18  ;;  %v4583_v50 = vadd.f32 1.4214138, %v4567_v46  ;;  %vm4775_vm0 = vcmp.ge.f32.partialorder %v8351_v39, 0.0 }
 0x496   : > { %v4614_v35 = vadd.f32 -0.28449672, %v4598_v26  ;;  %v4540_v12 = vmul.f32 1.0614054, %v8440_v56  ;;  %v4538_v17 = vmul.f32 1.0614054, %v8450_v38  ;;  %v4414_v39 = vadd.f32 %v8324_v30, %v8465_v60 }
 0x497   : > { %v4632_v21 = vmul.f32 %v8394_v57, %v4616_v40  ;;  %v4617_v13 = vadd.f32 -0.28449672, %v4601_v34  ;;  %v4599_v32 = vmul.f32 %v8417_v2, %v4583_v50  ;;  %v4496_v3 = vmul.f32 0.3275911, %v8458_v19  ;;  %v8467_v28 = vpop.eup %5993 }
 0x498   : > { %v4630_v5 = vmul.f32 %v8399_v58, %v4614_v35  ;;  %v4556_v22 = vadd.f32 -1.4531521, %v4540_v12  ;;  %v4554_v45 = vadd.f32 -1.4531521, %v4538_v17  ;;  %v4541_v29 = vmul.f32 1.0614054, %v8467_v28 }
 0x499   : > { %v4648_v27 = vadd.f32 0.2548296, %v4632_v21  ;;  %v4633_v55 = vmul.f32 %v8409_v24, %v4617_v13  ;;  %v4615_v36 = vadd.f32 -0.28449672, %v4599_v32  ;;  %v4512_v4 = vadd.f32 1.0, %v4496_v3  ;;  %v8476_v40 = vpop.eup %5995 }
 0x49a   : > { %v4646_v15 = vadd.f32 0.2548296, %v4630_v5  ;;  %v4572_v54 = vmul.f32 %v8440_v56, %v4556_v22  ;;  %v4570_v44 = vmul.f32 %v8450_v38, %v4554_v45  ;;  %v8480_v21 = vpop.eup %5997  ;;  %v4557_v50 = vadd.f32 -1.4531521, %v4541_v29 }
 0x49b   : > { %v4664_v53 = vmul.f32 %v8394_v57, %v4648_v27  ;;  %v4649_v46 = vadd.f32 0.2548296, %v4633_v55  ;;  %v4631_v57 = vmul.f32 %v8417_v2, %v4615_v36  ;;  %6005 = vrcp.f32 %v4512_v4  ;;  %v8485_v12 = vpop.eup %5999 }
 0x49c   : > { %v4662_v26 = vmul.f32 %v8399_v58, %v4646_v15  ;;  %v4588_v35 = vadd.f32 1.4214138, %v4572_v54  ;;  %v4586_v58 = vadd.f32 1.4214138, %v4570_v44  ;;  %v8489_v13 = vpop.eup %6001  ;;  %v4573_v22 = vmul.f32 %v8467_v28, %v4557_v50 }
 0x49d   : > { %v4744_v18 = vmul.f32 %v8413_v1, %v4664_v53  ;;  %v4665_v1 = vmul.f32 %v8409_v24, %v4649_v46  ;;  %v4647_v17 = vadd.f32 0.2548296, %v4631_v57  ;;  %v4539_v15 = vmul.f32 1.0614054, %v8485_v12  ;;  %v8501_v55 = vpop.eup %6003 }
 0x49e   : > { %v4742_v34 = vmul.f32 %v8420_v11, %v4662_v26  ;;  %v4604_v27 = vmul.f32 %v8440_v56, %v4588_v35  ;;  %v4602_v11 = vmul.f32 %v8450_v38, %v4586_v58  ;;  %v4589_v26 = vadd.f32 1.4214138, %v4573_v22 }
 0x49f   : > { %v4760_v5 = vsub.f32 1.0, %v4744_v18  ;;  %v4745_v24 = vmul.f32 %v8423_v0, %v4665_v1  ;;  %v4663_v3 = vmul.f32 %v8417_v2, %v4647_v17  ;;  %v4688_v44 = vsub.f32 0.0, %v8458_v19 }
 0x4a0   : > { %v4758_v32 = vsub.f32 1.0, %v4742_v34  ;;  %v4620_v53 = vadd.f32 -0.28449672, %v4604_v27  ;;  %v4618_v54 = vadd.f32 -0.28449672, %v4602_v11  ;;  %v4605_v35 = vmul.f32 %v8467_v28, %v4589_v26 }
 0x4a1   : > { %v4792_v45 = vsub.f32 0.0, %v4760_v5  ;;  %v4761_v4 = vsub.f32 1.0, %v4745_v24  ;;  %v4743_v18 = vmul.f32 %v8429_v6, %v4663_v3  ;;  %vm4780_vm9 = vcmp.ge.f32.partialorder %v8371_v9, 0.0 }
 0x4a2   : > { %v4790_v36 = vsub.f32 0.0, %v4758_v32  ;;  %v4636_v46 = vmul.f32 %v8440_v56, %v4620_v53  ;;  %v4634_v0 = vmul.f32 %v8450_v38, %v4618_v54  ;;  %v4555_v17 = vadd.f32 -1.4531521, %v4539_v15 }
 0x4a3   : > { %v4808_v29 = vsel %vm4776_vm12, %v4760_v5, %v4792_v45  ;;  %v4793_v58 = vsub.f32 0.0, %v4761_v4  ;;  %v4759_v50 = vsub.f32 1.0, %v4743_v18  ;;  %v4621_v5 = vadd.f32 -0.28449672, %v4605_v35 }
 0x4a4   : > { %v4824_v57 = vadd.f32 1.0, %v4808_v29  ;;  %v4806_v2 = vsel %vm4774_vm13, %v4758_v32, %v4790_v36  ;;  %v4652_v1 = vadd.f32 0.2548296, %v4636_v46  ;;  %v4650_v6 = vadd.f32 0.2548296, %v4634_v0 }
 0x4a5   : > { %v4822_v34 = vadd.f32 1.0, %v4806_v2  ;;  %v4809_v8 = vsel %vm4777_vm15, %v4761_v4, %v4793_v58  ;;  %v4791_v32 = vsub.f32 0.0, %v4759_v50  ;;  %v8518_v22 = vpop.eup %6005  ;;  %v4637_v15 = vmul.f32 %v8467_v28, %v4621_v5 }
 0x4a6   : > { %v4840_v33 = vmul.f32 %v4824_v57, %v8369_v51  ;;  %v4668_v11 = vmul.f32 %v8440_v56, %v4652_v1  ;;  %v4825_v51 = vadd.f32 1.0, %v4809_v8  ;;  %v4666_v45 = vmul.f32 %v8450_v38, %v4650_v6  ;;  %v6050_v57 = vld [vmem:[%s6303_s0 + $0x40] sm:$0xff] }
 0x4a7   : > { %v4838_v27 = vmul.f32 %v4822_v34, %v8378_v42  ;;  %v4571_v42 = vmul.f32 %v8485_v12, %v4555_v17  ;;  %v4807_v61 = vsel %vm4775_vm0, %v4759_v50, %v4791_v32  ;;  %v4544_v24 = vmul.f32 1.0614054, %v8518_v22 }
 0x4a8   : > { %4856 = vst [vmem:[%s8521_s9 + $0x10] sm:$0xff] %v4840_v33  ;;  %v4748_v56 = vmul.f32 %v8476_v40, %v4668_v11  ;;  %v4704_v3 = vmul.f32 %v4688_v44, %v8458_v19  ;;  %v4841_v53 = vmul.f32 %v4825_v51, %v8381_v7  ;;  %v4823_v36 = vadd.f32 1.0, %v4807_v61  ;;  %v6051_v11 = vld [vmem:[%s6303_s0 + $0x58] sm:$0xff] }
 0x4a9   : > { %4854 = vst [vmem:[%s8521_s9] sm:$0xff] %v4838_v27  ;;  %v4746_v38 = vmul.f32 %v8480_v21, %v4666_v45  ;;  %v4653_v54 = vadd.f32 0.2548296, %v4637_v15  ;;  %v4587_v29 = vadd.f32 1.4214138, %v4571_v42  ;;  %v4560_v4 = vadd.f32 -1.4531521, %v4544_v24 }
 0x4aa   : > { %v4764_v26 = vsub.f32 1.0, %v4748_v56  ;;  %4857 = vst [vmem:[%s8521_s9 + $0x18] sm:$0xff] %v4841_v53  ;;  %v4839_v40 = vmul.f32 %v4823_v36, %v8405_v25  ;;  %v4730_v44 = vmul.f32 1.442695, %v4704_v3  ;;  %v8543_v2 = vadd.f32 %v6050_v57, %v4414_v39 }
 0x4ab   : > { %v4762_v18 = vsub.f32 1.0, %v4746_v38  ;;  %v4669_v19 = vmul.f32 %v8467_v28, %v4653_v54  ;;  %v4603_v46 = vmul.f32 %v8485_v12, %v4587_v29  ;;  %v4576_v21 = vmul.f32 %v8518_v22, %v4560_v4  ;;  %v6052_v29 = vld [vmem:[%s6303_s0 + $0x48] sm:$0xff] }
 0x4ac   : > { %v4796_v7 = vsub.f32 0.0, %v4764_v26  ;;  %4855 = vst [vmem:[%s8521_s9 + $0x8] sm:$0xff] %v4839_v40  ;;  %vm4778_vm10 = vcmp.ge.f32.partialorder %v8374_v20, 0.0  ;;  %v4397_v25 = vmul.f32 %v8359_v47, %v8319_v48  ;;  %6007 = vpow2.f32 %v4730_v44 }
 0x4ad   : > { %v4794_v0 = vsub.f32 0.0, %v4762_v18  ;;  %v4749_v60 = vmul.f32 %v8489_v13, %v4669_v19  ;;  %v4619_v35 = vadd.f32 -0.28449672, %v4603_v46  ;;  %v4592_v34 = vadd.f32 1.4214138, %v4576_v21 }
 0x4ae   : > { %v4812_v28 = vsel %vm4780_vm9, %v4764_v26, %v4796_v7  ;;  %v8553_v33 = vmul.f32 0.70710677, %v8543_v2  ;;  %v4417_v9 = vadd.f32 %v8324_v30, %v4397_v25  ;;  %vm4781_vm11 = vcmp.ge.f32.partialorder %v8391_v10, 0.0  ;;  %v6053_v7 = vld [vmem:[%s6303_s0 + $0x70] sm:$0xff] }
 0x4af   : > { %v4828_v58 = vadd.f32 1.0, %v4812_v28  ;;  %v4810_v50 = vsel %vm4778_vm10, %v4762_v18, %v4794_v0  ;;  %v4765_v1 = vsub.f32 1.0, %v4749_v60  ;;  %v4635_v13 = vmul.f32 %v8485_v12, %v4619_v35 }
 0x4b0   : > { %v4826_v20 = vadd.f32 1.0, %v4810_v50  ;;  %v4608_v47 = vmul.f32 %v8518_v22, %v4592_v34  ;;  %v8561_v17 = vand.u32 2147483647, %v8553_v33  ;;  %v8565_v51 = vadd.f32 %v6051_v11, %v4417_v9 }
 0x4b1   : > { %v4844_v6 = vmul.f32 %v4828_v58, %v8407_v59  ;;  %v4797_v5 = vsub.f32 0.0, %v4765_v1  ;;  %v4651_v8 = vadd.f32 0.2548296, %v4635_v13  ;;  %v4395_v59 = vmul.f32 %v8319_v48, %v8365_v41  ;;  %v6054_v58 = vld [vmem:[%s6303_s0 + $0x60] sm:$0xff] }
 0x4b2   : > { %v4842_v27 = vmul.f32 %v4826_v20, %v8443_v14  ;;  %v4624_v32 = vadd.f32 -0.28449672, %v4608_v47  ;;  %v4494_v15 = vmul.f32 0.3275911, %v8561_v17  ;;  %v4445_v10 = vmul.f32 0.5, %v8385_v43 }
 0x4b3   : > { %4860 = vst [vmem:[%s8521_s9 + $0x30] sm:$0xff] %v4844_v6  ;;  %v4813_v45 = vsel %vm4781_vm11, %v4765_v1, %v4797_v5  ;;  %v4667_v14 = vmul.f32 %v8485_v12, %v4651_v8  ;;  %v8576_v24 = vmul.f32 0.70710677, %v8565_v51  ;;  %v4415_v3 = vadd.f32 %v8324_v30, %v4395_v59 }
 0x4b4   : > { %4858 = vst [vmem:[%s8521_s9 + $0x20] sm:$0xff] %v4842_v27  ;;  %v4829_v42 = vadd.f32 1.0, %v4813_v45  ;;  %v4640_v61 = vmul.f32 %v8518_v22, %v4624_v32  ;;  %v4510_v56 = vadd.f32 1.0, %v4494_v15  ;;  %v4400_v38 = vmul.f32 %v8427_v37, %v8319_v48 }
 0x4b5   : > { %v4747_v36 = vmul.f32 %v8501_v55, %v4667_v14  ;;  %v4481_v43 = vand.u32 2147483647, %v8576_v24  ;;  %v8586_v4 = vadd.f32 %v6052_v29, %v4415_v3  ;;  %v4398_v55 = vmul.f32 %v8319_v48, %v8435_v52 }
 0x4b6   : > { %v4845_v53 = vmul.f32 %v4829_v42, %v4445_v10  ;;  %v4656_v41 = vadd.f32 0.2548296, %v4640_v61  ;;  %6009 = vrcp.f32 %v4510_v56  ;;  %v6008_v12 = vpop.eup %6007  ;;  %v4420_v39 = vadd.f32 %v8324_v30, %v4400_v38  ;;  %v6055_v61 = vld [vmem:[%s6303_s0 + $0x78] sm:$0xff] }
 0x4b7   : > { %v4763_v54 = vsub.f32 1.0, %v4747_v36  ;;  %v4497_v40 = vmul.f32 0.3275911, %v4481_v43  ;;  %v8592_v19 = vmul.f32 0.70710677, %v8586_v4  ;;  %vm4779_vm14 = vcmp.ge.f32.partialorder %v8397_v62, 0.0 }
 0x4b8   : > { %4861 = vst [vmem:[%s8521_s9 + $0x38] sm:$0xff] %v4845_v53  ;;  %v4672_v26 = vmul.f32 %v8518_v22, %v4656_v41  ;;  %v8596_v22 = vadd.f32 %v6053_v7, %v4420_v39  ;;  %v4418_v46 = vadd.f32 %v8324_v30, %v4398_v55  ;;  %v4443_v52 = vmul.f32 0.5, %v8388_v49 }
 0x4b9   : > { %v4795_v18 = vsub.f32 0.0, %v4763_v54  ;;  %v4513_v44 = vadd.f32 1.0, %v4497_v40  ;;  %v4479_v0 = vand.u32 2147483647, %v8592_v19  ;;  %v4686_v25 = vsub.f32 0.0, %v8561_v17 }
 0x4ba   : > { %v4752_v37 = vmul.f32 %v6008_v12, %v4672_v26  ;;  %v8603_v35 = vmul.f32 0.70710677, %v8596_v22  ;;  %vm4784_vm1 = vcmp.ge.f32.partialorder %v8446_v23, 0.0  ;;  %v8607_v50 = vadd.f32 %v6054_v58, %v4418_v46 }
 0x4bb   : > { %v4811_v21 = vsel %vm4779_vm14, %v4763_v54, %v4795_v18  ;;  %6011 = vrcp.f32 %v4513_v44  ;;  %v4495_v62 = vmul.f32 0.3275911, %v4479_v0  ;;  %v4401_v13 = vmul.f32 %v8438_v63, %v8319_v48 }
 0x4bc   : > { %v4768_v57 = vsub.f32 1.0, %v4752_v37  ;;  %v4827_v60 = vadd.f32 1.0, %v4811_v21  ;;  %v4484_v49 = vand.u32 2147483647, %v8603_v35  ;;  %v4448_v9 = vmul.f32 0.5, %v8433_v16 }
 0x4bd   : > { %v4511_v20 = vadd.f32 1.0, %v4495_v62  ;;  %v4702_v5 = vmul.f32 %v4686_v25, %v8561_v17  ;;  %v8618_v23 = vmul.f32 0.70710677, %v8607_v50  ;;  %v4689_v8 = vsub.f32 0.0, %v4481_v43 }
 0x4be   : > { %v4800_v28 = vsub.f32 0.0, %v4768_v57  ;;  %v4843_v34 = vmul.f32 %v4827_v60, %v4443_v52  ;;  %v4500_v32 = vmul.f32 0.3275911, %v4484_v49  ;;  %v4421_v16 = vadd.f32 %v8324_v30, %v4401_v13 }
 0x4bf   : > { %6013 = vrcp.f32 %v4511_v20  ;;  %v8622_v63 = vand.u32 2147483647, %v8618_v23  ;;  %v4726_v59 = vmul.f32 1.442695, %v4702_v5  ;;  %v4399_v10 = vmul.f32 %v8319_v48, %v8448_v31  ;;  %v6056_v48 = vld [vmem:[%s6303_s0 + $0x68] sm:$0xff]  ;;  %s5221_s0 = sshll.u32 %s6135_s21, 4 }
 0x4c0   : > { %v4816_v1 = vsel %vm4784_vm1, %v4768_v57, %v4800_v28  ;;  %v8612_v47 = vpop.eup %6009  ;;  %4859 = vst [vmem:[%s8521_s9 + $0x28] sm:$0xff] %v4843_v34  ;;  %v4516_v15 = vadd.f32 1.0, %v4500_v32  ;;  %v4705_v14 = vmul.f32 %v4689_v8, %v4481_v43  ;;  %v8631_v56 = vadd.f32 %v6055_v61, %v4421_v16  ;;  %s4884_s30 = sadd.s32 %s5221_s0, %s5195_s15 }
 0x4c1   : > { %v4832_v6 = vadd.f32 1.0, %v4816_v1  ;;  %v4542_v27 = vmul.f32 1.0614054, %v8612_v47  ;;  %v4498_v17 = vmul.f32 0.3275911, %v8622_v63  ;;  %v4687_v53 = vsub.f32 0.0, %v4479_v0 }
 0x4c2   : > { %6015 = vrcp.f32 %v4516_v15  ;;  %v4419_v41 = vadd.f32 %v8324_v30, %v4399_v10  ;;  %v8638_v54 = vmul.f32 0.70710677, %v8631_v56  ;;  %v4732_v29 = vmul.f32 1.442695, %v4705_v14  ;;  %s5196_s21 = sshll.u32 %s4884_s30, 7 }
 0x4c3   : > { %v4848_v11 = vmul.f32 %v4832_v6, %v4448_v9  ;;  %v4558_v45 = vadd.f32 -1.4531521, %v4542_v27  ;;  %v4514_v36 = vadd.f32 1.0, %v4498_v17  ;;  %6017 = vpow2.f32 %v4726_v59  ;;  %s8723_s26 = scalar_lea.hbm %s8787_s5, %s5196_s21 }
 0x4c4   : > { %v8641_v31 = vadd.f32 %v6056_v48, %v4419_v41  ;;  %v4703_v39 = vmul.f32 %v4687_v53, %v4479_v0  ;;  %v4692_v40 = vsub.f32 0.0, %v4484_v49  ;;  %v4485_v55 = vand.u32 2147483647, %v8638_v54 }
 0x4c5   : > { %4864 = vst [vmem:[%s8521_s9 + $0x50] sm:$0xff] %v4848_v11  ;;  %v4574_v42 = vmul.f32 %v8612_v47, %v4558_v45  ;;  %v8633_v3 = vpop.eup %6011  ;;  %6019 = vrcp.f32 %v4514_v36  ;;  %v4690_v1 = vsub.f32 0.0, %v8622_v63  ;;  %vm4782_vm2 = vcmp.ge.f32.partialorder %v8553_v33, 0.0 }
 0x4c6   : > { %v4545_v12 = vmul.f32 1.0614054, %v8633_v3  ;;  %v8649_v44 = vmul.f32 0.70710677, %v8641_v31  ;;  %v4501_v46 = vmul.f32 0.3275911, %v4485_v55  ;;  %6021 = vpow2.f32 %v4732_v29 }
 0x4c7   : > { %v4590_v38 = vadd.f32 1.4214138, %v4574_v42  ;;  %v4728_v60 = vmul.f32 1.442695, %v4703_v39  ;;  %v4708_v25 = vmul.f32 %v4692_v40, %v4484_v49  ;;  %v4706_v59 = vmul.f32 %v4690_v1, %v8622_v63 }
 0x4c8   : > { %v4561_v26 = vadd.f32 -1.4531521, %v4545_v12  ;;  %v8654_v0 = vand.u32 2147483647, %v8649_v44  ;;  %v4517_v28 = vadd.f32 1.0, %v4501_v46  ;;  %v4693_v42 = vsub.f32 0.0, %v4485_v55 }
 0x4c9   : > { %v4606_v43 = vmul.f32 %v8612_v47, %v4590_v38  ;;  %v8645_v30 = vpop.eup %6013  ;;  %v4738_v11 = vmul.f32 1.442695, %v4708_v25  ;;  %v4734_v63 = vmul.f32 1.442695, %v4706_v59  ;;  %vm4785_vm3 = vcmp.ge.f32.partialorder %v8576_v24, 0.0 }
 0x4ca   : > { %v4577_v37 = vmul.f32 %v8633_v3, %v4561_v26  ;;  %v4543_v7 = vmul.f32 1.0614054, %v8645_v30  ;;  %v4499_v20 = vmul.f32 0.3275911, %v8654_v0  ;;  %6023 = vrcp.f32 %v4517_v28 }
 0x4cb   : > { %v4622_v18 = vadd.f32 -0.28449672, %v4606_v43  ;;  %6025 = vpow2.f32 %v4728_v60  ;;  %v4709_v39 = vmul.f32 %v4693_v42, %v4485_v55  ;;  %v4691_v33 = vsub.f32 0.0, %v8654_v0 }
 0x4cc   : > { %v4593_v57 = vadd.f32 1.4214138, %v4577_v37  ;;  %v4559_v52 = vadd.f32 -1.4531521, %v4543_v7  ;;  %v8656_v62 = vpop.eup %6015  ;;  %v4515_v27 = vadd.f32 1.0, %v4499_v20  ;;  %v4446_v7 = vmul.f32 0.5, %v8543_v2 }
 0x4cd   : > { %v4638_v21 = vmul.f32 %v8612_v47, %v4622_v18  ;;  %v4548_v9 = vmul.f32 1.0614054, %v8656_v62  ;;  %v6018_v49 = vpop.eup %6017  ;;  %vm4783_vm4 = vcmp.ge.f32.partialorder %v8592_v19, 0.0  ;;  %vm4788_vm5 = vcmp.ge.f32.partialorder %v8603_v35, 0.0 }
 0x4ce   : > { %v4609_v58 = vmul.f32 %v8633_v3, %v4593_v57  ;;  %v4575_v13 = vmul.f32 %v8645_v30, %v4559_v52  ;;  %6027 = vrcp.f32 %v4515_v27  ;;  %vm4786_vm6 = vcmp.ge.f32.partialorder %v8618_v23, 0.0 }
 0x4cf   : > { %v4654_v34 = vadd.f32 0.2548296, %v4638_v21  ;;  %v4564_v32 = vadd.f32 -1.4531521, %v4548_v9  ;;  %v8664_v45 = vpop.eup %6019  ;;  %6029 = vpow2.f32 %v4738_v11  ;;  %v4707_v9 = vmul.f32 %v4691_v33, %v8654_v0 }
 0x4d0   : > { %v4625_v5 = vadd.f32 -0.28449672, %v4609_v58  ;;  %v4591_v8 = vadd.f32 1.4214138, %v4575_v13  ;;  %v6022_v38 = vpop.eup %6021  ;;  %6031 = vpow2.f32 %v4734_v63  ;;  %v4740_v58 = vmul.f32 1.442695, %v4709_v39 }
 0x4d1   : > { %v4670_v6 = vmul.f32 %v8612_v47, %v4654_v34  ;;  %v4580_v10 = vmul.f32 %v8656_v62, %v4564_v32  ;;  %v4546_v47 = vmul.f32 1.0614054, %v8664_v45  ;;  %v4452_v33 = vmul.f32 0.5, %v8596_v22 }
 0x4d2   : > { %v4641_v16 = vmul.f32 %v8633_v3, %v4625_v5  ;;  %v4607_v17 = vmul.f32 %v8645_v30, %v4591_v8  ;;  %6033 = vpow2.f32 %v4740_v58  ;;  %v4450_v22 = vmul.f32 0.5, %v8607_v50 }
 0x4d3   : > { %v4750_v15 = vmul.f32 %v6018_v49, %v4670_v6  ;;  %v4596_v36 = vadd.f32 1.4214138, %v4580_v10  ;;  %v4562_v41 = vadd.f32 -1.4531521, %v4546_v47  ;;  %v4736_v10 = vmul.f32 1.442695, %v4707_v9 }
 0x4d4   : > { %v4657_v61 = vadd.f32 0.2548296, %v4641_v16  ;;  %v4623_v53 = vadd.f32 -0.28449672, %v4607_v17  ;;  %v8677_v37 = vpop.eup %6023  ;;  %vm4789_vm7 = vcmp.ge.f32.partialorder %v8638_v54, 0.0  ;;  %v4453_v50 = vmul.f32 0.5, %v8631_v56 }
 0x4d5   : > { %v4766_v14 = vsub.f32 1.0, %v4750_v15  ;;  %v4612_v26 = vmul.f32 %v8656_v62, %v4596_v36  ;;  %v4578_v29 = vmul.f32 %v8664_v45, %v4562_v41  ;;  %v4549_v60 = vmul.f32 1.0614054, %v8677_v37  ;;  %v6026_v25 = vpop.eup %6025 }
 0x4d6   : > { %v4673_v48 = vmul.f32 %v8633_v3, %v4657_v61  ;;  %v4639_v43 = vmul.f32 %v8645_v30, %v4623_v53  ;;  %6035 = vpow2.f32 %v4736_v10  ;;  %vm4787_vm8 = vcmp.ge.f32.partialorder %v8649_v44, 0.0 }
 0x4d7   : > { %v4798_v12 = vsub.f32 0.0, %v4766_v14  ;;  %v4628_v3 = vadd.f32 -0.28449672, %v4612_v26  ;;  %v4594_v52 = vadd.f32 1.4214138, %v4578_v29 }
 0x4d8   : > { %v4753_v18 = vmul.f32 %v6022_v38, %v4673_v48  ;;  %v4655_v21 = vadd.f32 0.2548296, %v4639_v43  ;;  %v8683_v1 = vpop.eup %6027  ;;  %v4565_v13 = vadd.f32 -1.4531521, %v4549_v60 }
 0x4d9   : > { %v4814_v40 = vsel %vm4782_vm2, %v4766_v14, %v4798_v12  ;;  %v4644_v34 = vmul.f32 %v8656_v62, %v4628_v3  ;;  %v4610_v2 = vmul.f32 %v8664_v45, %v4594_v52  ;;  %v4547_v27 = vmul.f32 1.0614054, %v8683_v1  ;;  %v6030_v0 = vpop.eup %6029 }
 0x4da   : > { %v4830_v46 = vadd.f32 1.0, %v4814_v40  ;;  %v4769_v57 = vsub.f32 1.0, %v4753_v18  ;;  %v4671_v55 = vmul.f32 %v8645_v30, %v4655_v21  ;;  %v4449_v30 = vmul.f32 0.5, %v8565_v51  ;;  %v6032_v12 = vpop.eup %6031 }
 0x4db   : > { %v4660_v5 = vadd.f32 0.2548296, %v4644_v34  ;;  %v4626_v8 = vadd.f32 -0.28449672, %v4610_v2  ;;  %v4581_v32 = vmul.f32 %v8677_v37, %v4565_v13  ;;  %v4563_v59 = vadd.f32 -1.4531521, %v4547_v27 }
 0x4dc   : > { %v4846_v28 = vmul.f32 %v4830_v46, %v4446_v7  ;;  %v4801_v20 = vsub.f32 0.0, %v4769_v57  ;;  %v4751_v6 = vmul.f32 %v6026_v25, %v4671_v55  ;;  %v6034_v3 = vpop.eup %6033 }
 0x4dd   : > { %v4676_v16 = vmul.f32 %v8656_v62, %v4660_v5  ;;  %v4642_v17 = vmul.f32 %v8664_v45, %v4626_v8  ;;  %v4597_v24 = vadd.f32 1.4214138, %v4581_v32  ;;  %v4579_v51 = vmul.f32 %v8683_v1, %v4563_v59 }
 0x4de   : > { %4862 = vst [vmem:[%s8521_s9 + $0x40] sm:$0xff] %v4846_v28  ;;  %v4817_v49 = vsel %vm4785_vm3, %v4769_v57, %v4801_v20  ;;  %v4767_v15 = vsub.f32 1.0, %v4751_v6  ;;  %v4447_v62 = vmul.f32 0.5, %v8586_v4 }
 0x4df   : > { %v4833_v11 = vadd.f32 1.0, %v4817_v49  ;;  %v4756_v14 = vmul.f32 %v6030_v0, %v4676_v16  ;;  %v4658_v61 = vadd.f32 0.2548296, %v4642_v17  ;;  %v4613_v53 = vmul.f32 %v8677_v37, %v4597_v24 }
 0x4e0   : > { %v4799_v42 = vsub.f32 0.0, %v4767_v15  ;;  %v4595_v38 = vadd.f32 1.4214138, %v4579_v51  ;;  %v6036_v58 = vpop.eup %6035 }
 0x4e1   : > { %v4849_v47 = vmul.f32 %v4833_v11, %v4449_v30  ;;  %v4772_v41 = vsub.f32 1.0, %v4756_v14  ;;  %v4674_v63 = vmul.f32 %v8664_v45, %v4658_v61  ;;  %v4629_v43 = vadd.f32 -0.28449672, %v4613_v53 }
 0x4e2   : > { %v4815_v36 = vsel %vm4783_vm4, %v4767_v15, %v4799_v42  ;;  %v4611_v29 = vmul.f32 %v8683_v1, %v4595_v38  ;;  %v4451_v30 = vmul.f32 0.5, %v8641_v31 }
 0x4e3   : > { %4865 = vst [vmem:[%s8521_s9 + $0x58] sm:$0xff] %v4849_v47  ;;  %v4831_v48 = vadd.f32 1.0, %v4815_v36  ;;  %v4804_v26 = vsub.f32 0.0, %v4772_v41  ;;  %v4754_v39 = vmul.f32 %v6032_v12, %v4674_v63  ;;  %v4645_v4 = vmul.f32 %v8677_v37, %v4629_v43 }
 0x4e4   : > { %v4627_v18 = vadd.f32 -0.28449672, %v4611_v29 }
 0x4e5   : > { %v4847_v19 = vmul.f32 %v4831_v48, %v4447_v62  ;;  %v4820_v40 = vsel %vm4788_vm5, %v4772_v41, %v4804_v26  ;;  %v4770_v46 = vsub.f32 1.0, %v4754_v39  ;;  %v4661_v45 = vadd.f32 0.2548296, %v4645_v4 }
 0x4e6   : > { %v4836_v7 = vadd.f32 1.0, %v4820_v40  ;;  %v4643_v21 = vmul.f32 %v8683_v1, %v4627_v18 }
 0x4e7   : > { %4863 = vst [vmem:[%s8521_s9 + $0x48] sm:$0xff] %v4847_v19  ;;  %v4802_v52 = vsub.f32 0.0, %v4770_v46  ;;  %v4677_v35 = vmul.f32 %v8677_v37, %v4661_v45 }
 0x4e8   : > { %v4852_v57 = vmul.f32 %v4836_v7, %v4452_v33  ;;  %v4659_v60 = vadd.f32 0.2548296, %v4643_v21 }
 0x4e9   : > { %v4818_v25 = vsel %vm4786_vm6, %v4770_v46, %v4802_v52  ;;  %v4757_v28 = vmul.f32 %v6034_v3, %v4677_v35 }
 0x4ea   : > { %4868 = vst [vmem:[%s8521_s9 + $0x70] sm:$0xff] %v4852_v57  ;;  %v4834_v55 = vadd.f32 1.0, %v4818_v25  ;;  %v4675_v34 = vmul.f32 %v8683_v1, %v4659_v60 }
 0x4eb   : > { %v4773_v20 = vsub.f32 1.0, %v4757_v28 }
 0x4ec   : > { %v4850_v2 = vmul.f32 %v4834_v55, %v4450_v22  ;;  %v4755_v13 = vmul.f32 %v6036_v58, %v4675_v34 }
 0x4ed   : > { %v4805_v37 = vsub.f32 0.0, %v4773_v20 }
 0x4ee   : > { %4866 = vst [vmem:[%s8521_s9 + $0x60] sm:$0xff] %v4850_v2  ;;  %v4771_v23 = vsub.f32 1.0, %v4755_v13 }
 0x4ef   : > { %v4821_v9 = vsel %vm4789_vm7, %v4773_v20, %v4805_v37 }
 0x4f0   : > { %v4837_v1 = vadd.f32 1.0, %v4821_v9  ;;  %v4803_v6 = vsub.f32 0.0, %v4771_v23 }
 0x4f2   : > { %v4853_v5 = vmul.f32 %v4837_v1, %v4453_v50  ;;  %v4819_v27 = vsel %vm4787_vm8, %v4771_v23, %v4803_v6 }
 0x4f3   : > { %v4835_v49 = vadd.f32 1.0, %v4819_v27 }
 0x4f4   : > { %4869 = vst [vmem:[%s8521_s9 + $0x78] sm:$0xff] %v4853_v5 }
 0x4f5   : > { %v4851_v56 = vmul.f32 %v4835_v49, %v4451_v30 }
 0x4f7   : > { %4867 = vst [vmem:[%s8521_s9 + $0x68] sm:$0xff] %v4851_v56 }
 0x4f8   : > { %6070 = shalt.err (!%p6067_p11)
}
 0x4f9   : > { %s6071_s12 = scalar_lea.hbm %s8723_s26, 2048  ;;  %s6075_s15 = scalar_lea.hbm %s8787_s5, 8192 }
 0x4fa   : > { %p6072_p12 = scmp.ne.s32.totalorder %s8723_s26, %s6071_s12  ;;  %p6076_p1 = scmp.lt.u32.totalorder %s8723_s26, %s8787_s5 }
 0x4fb   : > { %p6077_p2 = scmp.lt.u32.totalorder %s6075_s15, %s6071_s12  ;;  %p6079_p5 = scmp.lt.u32.totalorder %s6071_s12, %s8723_s26 }
 0x4fc   : > { %p6073_p13 = pnand %p6072_p12, %p6237_p3 }
 0x4fd   : > { %p6078_p4 = por %p6077_p2, %p6076_p1 }
 0x4fe   : > { %p6074_p0 = pneg %p6073_p13 }
 0x4ff   : > { %p6080_p6 = por %p6079_p5, %p6078_p4 }
 0x501   : > { %p6081_p7 = pnand %p6080_p6, %p6074_p0 }
 0x503   : > { %6084 = shalt.err (!%p6081_p7)
}
 0x504   : > { %s6154_s8 = smov 128   ;;  %s6155_s10 = smov 8  }
 0x505   : > { %5644 = dma.vmem_to_hbm [thread:$0]  (%p6237_p3), %s8725_s22, 2048, %s8723_s26, %s8730_s13, %s6154_s8, %s6154_s8, %s6155_s10  }
 0x506 PF: > { %p5650_p9 = scmp.ge.s32.totalorder %s6151_s25, 2  ;;  %s4902_s14 = sand.u32 1, %s6123_s18  }
 0x507   : > { %s4903_s17 = scalar_lea.sflag [#allocation4], %s4902_s14 }
 0x508   : > { %p5647_p10 = pnand %p5650_p9, %p6246_p8 }
 0x50a   : > { %6118 = dma.done.wait (!%p5647_p10), %s4903_s17, 2048  }
 0x50b   : > { %6120 = vsyncadd (!%p5647_p10), %s4903_s17, 4294965248  ;;  %s18_s25 = sadd.s32 1, %s6151_s25   ;;  %s8827_s18 = smov %s6127_s19 }
 0x50c   : > { %p15_p11 = scmp.ge.s32.totalorder %s18_s25, 6   ;;  %s8828_s19 = smov %s6131_s20 }
 0x50d   : > { %s8829_s20 = smov %s6255_s11  ;;  %s8830_s21 = smov %s6143_s23 }
 0x50e   : > { %s8831_s22 = smov %s6147_s24  ;;  %s8832_s23 = smov %s8835_s28 }
 0x50f   : > { %s8833_s24 = smov %s8839_s29  ;;  %17 = sbr.rel (!%p15_p11) target bundleno = 7 (0x7), region = 80 }
 0x516   :  { %4908 = vsyncpa [#allocation4], 1 }
 0x517   :  { %4910 = vsyncpa [#allocation4 + $0x1], 1 }

</bundles_post_ra>
